<compile_context>
chip_gen: v7x
topology: tpu7x:2x2x1
jax: 0.10.0
libtpu: 0.0.40
codegen_flags: <defaults>
</compile_context>

<pallas_src>
import jax
import jax.numpy as jnp
from jax import lax
from jax.experimental import pallas as pl
from jax.experimental.pallas import tpu as pltpu

# ---- shapes implied by the module ------------------------------------------
B = 2                      # batch
CIN = 2                    # Conv1d in_channels
L = 1024                   # input length -> conv len 1017 -> pool len 508
KSZ = 8                    # conv kernel size
H = 64                     # conv out channels == LSTM hidden
G4 = 4 * H                 # 256, gate width
TCONV = L - KSZ + 1        # 1017
T = TCONV // 2             # 508   (conv position 1016 dropped by floor pool)
TPOOLIN = 2 * T            # 1016
FC_IN = T * H              # 32512 (matches nn.Linear(508*64, 512))
FC_OUT = 512
FC_IN_PAD = 32768          # FC reduction padded to a multiple of TK
TK = 2048                  # FC reduction tile  (16 steps)
TN = 256                   # FC output tile     (2 parallel tiles)


# ---- kernel 1: Conv1d(valid) + MaxPool1d(2,2) + layer-1 input projection ----
def conv_pool_proj_kernel(ce_ref, co_ref, w_ref, cb_ref, wih1_ref, b1_ref,
                          o_ref):
    # ce/co: (1, T, KSZ*CIN) im2col rows for even / odd conv positions
    # w: (KSZ*CIN, H) flattened conv weight; cb: (1, H)
    # wih1: (H, 4H) LSTM1 input weights; b1: (1, 4H) = b_ih + b_hh
    conv_e = jnp.dot(ce_ref[0], w_ref[...], preferred_element_type=jnp.float32)
    conv_o = jnp.dot(co_ref[0], w_ref[...], preferred_element_type=jnp.float32)
    # max(a+b, c+b) == max(a,c)+b (bias is per-channel), pool in registers
    pooled = jnp.maximum(conv_e, conv_o) + cb_ref[...]          # (T, H)
    # fused layer-1 input projection: z1 = pooled @ Wih1 + b1   (T, 4H)
    o_ref[0] = (jnp.dot(pooled, wih1_ref[...],
                        preferred_element_type=jnp.float32) + b1_ref[...])


def conv_pool_proj(cols_e, cols_o, w_flat, conv_b, wih1, b1):
    return pl.pallas_call(
        conv_pool_proj_kernel,
        out_shape=jax.ShapeDtypeStruct((B, T, G4), jnp.float32),
        grid=(B,),
        in_specs=[
            pl.BlockSpec((1, T, KSZ * CIN), lambda i: (i, 0, 0)),
            pl.BlockSpec((1, T, KSZ * CIN), lambda i: (i, 0, 0)),
            pl.BlockSpec((KSZ * CIN, H), lambda i: (0, 0)),
            pl.BlockSpec((1, H), lambda i: (0, 0)),
            pl.BlockSpec((H, G4), lambda i: (0, 0)),
            pl.BlockSpec((1, G4), lambda i: (0, 0)),
        ],
        out_specs=pl.BlockSpec((1, T, G4), lambda i: (i, 0, 0)),
        compiler_params=pltpu.CompilerParams(
            dimension_semantics=("parallel",)),
    )(cols_e, cols_o, w_flat, conv_b, wih1, b1)


# ---- kernel 2: fused 2-layer LSTM (PyTorch gate order i,f,g,o) --------------
def lstm2_kernel(z1_ref, whh1_ref, wih2_ref, whh2_ref, b2_ref, o_ref):
    # z1_ref: (T, B, 4H) precomputed layer-1 input projections (incl. b1)
    # whh1/wih2/whh2: (H, 4H); b2: (1, 4H) = b_ih + b_hh; o_ref: (T, B, H)
    b2 = b2_ref[...]                               # loop-invariant, tiny

    def step(t, carry):
        h1, c1, h2, c2 = carry
        # layer-2 recurrent term: independent of this step's layer-1 output
        r2 = jnp.dot(h2, whh2_ref[...],
                     preferred_element_type=jnp.float32) + b2
        # ---- layer 1 (input projection precomputed in the conv kernel) -----
        z1 = z1_ref[t] + jnp.dot(h1, whh1_ref[...],
                                 preferred_element_type=jnp.float32)
        i1 = jax.nn.sigmoid(z1[:, 0 * H:1 * H])
        f1 = jax.nn.sigmoid(z1[:, 1 * H:2 * H])
        g1 = jnp.tanh(z1[:, 2 * H:3 * H])
        o1 = jax.nn.sigmoid(z1[:, 3 * H:4 * H])
        c1n = f1 * c1 + i1 * g1
        h1n = o1 * jnp.tanh(c1n)
        # ---- layer 2 (dropout between layers is identity in eval mode) -----
        z2 = jnp.dot(h1n, wih2_ref[...],
                     preferred_element_type=jnp.float32) + r2
        i2 = jax.nn.sigmoid(z2[:, 0 * H:1 * H])
        f2 = jax.nn.sigmoid(z2[:, 1 * H:2 * H])
        g2 = jnp.tanh(z2[:, 2 * H:3 * H])
        o2 = jax.nn.sigmoid(z2[:, 3 * H:4 * H])
        c2n = f2 * c2 + i2 * g2
        h2n = o2 * jnp.tanh(c2n)
        o_ref[t] = h2n
        return (h1n, c1n, h2n, c2n)

    z = jnp.zeros((B, H), jnp.float32)
    lax.fori_loop(0, T, step, (z, z, z, z))


def lstm_stack(z1_tm, whh1, wih2, whh2, b2):
    return pl.pallas_call(
        lstm2_kernel,
        out_shape=jax.ShapeDtypeStruct((T, B, H), jnp.float32),
        grid=(1,),
        in_specs=[
            pl.BlockSpec((T, B, G4), lambda i: (0, 0, 0)),
            pl.BlockSpec((H, G4), lambda i: (0, 0)),
            pl.BlockSpec((H, G4), lambda i: (0, 0)),
            pl.BlockSpec((H, G4), lambda i: (0, 0)),
            pl.BlockSpec((1, G4), lambda i: (0, 0)),
        ],
        out_specs=pl.BlockSpec((T, B, H), lambda i: (0, 0, 0)),
        compiler_params=pltpu.CompilerParams(
            dimension_semantics=("arbitrary",),
            vmem_limit_bytes=32 * 1024 * 1024),
    )(z1_tm, whh1, wih2, whh2, b2)


# ---- kernel 3: fc_bottleneck (bf16 weight/activation, f32 accumulation) -----
def fc_kernel(x_ref, w_ref, b_ref, o_ref, acc_ref):
    k = pl.program_id(1)

    @pl.when(k == 0)
    def _():
        acc_ref[...] = jnp.zeros_like(acc_ref)

    acc_ref[...] += jnp.dot(x_ref[...], w_ref[...],
                            preferred_element_type=jnp.float32)

    @pl.when(k == pl.num_programs(1) - 1)
    def _():
        o_ref[...] = acc_ref[...] + b_ref[...]


def fc_bottleneck(flat_pad_bf16, w_pad_bf16, bias):
    return pl.pallas_call(
        fc_kernel,
        out_shape=jax.ShapeDtypeStruct((B, FC_OUT), jnp.float32),
        grid=(FC_OUT // TN, FC_IN_PAD // TK),          # (2, 16)
        in_specs=[
            pl.BlockSpec((B, TK), lambda j, k: (0, k)),
            pl.BlockSpec((TK, TN), lambda j, k: (k, j)),
            pl.BlockSpec((1, TN), lambda j, k: (0, j)),
        ],
        out_specs=pl.BlockSpec((B, TN), lambda j, k: (0, j)),
        scratch_shapes=[pltpu.VMEM((B, TN), jnp.float32)],
        compiler_params=pltpu.CompilerParams(
            dimension_semantics=("parallel", "arbitrary")),
    )(flat_pad_bf16, w_pad_bf16, bias)


# ---- parameters (deterministic, PyTorch-default-like uniform init) ---------
def init_params(key):
    ks = jax.random.split(key, 12)

    def unif(k, shape, bound):
        return jax.random.uniform(k, shape, jnp.float32, -bound, bound)

    cb = 1.0 / (CIN * KSZ) ** 0.5
    lb = 1.0 / H ** 0.5
    fb = 1.0 / FC_IN ** 0.5
    wfc = unif(ks[10], (FC_IN, FC_OUT), fb)            # torch fc weight.T
    # bf16 weight, zero-padded rows so the padded reduction contributes 0
    wfc_pad_bf16 = jnp.zeros((FC_IN_PAD, FC_OUT), jnp.bfloat16)
    wfc_pad_bf16 = wfc_pad_bf16.at[:FC_IN].set(wfc.astype(jnp.bfloat16))
    return dict(
        conv_w=unif(ks[0], (KSZ * CIN, H), cb),        # [k*CIN+c, o] = torch_w[o, c, k]
        conv_b=unif(ks[1], (1, H), cb),
        wih1=unif(ks[2], (H, G4), lb),                 # torch weight_ih_l0.T, gates [i,f,g,o]
        whh1=unif(ks[3], (H, G4), lb),
        b1=unif(ks[4], (1, G4), lb) + unif(ks[5], (1, G4), lb),   # b_ih + b_hh
        wih2=unif(ks[6], (H, G4), lb),
        whh2=unif(ks[7], (H, G4), lb),
        b2=unif(ks[8], (1, G4), lb) + unif(ks[9], (1, G4), lb),
        wfc=wfc,                                       # f32 copy (reference only)
        wfc_pad_bf16=wfc_pad_bf16,
        bfc=unif(ks[11], (1, FC_OUT), fb),
    )


# ---- full forward (Pallas kernels + cheap JAX layout glue) -------------------
@jax.jit
def cldnn_g_forward(x_ncl, p):
    x_nlc = jnp.transpose(x_ncl, (0, 2, 1))                    # NCL -> NLC
    # im2col "view" (layout plumbing only): cols[:, t, k*CIN+c] = x[:, t+k, c]
    cols = jnp.concatenate([x_nlc[:, k:k + TPOOLIN, :] for k in range(KSZ)],
                           axis=-1)                            # (B, 1016, 16)
    cols_e = cols[:, 0::2, :]                                  # even conv rows
    cols_o = cols[:, 1::2, :]                                  # odd  conv rows
    # conv + pool + layer-1 input projection   -> (B, T, 4H)
    z1 = conv_pool_proj(cols_e, cols_o, p["conv_w"], p["conv_b"],
                        p["wih1"], p["b1"])
    z1_tm = jnp.transpose(z1, (1, 0, 2))                       # (T, B, 4H)
    # fused 2-layer LSTM (dropout1/dropout2: identity, eval mode)
    h2 = lstm_stack(z1_tm, p["whh1"], p["wih2"], p["whh2"], p["b2"])  # (T,B,H)
    flat = jnp.transpose(h2, (1, 0, 2)).reshape(B, FC_IN)      # (B, T*H)
    flat_pad = jnp.pad(flat, ((0, 0), (0, FC_IN_PAD - FC_IN)))
    return fc_bottleneck(flat_pad.astype(jnp.bfloat16),
                         p["wfc_pad_bf16"], p["bfc"])


# ---- pure-JAX reference for verification ------------------------------------
@jax.jit
def reference_forward(x_ncl, p):
    x = jnp.transpose(x_ncl, (0, 2, 1))                        # (B, L, C)
    w = p["conv_w"].reshape(KSZ, CIN, H)
    conv = jnp.zeros((B, TPOOLIN, H), jnp.float32)
    for k in range(KSZ):
        conv = conv + jnp.einsum("blc,co->blo", x[:, k:k + TPOOLIN, :], w[k])
    conv = conv + p["conv_b"]
    pooled = jnp.maximum(conv[:, 0::2, :], conv[:, 1::2, :])   # (B, T, H)

    def lstm(seq, wih, whh, b):
        def step(carry, x_t):
            h, c = carry
            z = x_t @ wih + h @ whh + b
            i = jax.nn.sigmoid(z[:, :H])
            f = jax.nn.sigmoid(z[:, H:2 * H])
            g = jnp.tanh(z[:, 2 * H:3 * H])
            o = jax.nn.sigmoid(z[:, 3 * H:])
            c = f * c + i * g
            h = o * jnp.tanh(c)
            return (h, c), h
        init = (jnp.zeros((B, H), jnp.float32), jnp.zeros((B, H), jnp.float32))
        _, hs = lax.scan(step, init, jnp.swapaxes(seq, 0, 1))
        return jnp.swapaxes(hs, 0, 1)

    h1 = lstm(pooled, p["wih1"], p["whh1"], p["b1"])
    h2 = lstm(h1, p["wih2"], p["whh2"], p["b2"])
    # mirror the kernel's bf16 quantization of the FC inputs/weights
    flat_q = h2.reshape(B, FC_IN).astype(jnp.bfloat16).astype(jnp.float32)
    w_q = p["wfc"].astype(jnp.bfloat16).astype(jnp.float32)
    return flat_q @ w_q + p["bfc"]


if __name__ == "__main__":
    key = jax.random.PRNGKey(0)
    pkey, xkey = jax.random.split(key)
    params = init_params(pkey)
    x = jax.random.normal(xkey, (B, CIN, L), jnp.float32)      # PyTorch NCL input

    out = jax.block_until_ready(cldnn_g_forward(x, params))
    assert out.shape == (B, FC_OUT)

    ref = jax.block_until_ready(reference_forward(x, params))
    max_err = float(jnp.max(jnp.abs(out - ref)))
    assert max_err < 1e-2, f"mismatch vs reference: max abs err = {max_err}"

    print("KERNEL_OK")
</pallas_src>

<mosaic_0001>
module attributes {stable_mosaic.version = 11 : i64} {
  func.func @conv_pool_proj_kernel(%arg0: i32, %arg1: memref<1x508x16xf32, #tpu.memory_space<vmem>>, %arg2: memref<1x508x16xf32, #tpu.memory_space<vmem>>, %arg3: memref<16x64xf32, #tpu.memory_space<vmem>>, %arg4: memref<1x64xf32, #tpu.memory_space<vmem>>, %arg5: memref<64x256xf32, #tpu.memory_space<vmem>>, %arg6: memref<1x256xf32, #tpu.memory_space<vmem>>, %arg7: memref<1x508x256xf32, #tpu.memory_space<vmem>>) attributes {dimension_semantics = [#tpu.dimension_semantics<parallel>], iteration_bounds = array<i64: 2>, scalar_prefetch = 0 : i64, scratch_operands = 0 : i64, tpu.core_type = #tpu.core_type<tc>, window_params = [{transform_indices = @transform_0, window_bounds = array<i64: 1, 508, 16>}, {transform_indices = @transform_1, window_bounds = array<i64: 1, 508, 16>}, {pipeline_mode = #tpu.pipeline_mode<synchronous>, transform_indices = @transform_2, window_bounds = array<i64: 16, 64>}, {pipeline_mode = #tpu.pipeline_mode<synchronous>, transform_indices = @transform_3, window_bounds = array<i64: 1, 64>}, {pipeline_mode = #tpu.pipeline_mode<synchronous>, transform_indices = @transform_4, window_bounds = array<i64: 64, 256>}, {pipeline_mode = #tpu.pipeline_mode<synchronous>, transform_indices = @transform_5, window_bounds = array<i64: 1, 256>}, {transform_indices = @transform_6, window_bounds = array<i64: 1, 508, 256>}]} {
    %c0 = arith.constant 0 : index
    %c0_0 = arith.constant 0 : index
    %c0_1 = arith.constant 0 : index
    %0 = vector.load %arg1[%c0, %c0_0, %c0_1] : memref<1x508x16xf32, #tpu.memory_space<vmem>>, vector<1x508x16xf32>
    %1 = vector.shape_cast %0 : vector<1x508x16xf32> to vector<508x16xf32>
    %c0_2 = arith.constant 0 : index
    %c0_3 = arith.constant 0 : index
    %2 = vector.load %arg3[%c0_2, %c0_3] : memref<16x64xf32, #tpu.memory_space<vmem>>, vector<16x64xf32>
    %cst = arith.constant dense<0.000000e+00> : vector<508x64xf32>
    %3 = tpu.matmul %1, %2, %cst {dimension_numbers = #tpu.dot_dimension_numbers<[1], [0], [0], [1], [0, 0, 1, 1], [], []>} : vector<508x16xf32>, vector<16x64xf32>, vector<508x64xf32> -> vector<508x64xf32>
    %c0_4 = arith.constant 0 : index
    %c0_5 = arith.constant 0 : index
    %c0_6 = arith.constant 0 : index
    %4 = vector.load %arg2[%c0_4, %c0_5, %c0_6] : memref<1x508x16xf32, #tpu.memory_space<vmem>>, vector<1x508x16xf32>
    %5 = vector.shape_cast %4 : vector<1x508x16xf32> to vector<508x16xf32>
    %c0_7 = arith.constant 0 : index
    %c0_8 = arith.constant 0 : index
    %6 = vector.load %arg3[%c0_7, %c0_8] : memref<16x64xf32, #tpu.memory_space<vmem>>, vector<16x64xf32>
    %cst_9 = arith.constant dense<0.000000e+00> : vector<508x64xf32>
    %7 = tpu.matmul %5, %6, %cst_9 {dimension_numbers = #tpu.dot_dimension_numbers<[1], [0], [0], [1], [0, 0, 1, 1], [], []>} : vector<508x16xf32>, vector<16x64xf32>, vector<508x64xf32> -> vector<508x64xf32>
    %8 = arith.maximumf %3, %7 : vector<508x64xf32>
    %c0_10 = arith.constant 0 : index
    %c0_11 = arith.constant 0 : index
    %9 = vector.load %arg4[%c0_10, %c0_11] : memref<1x64xf32, #tpu.memory_space<vmem>>, vector<1x64xf32>
    %10 = vector.broadcast %9 : vector<1x64xf32> to vector<508x64xf32>
    %11 = arith.addf %8, %10 : vector<508x64xf32>
    %c0_12 = arith.constant 0 : index
    %c0_13 = arith.constant 0 : index
    %12 = vector.load %arg5[%c0_12, %c0_13] : memref<64x256xf32, #tpu.memory_space<vmem>>, vector<64x256xf32>
    %cst_14 = arith.constant dense<0.000000e+00> : vector<508x256xf32>
    %13 = tpu.matmul %11, %12, %cst_14 {dimension_numbers = #tpu.dot_dimension_numbers<[1], [0], [0], [1], [0, 0, 1, 1], [], []>} : vector<508x64xf32>, vector<64x256xf32>, vector<508x256xf32> -> vector<508x256xf32>
    %c0_15 = arith.constant 0 : index
    %c0_16 = arith.constant 0 : index
    %14 = vector.load %arg6[%c0_15, %c0_16] : memref<1x256xf32, #tpu.memory_space<vmem>>, vector<1x256xf32>
    %15 = vector.broadcast %14 : vector<1x256xf32> to vector<508x256xf32>
    %16 = arith.addf %13, %15 : vector<508x256xf32>
    %c0_17 = arith.constant 0 : index
    %c0_18 = arith.constant 0 : index
    %c0_19 = arith.constant 0 : index
    %17 = vector.load %arg7[%c0_17, %c0_18, %c0_19] : memref<1x508x256xf32, #tpu.memory_space<vmem>>, vector<1x508x256xf32>
    %18 = vector.shape_cast %17 : vector<1x508x256xf32> to vector<508x256xf32>
    %19 = vector.shape_cast %16 : vector<508x256xf32> to vector<1x508x256xf32>
    tpu.vector_store %arg7[%c0_17, %c0_18, %c0_19], %19 {strides = array<i32>} : memref<1x508x256xf32, #tpu.memory_space<vmem>>, vector<1x508x256xf32>,
    return
  }
  func.func @transform_0(%arg0: i32) -> (i32, i32, i32) {
    %c0_i32 = arith.constant 0 : i32
    %c0_i32_0 = arith.constant 0 : i32
    %c0_i32_1 = arith.constant 0 : i32
    return %arg0, %c0_i32, %c0_i32_0 : i32, i32, i32
  }
  func.func @transform_1(%arg0: i32) -> (i32, i32, i32) {
    %c0_i32 = arith.constant 0 : i32
    %c0_i32_0 = arith.constant 0 : i32
    %c0_i32_1 = arith.constant 0 : i32
    return %arg0, %c0_i32, %c0_i32_0 : i32, i32, i32
  }
  func.func @transform_2(%arg0: i32) -> (i32, i32) {
    %c0_i32 = arith.constant 0 : i32
    %c0_i32_0 = arith.constant 0 : i32
    %c0_i32_1 = arith.constant 0 : i32
    return %c0_i32, %c0_i32_0 : i32, i32
  }
  func.func @transform_3(%arg0: i32) -> (i32, i32) {
    %c0_i32 = arith.constant 0 : i32
    %c0_i32_0 = arith.constant 0 : i32
    %c0_i32_1 = arith.constant 0 : i32
    return %c0_i32, %c0_i32_0 : i32, i32
  }
  func.func @transform_4(%arg0: i32) -> (i32, i32) {
    %c0_i32 = arith.constant 0 : i32
    %c0_i32_0 = arith.constant 0 : i32
    %c0_i32_1 = arith.constant 0 : i32
    return %c0_i32, %c0_i32_0 : i32, i32
  }
  func.func @transform_5(%arg0: i32) -> (i32, i32) {
    %c0_i32 = arith.constant 0 : i32
    %c0_i32_0 = arith.constant 0 : i32
    %c0_i32_1 = arith.constant 0 : i32
    return %c0_i32, %c0_i32_0 : i32, i32
  }
  func.func @transform_6(%arg0: i32) -> (i32, i32, i32) {
    %c0_i32 = arith.constant 0 : i32
    %c0_i32_0 = arith.constant 0 : i32
    %c0_i32_1 = arith.constant 0 : i32
    return %arg0, %c0_i32, %c0_i32_0 : i32, i32, i32
  }
}

module attributes {stable_mosaic.version = 11 : i64} {
  func.func @lstm2_kernel(%arg0: i32, %arg1: memref<508x2x256xf32, #tpu.memory_space<vmem>>, %arg2: memref<64x256xf32, #tpu.memory_space<vmem>>, %arg3: memref<64x256xf32, #tpu.memory_space<vmem>>, %arg4: memref<64x256xf32, #tpu.memory_space<vmem>>, %arg5: memref<1x256xf32, #tpu.memory_space<vmem>>, %arg6: memref<508x2x64xf32, #tpu.memory_space<vmem>>) attributes {dimension_semantics = [#tpu.dimension_semantics<arbitrary>], iteration_bounds = array<i64: 1>, scalar_prefetch = 0 : i64, scratch_operands = 0 : i64, tpu.core_type = #tpu.core_type<tc>, window_params = [{pipeline_mode = #tpu.pipeline_mode<synchronous>, transform_indices = @transform_0, window_bounds = array<i64: 508, 2, 256>}, {pipeline_mode = #tpu.pipeline_mode<synchronous>, transform_indices = @transform_1, window_bounds = array<i64: 64, 256>}, {pipeline_mode = #tpu.pipeline_mode<synchronous>, transform_indices = @transform_2, window_bounds = array<i64: 64, 256>}, {pipeline_mode = #tpu.pipeline_mode<synchronous>, transform_indices = @transform_3, window_bounds = array<i64: 64, 256>}, {pipeline_mode = #tpu.pipeline_mode<synchronous>, transform_indices = @transform_4, window_bounds = array<i64: 1, 256>}, {pipeline_mode = #tpu.pipeline_mode<synchronous>, transform_indices = @transform_5, window_bounds = array<i64: 508, 2, 64>}]} {
    %c0 = arith.constant 0 : index
    %c0_0 = arith.constant 0 : index
    %0 = vector.load %arg5[%c0, %c0_0] : memref<1x256xf32, #tpu.memory_space<vmem>>, vector<1x256xf32>
    %cst = arith.constant 0.000000e+00 : f32
    %1 = vector.broadcast %cst : f32 to vector<2x64xf32>
    %c0_i32 = arith.constant 0 : i32
    %c508_i32 = arith.constant 508 : i32
    %2 = arith.addi %c0_i32, %c508_i32 : i32
    %c1_i32 = arith.constant 1 : i32
    %3:4 = scf.for %arg7 = %c0_i32 to %2 step %c1_i32 iter_args(%arg8 = %1, %arg9 = %1, %arg10 = %1, %arg11 = %1) -> (vector<2x64xf32>, vector<2x64xf32>, vector<2x64xf32>, vector<2x64xf32>)  : i32 {
      %c0_2 = arith.constant 0 : index
      %c0_3 = arith.constant 0 : index
      %4 = vector.load %arg4[%c0_2, %c0_3] : memref<64x256xf32, #tpu.memory_space<vmem>>, vector<64x256xf32>
      %cst_4 = arith.constant dense<0.000000e+00> : vector<2x256xf32>
      %5 = tpu.matmul %arg10, %4, %cst_4 {dimension_numbers = #tpu.dot_dimension_numbers<[1], [0], [0], [1], [0, 0, 1, 1], [], []>} : vector<2x64xf32>, vector<64x256xf32>, vector<2x256xf32> -> vector<2x256xf32>
      %6 = vector.broadcast %0 : vector<1x256xf32> to vector<2x256xf32>
      %7 = arith.addf %5, %6 : vector<2x256xf32>
      %8 = arith.index_cast %arg7 : i32 to index
      %c0_5 = arith.constant 0 : index
      %c0_6 = arith.constant 0 : index
      %9 = vector.load %arg1[%8, %c0_5, %c0_6] : memref<508x2x256xf32, #tpu.memory_space<vmem>>, vector<1x2x256xf32>
      %10 = vector.shape_cast %9 : vector<1x2x256xf32> to vector<2x256xf32>
      %c0_7 = arith.constant 0 : index
      %c0_8 = arith.constant 0 : index
      %11 = vector.load %arg2[%c0_7, %c0_8] : memref<64x256xf32, #tpu.memory_space<vmem>>, vector<64x256xf32>
      %cst_9 = arith.constant dense<0.000000e+00> : vector<2x256xf32>
      %12 = tpu.matmul %arg8, %11, %cst_9 {dimension_numbers = #tpu.dot_dimension_numbers<[1], [0], [0], [1], [0, 0, 1, 1], [], []>} : vector<2x64xf32>, vector<64x256xf32>, vector<2x256xf32> -> vector<2x256xf32>
      %13 = arith.addf %10, %12 : vector<2x256xf32>
      %14 = vector.extract_strided_slice %13 {offsets = [0, 0], sizes = [2, 64], strides = [1, 1]} : vector<2x256xf32> to vector<2x64xf32>
      %15 = arith.negf %14 : vector<2x64xf32>
      %16 = math.exp %15 : vector<2x64xf32>
      %cst_10 = arith.constant 1.000000e+00 : f32
      %17 = vector.broadcast %cst_10 : f32 to vector<2x64xf32>
      %18 = arith.addf %17, %16 : vector<2x64xf32>
      %19 = arith.divf %17, %18 : vector<2x64xf32>
      %20 = vector.extract_strided_slice %13 {offsets = [0, 64], sizes = [2, 64], strides = [1, 1]} : vector<2x256xf32> to vector<2x64xf32>
      %21 = arith.negf %20 : vector<2x64xf32>
      %22 = math.exp %21 : vector<2x64xf32>
      %cst_11 = arith.constant 1.000000e+00 : f32
      %23 = vector.broadcast %cst_11 : f32 to vector<2x64xf32>
      %24 = arith.addf %23, %22 : vector<2x64xf32>
      %25 = arith.divf %23, %24 : vector<2x64xf32>
      %26 = vector.extract_strided_slice %13 {offsets = [0, 128], sizes = [2, 64], strides = [1, 1]} : vector<2x256xf32> to vector<2x64xf32>
      %27 = math.tanh %26 : vector<2x64xf32>
      %28 = vector.extract_strided_slice %13 {offsets = [0, 192], sizes = [2, 64], strides = [1, 1]} : vector<2x256xf32> to vector<2x64xf32>
      %29 = arith.negf %28 : vector<2x64xf32>
      %30 = math.exp %29 : vector<2x64xf32>
      %cst_12 = arith.constant 1.000000e+00 : f32
      %31 = vector.broadcast %cst_12 : f32 to vector<2x64xf32>
      %32 = arith.addf %31, %30 : vector<2x64xf32>
      %33 = arith.divf %31, %32 : vector<2x64xf32>
      %34 = arith.mulf %25, %arg9 : vector<2x64xf32>
      %35 = arith.mulf %19, %27 : vector<2x64xf32>
      %36 = arith.addf %34, %35 : vector<2x64xf32>
      %37 = math.tanh %36 : vector<2x64xf32>
      %38 = arith.mulf %33, %37 : vector<2x64xf32>
      %c0_13 = arith.constant 0 : index
      %c0_14 = arith.constant 0 : index
      %39 = vector.load %arg3[%c0_13, %c0_14] : memref<64x256xf32, #tpu.memory_space<vmem>>, vector<64x256xf32>
      %cst_15 = arith.constant dense<0.000000e+00> : vector<2x256xf32>
      %40 = tpu.matmul %38, %39, %cst_15 {dimension_numbers = #tpu.dot_dimension_numbers<[1], [0], [0], [1], [0, 0, 1, 1], [], []>} : vector<2x64xf32>, vector<64x256xf32>, vector<2x256xf32> -> vector<2x256xf32>
      %41 = arith.addf %40, %7 : vector<2x256xf32>
      %42 = vector.extract_strided_slice %41 {offsets = [0, 0], sizes = [2, 64], strides = [1, 1]} : vector<2x256xf32> to vector<2x64xf32>
      %43 = arith.negf %42 : vector<2x64xf32>
      %44 = math.exp %43 : vector<2x64xf32>
      %cst_16 = arith.constant 1.000000e+00 : f32
      %45 = vector.broadcast %cst_16 : f32 to vector<2x64xf32>
      %46 = arith.addf %45, %44 : vector<2x64xf32>
      %47 = arith.divf %45, %46 : vector<2x64xf32>
      %48 = vector.extract_strided_slice %41 {offsets = [0, 64], sizes = [2, 64], strides = [1, 1]} : vector<2x256xf32> to vector<2x64xf32>
      %49 = arith.negf %48 : vector<2x64xf32>
      %50 = math.exp %49 : vector<2x64xf32>
      %cst_17 = arith.constant 1.000000e+00 : f32
      %51 = vector.broadcast %cst_17 : f32 to vector<2x64xf32>
      %52 = arith.addf %51, %50 : vector<2x64xf32>
      %53 = arith.divf %51, %52 : vector<2x64xf32>
      %54 = vector.extract_strided_slice %41 {offsets = [0, 128], sizes = [2, 64], strides = [1, 1]} : vector<2x256xf32> to vector<2x64xf32>
      %55 = math.tanh %54 : vector<2x64xf32>
      %56 = vector.extract_strided_slice %41 {offsets = [0, 192], sizes = [2, 64], strides = [1, 1]} : vector<2x256xf32> to vector<2x64xf32>
      %57 = arith.negf %56 : vector<2x64xf32>
      %58 = math.exp %57 : vector<2x64xf32>
      %cst_18 = arith.constant 1.000000e+00 : f32
      %59 = vector.broadcast %cst_18 : f32 to vector<2x64xf32>
      %60 = arith.addf %59, %58 : vector<2x64xf32>
      %61 = arith.divf %59, %60 : vector<2x64xf32>
      %62 = arith.mulf %53, %arg11 : vector<2x64xf32>
      %63 = arith.mulf %47, %55 : vector<2x64xf32>
      %64 = arith.addf %62, %63 : vector<2x64xf32>
      %65 = math.tanh %64 : vector<2x64xf32>
      %66 = arith.mulf %61, %65 : vector<2x64xf32>
      %67 = arith.index_cast %arg7 : i32 to index
      %c0_19 = arith.constant 0 : index
      %c0_20 = arith.constant 0 : index
      %68 = vector.load %arg6[%67, %c0_19, %c0_20] : memref<508x2x64xf32, #tpu.memory_space<vmem>>, vector<1x2x64xf32>
      %69 = vector.shape_cast %68 : vector<1x2x64xf32> to vector<2x64xf32>
      %70 = vector.shape_cast %66 : vector<2x64xf32> to vector<1x2x64xf32>
      tpu.vector_store %arg6[%67, %c0_19, %c0_20], %70 {strides = array<i32>} : memref<508x2x64xf32, #tpu.memory_space<vmem>>, vector<1x2x64xf32>,
      scf.yield %38, %36, %66, %64 : vector<2x64xf32>, vector<2x64xf32>, vector<2x64xf32>, vector<2x64xf32>
    }
    %c508_i32_1 = arith.constant 508 : i32
    return
  }
  func.func @transform_0(%arg0: i32) -> (i32, i32, i32) {
    %c0_i32 = arith.constant 0 : i32
    %c0_i32_0 = arith.constant 0 : i32
    %c0_i32_1 = arith.constant 0 : i32
    %c0_i32_2 = arith.constant 0 : i32
    return %c0_i32, %c0_i32_0, %c0_i32_1 : i32, i32, i32
  }
  func.func @transform_1(%arg0: i32) -> (i32, i32) {
    %c0_i32 = arith.constant 0 : i32
    %c0_i32_0 = arith.constant 0 : i32
    %c0_i32_1 = arith.constant 0 : i32
    return %c0_i32, %c0_i32_0 : i32, i32
  }
  func.func @transform_2(%arg0: i32) -> (i32, i32) {
    %c0_i32 = arith.constant 0 : i32
    %c0_i32_0 = arith.constant 0 : i32
    %c0_i32_1 = arith.constant 0 : i32
    return %c0_i32, %c0_i32_0 : i32, i32
  }
  func.func @transform_3(%arg0: i32) -> (i32, i32) {
    %c0_i32 = arith.constant 0 : i32
    %c0_i32_0 = arith.constant 0 : i32
    %c0_i32_1 = arith.constant 0 : i32
    return %c0_i32, %c0_i32_0 : i32, i32
  }
  func.func @transform_4(%arg0: i32) -> (i32, i32) {
    %c0_i32 = arith.constant 0 : i32
    %c0_i32_0 = arith.constant 0 : i32
    %c0_i32_1 = arith.constant 0 : i32
    return %c0_i32, %c0_i32_0 : i32, i32
  }
  func.func @transform_5(%arg0: i32) -> (i32, i32, i32) {
    %c0_i32 = arith.constant 0 : i32
    %c0_i32_0 = arith.constant 0 : i32
    %c0_i32_1 = arith.constant 0 : i32
    %c0_i32_2 = arith.constant 0 : i32
    return %c0_i32, %c0_i32_0, %c0_i32_1 : i32, i32, i32
  }
}

module attributes {stable_mosaic.version = 11 : i64} {
  func.func @fc_kernel(%arg0: i32, %arg1: i32, %arg2: memref<2x2048xbf16, #tpu.memory_space<vmem>>, %arg3: memref<2048x256xbf16, #tpu.memory_space<vmem>>, %arg4: memref<1x256xf32, #tpu.memory_space<vmem>>, %arg5: memref<2x256xf32, #tpu.memory_space<vmem>>, %arg6: memref<2x256xf32, #tpu.memory_space<vmem>>) attributes {dimension_semantics = [#tpu.dimension_semantics<parallel>, #tpu.dimension_semantics<arbitrary>], iteration_bounds = array<i64: 2, 16>, scalar_prefetch = 0 : i64, scratch_operands = 1 : i64, tpu.core_type = #tpu.core_type<tc>, window_params = [{transform_indices = @transform_0, window_bounds = array<i64: 2, 2048>}, {transform_indices = @transform_1, window_bounds = array<i64: 2048, 256>}, {transform_indices = @transform_2, window_bounds = array<i64: 1, 256>}, {transform_indices = @transform_3, window_bounds = array<i64: 2, 256>}]} {
    %c0_i32 = arith.constant 0 : i32
    %0 = arith.cmpi eq, %arg1, %c0_i32 : i32
    %1 = arith.extui %0 : i1 to i32
    %c0_i32_0 = arith.constant 0 : i32
    %2 = arith.cmpi ne, %1, %c0_i32_0 : i32
    scf.if %2 {
      %cst_9 = arith.constant 0.000000e+00 : f32
      %12 = vector.broadcast %cst_9 : f32 to vector<2x256xf32>
      %c0_10 = arith.constant 0 : index
      %c0_11 = arith.constant 0 : index
      %13 = vector.load %arg6[%c0_10, %c0_11] : memref<2x256xf32, #tpu.memory_space<vmem>>, vector<2x256xf32>
      tpu.vector_store %arg6[%c0_10, %c0_11], %12 {strides = array<i32>} : memref<2x256xf32, #tpu.memory_space<vmem>>, vector<2x256xf32>,
    } else {
    }
    %c0 = arith.constant 0 : index
    %c0_1 = arith.constant 0 : index
    %3 = vector.load %arg6[%c0, %c0_1] : memref<2x256xf32, #tpu.memory_space<vmem>>, vector<2x256xf32>
    %c0_2 = arith.constant 0 : index
    %c0_3 = arith.constant 0 : index
    %4 = vector.load %arg2[%c0_2, %c0_3] : memref<2x2048xbf16, #tpu.memory_space<vmem>>, vector<2x2048xbf16>
    %c0_4 = arith.constant 0 : index
    %c0_5 = arith.constant 0 : index
    %5 = vector.load %arg3[%c0_4, %c0_5] : memref<2048x256xbf16, #tpu.memory_space<vmem>>, vector<2048x256xbf16>
    %cst = arith.constant dense<0.000000e+00> : vector<2x256xf32>
    %6 = tpu.matmul %4, %5, %cst {dimension_numbers = #tpu.dot_dimension_numbers<[1], [0], [0], [1], [0, 0, 1, 1], [], []>} : vector<2x2048xbf16>, vector<2048x256xbf16>, vector<2x256xf32> -> vector<2x256xf32>
    %7 = arith.addf %3, %6 : vector<2x256xf32>
    %c0_6 = arith.constant 0 : index
    %c0_7 = arith.constant 0 : index
    %8 = vector.load %arg6[%c0_6, %c0_7] : memref<2x256xf32, #tpu.memory_space<vmem>>, vector<2x256xf32>
    tpu.vector_store %arg6[%c0_6, %c0_7], %7 {strides = array<i32>} : memref<2x256xf32, #tpu.memory_space<vmem>>, vector<2x256xf32>,
    %c15_i32 = arith.constant 15 : i32
    %9 = arith.cmpi eq, %arg1, %c15_i32 : i32
    %10 = arith.extui %9 : i1 to i32
    %c0_i32_8 = arith.constant 0 : i32
    %11 = arith.cmpi ne, %10, %c0_i32_8 : i32
    scf.if %11 {
      %c0_9 = arith.constant 0 : index
      %c0_10 = arith.constant 0 : index
      %12 = vector.load %arg6[%c0_9, %c0_10] : memref<2x256xf32, #tpu.memory_space<vmem>>, vector<2x256xf32>
      %c0_11 = arith.constant 0 : index
      %c0_12 = arith.constant 0 : index
      %13 = vector.load %arg4[%c0_11, %c0_12] : memref<1x256xf32, #tpu.memory_space<vmem>>, vector<1x256xf32>
      %14 = vector.broadcast %13 : vector<1x256xf32> to vector<2x256xf32>
      %15 = arith.addf %12, %14 : vector<2x256xf32>
      %c0_13 = arith.constant 0 : index
      %c0_14 = arith.constant 0 : index
      %16 = vector.load %arg5[%c0_13, %c0_14] : memref<2x256xf32, #tpu.memory_space<vmem>>, vector<2x256xf32>
      tpu.vector_store %arg5[%c0_13, %c0_14], %15 {strides = array<i32>} : memref<2x256xf32, #tpu.memory_space<vmem>>, vector<2x256xf32>,
    } else {
    }
    return
  }
  func.func @transform_0(%arg0: i32, %arg1: i32) -> (i32, i32) {
    %c0_i32 = arith.constant 0 : i32
    %c0_i32_0 = arith.constant 0 : i32
    return %c0_i32, %arg1 : i32, i32
  }
  func.func @transform_1(%arg0: i32, %arg1: i32) -> (i32, i32) {
    %c0_i32 = arith.constant 0 : i32
    return %arg1, %arg0 : i32, i32
  }
  func.func @transform_2(%arg0: i32, %arg1: i32) -> (i32, i32) {
    %c0_i32 = arith.constant 0 : i32
    %c0_i32_0 = arith.constant 0 : i32
    return %c0_i32, %arg0 : i32, i32
  }
  func.func @transform_3(%arg0: i32, %arg1: i32) -> (i32, i32) {
    %c0_i32 = arith.constant 0 : i32
    %c0_i32_0 = arith.constant 0 : i32
    return %c0_i32, %arg0 : i32, i32
  }
}

</mosaic_0001>

<bundles_post_ra>
// kernel: cldnn_g_forward.3
= control target key start
LH: loop header
LB: loop body
LE: loop exit
PB: predicated region body
PF: predicated region fallthrough
CT: control target
= control target key end

     0   :  { %11 = vsyncpa [#allocation3], 0  ;;  %s4672_s0 = inlined_call_operand.vmem [shape: f32[2,508,16], index: 0, kind: input, shape index: {}]   ;;  %s4673_s1 = inlined_call_operand.vmem [shape: f32[2,508,16], index: 1, kind: input, shape index: {}]   ;;  %s4674_s2 = inlined_call_operand.hbm [shape: f32[16,64], index: 2, kind: input, shape index: {}]   ;;  %s4675_s3 = inlined_call_operand.hbm [shape: f32[1,64], index: 3, kind: input, shape index: {}]   ;;  %s4676_s4 = inlined_call_operand.hbm [shape: f32[64,256], index: 4, kind: input, shape index: {}]   ;;  %s4677_s5 = inlined_call_operand.hbm [shape: f32[1,256], index: 5, kind: input, shape index: {}]   ;;  %s4678_s6 = inlined_call_operand.vmem [shape: f32[2,508,256], index: 6, kind: output, shape index: {}]  }
   0x1   :  { %12 = vsyncpa [#allocation5], 0 }
   0x2   :  { %13 = vsyncpa [#allocation8], 0  ;;  %s3464_s21 = smov 0  }
   0x3 LB: > { %s3420_s22 = smov [#allocation4]   ;;  %s3470_s24 = sadd.s32 4294967295, %s3418_s21   ;;  %s3418_s21 = sphi %s3464_s21, %s19_s21  }
   0x4   : > { %s212_s23 = sshll.u32 %s3420_s22, 4  ;;  %p2655_p0 = scmp.ge.s32.totalorder %s3418_s21, 1  ;;  %s213_s23 = int_to_ptr.vmem [resolvable:$true] %s212_s23 }
   0x5   : > { %p186_p1 = scmp.lt.s32.totalorder %s3418_s21, 3  ;;  %p4679_p2 = scmp.eq.s32.totalorder %s3470_s24, 0 }
   0x6   : > { %s3421_s26 = smov [#allocation2]   ;;  %s3422_s29 = smov [#allocation6]  }
   0x7   : > { %p3475_p3 = pnand %p2655_p0, %p186_p1  ;;  %s198_s27 = sshll.u32 %s3421_s26, 4  ;;  %s3481_s27 = int_to_ptr.vmem [resolvable:$true] %s198_s27 }
   0x8   : > { %s222_s30 = sshll.u32 %s3422_s29, 4  ;;  %s3288_s9 = scalar_lea.hbm %s4675_s3, 16  ;;  %s3489_s30 = int_to_ptr.vmem [resolvable:$true] %s222_s30 }
   0x9   : > { %s4681_s25 = scalar_select %p3475_p3, 1, 0 }
   0xa   : > { %p3250_p4 = pneg %p3475_p3  ;;  %p3289_p6 = scmp.ne.s32.totalorder %s4675_s3, %s3288_s9 }
   0xb   : > { %p3295_p10 = scmp.lt.u32.totalorder %s3288_s9, %s4675_s3 }
   0xc   : > { %p3485_p5 = pnand %p4679_p2, %p3250_p4 }
   0xe   : > { %p3499_p7 = pneg %p3485_p5 }
  0x10   : > { %p3291_p8 = pnand %p3499_p7, %p3289_p6 }
  0x12   : > { %p3292_p9 = pneg %p3291_p8 }
  0x14   : > { %p3297_p11 = pnand %p3295_p10, %p3292_p9 }
  0x16   : > { %3300 = shalt.err (!%p3297_p11)
}
  0x17   : > { %s3301_s15 = scalar_lea.vmem %s213_s23, 16  ;;  %s3308_s16 = scalar_lea.vmem %s213_s23, 32 }
  0x18   : > { %p3302_p12 = scmp.ne.s32.totalorder %s213_s23, %s3301_s15  ;;  %p3309_p1 = scmp.lt.s32.totalorder %s213_s23, %s213_s23 }
  0x19   : > { %p3310_p4 = scmp.lt.s32.totalorder %s3308_s16, %s3301_s15 }
  0x1a   : > { %p3304_p13 = pnand %p3302_p12, %p3499_p7 }
  0x1b   : > { %p3311_p2 = por %p3310_p4, %p3309_p1 }
  0x1c   : > { %p3305_p0 = pneg %p3304_p13 }
  0x1e   : > { %p3312_p3 = pnand %p3311_p2, %p3305_p0 }
  0x20   : > { %3315 = shalt.err (!%p3312_p3)
}
  0x21   : > { %3256 = dma.hbm_to_vmem [thread:$0]  (!%p3485_p5), %s4675_s3, 16, %s213_s23, [#allocation5]  }
  0x22   : > { %s3316_s22 = scalar_lea.hbm %s4674_s2, 256 }
  0x23   : > { %p3317_p6 = scmp.ne.s32.totalorder %s4674_s2, %s3316_s22  ;;  %p3323_p2 = scmp.lt.u32.totalorder %s3316_s22, %s4674_s2 }
  0x25   : > { %p3319_p8 = pnand %p3317_p6, %p3499_p7 }
  0x27   : > { %p3320_p9 = pneg %p3319_p8 }
  0x29   : > { %p3325_p3 = pnand %p3323_p2, %p3320_p9 }
  0x2b   : > { %3328 = shalt.err (!%p3325_p3)
}
  0x2c   : > { %s3329_s23 = scalar_lea.vmem %s3481_s27, 256  ;;  %p3337_p13 = scmp.lt.s32.totalorder %s3481_s27, %s3481_s27 }
  0x2d   : > { %p3330_p10 = scmp.ne.s32.totalorder %s3481_s27, %s3329_s23  ;;  %p3338_p0 = scmp.lt.s32.totalorder %s3329_s23, %s3329_s23 }
  0x2f   : > { %p3332_p11 = pnand %p3330_p10, %p3499_p7  ;;  %p3339_p1 = por %p3338_p0, %p3337_p13 }
  0x31   : > { %p3333_p12 = pneg %p3332_p11 }
  0x33   : > { %p3340_p4 = pnand %p3339_p1, %p3333_p12 }
  0x35   : > { %3343 = shalt.err (!%p3340_p4)
}
  0x36   : > { %s3423_s9 = smov 128   ;;  %s3424_s10 = smov 8  }
  0x37   : > { %3253 = dma.hbm_to_vmem [thread:$0]  (!%p3485_p5), %s4674_s2, 256, %s3481_s27, [#allocation3], %s3423_s9, %s3423_s9, %s3424_s10  }
  0x38   : > { %s3344_s16 = scalar_lea.hbm %s4676_s4, 2048 }
  0x39   : > { %p3345_p6 = scmp.ne.s32.totalorder %s4676_s4, %s3344_s16  ;;  %p3351_p2 = scmp.lt.u32.totalorder %s3344_s16, %s4676_s4 }
  0x3b   : > { %p3347_p8 = pnand %p3345_p6, %p3499_p7 }
  0x3d   : > { %p3348_p9 = pneg %p3347_p8 }
  0x3f   : > { %p3353_p3 = pnand %p3351_p2, %p3348_p9 }
  0x41   : > { %3356 = shalt.err (!%p3353_p3)
}
  0x42   : > { %s3357_s27 = scalar_lea.vmem %s3489_s30, 2048  ;;  %p3365_p13 = scmp.lt.s32.totalorder %s3489_s30, %s3489_s30 }
  0x43   : > { %p3358_p10 = scmp.ne.s32.totalorder %s3489_s30, %s3357_s27  ;;  %p3366_p0 = scmp.lt.s32.totalorder %s3357_s27, %s3357_s27 }
  0x45   : > { %p3360_p11 = pnand %p3358_p10, %p3499_p7  ;;  %p3367_p1 = por %p3366_p0, %p3365_p13 }
  0x47   : > { %p3361_p12 = pneg %p3360_p11 }
  0x49   : > { %p3368_p4 = pnand %p3367_p1, %p3361_p12 }
  0x4b   : > { %3371 = shalt.err (!%p3368_p4)
}
  0x4c   : > { %s3425_s22 = smov 256   ;;  %s3426_s26 = smov 16  }
  0x4d   : > { %3259 = dma.hbm_to_vmem [thread:$0]  (!%p3485_p5), %s4676_s4, 2048, %s3489_s30, [#allocation5], %s3425_s22, %s3425_s22, %s3426_s26  }
  0x4e   : > { %s3427_s8 = smov [#allocation7]   ;;  %s3372_s11 = scalar_lea.hbm %s4677_s5, 32 }
  0x4f   : > { %s236_s23 = sshll.u32 %s3427_s8, 4  ;;  %p3373_p6 = scmp.ne.s32.totalorder %s4677_s5, %s3372_s11  ;;  %s237_s23 = int_to_ptr.vmem [resolvable:$true] %s236_s23 }
  0x50   : > { %p3379_p2 = scmp.lt.u32.totalorder %s3372_s11, %s4677_s5 }
  0x51   : > { %p3375_p8 = pnand %p3373_p6, %p3499_p7 }
  0x53   : > { %p3376_p9 = pneg %p3375_p8 }
  0x55   : > { %p3381_p3 = pnand %p3379_p2, %p3376_p9 }
  0x57   : > { %3384 = shalt.err (!%p3381_p3)
}
  0x58   : > { %s3385_s30 = scalar_lea.vmem %s237_s23, 32  ;;  %p3393_p13 = scmp.lt.s32.totalorder %s237_s23, %s237_s23 }
  0x59   : > { %p3386_p10 = scmp.ne.s32.totalorder %s237_s23, %s3385_s30  ;;  %p3394_p0 = scmp.lt.s32.totalorder %s3385_s30, %s3385_s30 }
  0x5b   : > { %p3388_p11 = pnand %p3386_p10, %p3499_p7  ;;  %p3395_p1 = por %p3394_p0, %p3393_p13 }
  0x5d   : > { %p3389_p12 = pneg %p3388_p11 }
  0x5f   : > { %p3396_p4 = pnand %p3395_p1, %p3389_p12 }
  0x61   : > { %3399 = shalt.err (!%p3396_p4)
}
  0x62   : > { %3262 = dma.hbm_to_vmem [thread:$0]  (!%p3485_p5), %s4677_s5, 32, %s237_s23, [#allocation8]  }
  0x63   : > { %p4684_p6 = scmp.ne.s32.totalorder %s4681_s25, 0 }
  0x64   : > { %p4685_p8 = scmp.eq.s32.totalorder (!%p4684_p6), %s3470_s24, 0 }
  0x65   : > { %265 = sbr.rel (%p4684_p6) target bundleno = 745 (0x2e9), region = 44 }
  0x6c   : > { %3405 = dma.done.wait (%p4685_p8), [#allocation3], 256   ;;  %p4686_p7 = pmov %p4685_p8 }
  0x6e   : > { %3407 = vsyncadd (%p4686_p7), [#allocation3], 4294967040  ;;  %p4687_p9 = pmov %p4686_p7 }
  0x6f   : > { %p4688_p2 = pmov %p4686_p7 }
  0x70   : > { %3409 = dma.done.wait (%p4687_p9), [#allocation5], 2064  }
  0x71   : > { %3411 = vsyncadd (%p4688_p2), [#allocation5], 4294965232  ;;  %p4689_p3 = pmov %p4688_p2 }
  0x72   : > { %p4690_p5 = pmov %p4688_p2 }
  0x73   : > { %3413 = dma.done.wait (%p4689_p3), [#allocation8], 32  }
  0x74   : > { %3415 = vsyncadd (%p4690_p5), [#allocation8], 4294967264  ;;  %p312_p10 = scmp.lt.s32.totalorder %s3470_s24, 1  ;;  %vm393_vm0 = vcmask 130048   ;;  %v391_v0 = vld [vmem:[#allocation2] sm:$0xff]  ;;  %v392_v1 = vld [vmem:[#allocation2 + $0x8] sm:$0xff] }
  0x75   : > { %v3202_v3 = vpack.c.bf16 %v392_v1, %v391_v0  ;;  %v1748_v41 = vld [vmem:[#allocation6 + $0x8] sm:$0xff]  ;;  %v1750_v42 = vld [vmem:[#allocation6 + $0x18] sm:$0xff]  ;;  %v1747_v43 = vld [vmem:[#allocation6] sm:$0xff]  ;;  %vm1775_vm1 = vcmask 523264  }
  0x76   : > { %s4692_s24 = smov (!%p312_p10, %s3470_s24), 1  ;;  %v3210_v44 = vpack.c.bf16 %v1750_v42, %v1748_v41  ;;  %v1749_v45 = vld [vmem:[#allocation6 + $0x10] sm:$0xff]  ;;  %v1752_v55 = vld [vmem:[#allocation6 + $0x28] sm:$0xff]  ;;  %v1754_v56 = vld [vmem:[#allocation6 + $0x38] sm:$0xff] }
  0x77   : > { %s2867_s25 = sshll.u32 %s4692_s24, 9  ;;  %3203 = vmatprep.subr.bf16.mxu0 %v3202_v3  ;;  %3207 = vmatprep.subr.bf16.mxu1 %v3202_v3  ;;  %v3212_v48 = vpack.c.bf16 %v1749_v45, %v1747_v43  ;;  %v1751_v57 = vld [vmem:[#allocation6 + $0x20] sm:$0xff]  ;;  %v1753_v58 = vld [vmem:[#allocation6 + $0x30] sm:$0xff]  ;;  %v3214_v59 = vpack.c.bf16 %v1754_v56, %v1752_v55  ;;  %v1756_v61 = vld [vmem:[#allocation6 + $0x48] sm:$0xff]  ;;  %s2869_s26 = sshll.u32 %s4692_s24, 10 }
  0x78   : > { %s3601_s19 = scalar_lea.vmem %s4672_s0, %s2867_s25  ;;  %s3606_s22 = scalar_lea.vmem %s4673_s1, %s2867_s25  ;;  %3205 = vmatpush3.bf16.msra.mxu0 %v3202_v3  ;;  %3209 = vmatpush3.bf16.msra.mxu1 %v3202_v3  ;;  %v3216_v60 = vpack.c.bf16 %v1753_v58, %v1751_v57  ;;  %v1758_v62 = vld [vmem:[#allocation6 + $0x58] sm:$0xff]  ;;  %v1755_v63 = vld [vmem:[#allocation6 + $0x40] sm:$0xff]  ;;  %v1757_v0 = vld [vmem:[#allocation6 + $0x50] sm:$0xff] }
  0x79   : > { %v327_v2 = vld [vmem:[%s3601_s19] sm:$0xff]  ;;  %v328_v5 = vld [vmem:[%s3601_s19 + $0x8] sm:$0xff]  ;;  %v329_v7 = vld [vmem:[%s3601_s19 + $0x10] sm:$0xff]  ;;  %3211 = vmatprep.subr.bf16.mxu0 %v3210_v44  ;;  %3226 = vmatprep.subr.bf16.mxu1 %v3210_v44  ;;  %s4411_s8 = scalar_lea.vmem %s4678_s6, %s2869_s26 }
  0x7a   : > { %3006 = vmatprep.mubr.msk.f32.mxu0 %vm393_vm0, %v327_v2  ;;  %v971_v4 = vld [vmem:[%s3606_s22] sm:$0xff]  ;;  %v972_v6 = vld [vmem:[%s3606_s22 + $0x8] sm:$0xff]  ;;  %v973_v8 = vld [vmem:[%s3606_s22 + $0x10] sm:$0xff] }
  0x7b   : > { %3106 = vmatprep.mubr.msk.f32.mxu1 %vm393_vm0, %v971_v4  ;;  %3007 = vmatmul.mubr.msk.f32.vlgmr.msra.gmra.mrb[0].mxu0 %vm393_vm0, %v328_v5  ;;  %v330_v9 = vld [vmem:[%s3601_s19 + $0x18] sm:$0xff]  ;;  %v331_v11 = vld [vmem:[%s3601_s19 + $0x20] sm:$0xff]  ;;  %v332_v13 = vld [vmem:[%s3601_s19 + $0x28] sm:$0xff]  ;;  %v3218_v5 = vpack.c.bf16 %v1758_v62, %v1756_v61 }
  0x7c   : > { %3107 = vmatmul.mubr.msk.f32.vlgmr.msra.gmra.mrb[0].mxu1 %vm393_vm0, %v972_v6  ;;  %3009 = vmatprep.mubr.msk.f32.mxu0 %vm393_vm0, %v329_v7  ;;  %v974_v10 = vld [vmem:[%s3606_s22 + $0x18] sm:$0xff]  ;;  %v975_v12 = vld [vmem:[%s3606_s22 + $0x20] sm:$0xff]  ;;  %v976_v14 = vld [vmem:[%s3606_s22 + $0x28] sm:$0xff]  ;;  %v3220_v6 = vpack.c.bf16 %v1757_v0, %v1755_v63 }
  0x7d   : > { %3109 = vmatprep.mubr.msk.f32.mxu1 %vm393_vm0, %v973_v8  ;;  %v333_v15 = vld [vmem:[%s3601_s19 + $0x30] sm:$0xff]  ;;  %v334_v17 = vld [vmem:[%s3601_s19 + $0x38] sm:$0xff]  ;;  %v335_v19 = vld [vmem:[%s3601_s19 + $0x40] sm:$0xff]  ;;  %3213 = vmatpush1.bf16.msra.mxu0 %v3212_v48 }
  0x7e   : > { %v977_v16 = vld [vmem:[%s3606_s22 + $0x30] sm:$0xff]  ;;  %v978_v18 = vld [vmem:[%s3606_s22 + $0x38] sm:$0xff]  ;;  %v979_v20 = vld [vmem:[%s3606_s22 + $0x40] sm:$0xff]  ;;  %3230 = vmatpush1.bf16.msra.mxu1 %v3212_v48  ;;  %3215 = vmatprep.subr.bf16.mxu0 %v3214_v59 }
  0x7f   : > { %3010 = vmatmul.mubr.msk.f32.gmra.mrb[2].mxu0 %vm393_vm0, %v330_v9  ;;  %v336_v21 = vld [vmem:[%s3601_s19 + $0x48] sm:$0xff]  ;;  %v337_v23 = vld [vmem:[%s3601_s19 + $0x50] sm:$0xff]  ;;  %v338_v25 = vld [vmem:[%s3601_s19 + $0x58] sm:$0xff]  ;;  %3227 = vmatprep.subr.bf16.mxu1 %v3214_v59 }
  0x80   : > { %3110 = vmatmul.mubr.msk.f32.gmra.mrb[2].mxu1 %vm393_vm0, %v974_v10  ;;  %3012 = vmatprep.mubr.msk.f32.mxu0 %vm393_vm0, %v331_v11  ;;  %v980_v22 = vld [vmem:[%s3606_s22 + $0x48] sm:$0xff]  ;;  %v981_v24 = vld [vmem:[%s3606_s22 + $0x50] sm:$0xff]  ;;  %v982_v26 = vld [vmem:[%s3606_s22 + $0x58] sm:$0xff] }
  0x81   : > { %3112 = vmatprep.mubr.msk.f32.mxu1 %vm393_vm0, %v975_v12  ;;  %v339_v27 = vld [vmem:[%s3601_s19 + $0x60] sm:$0xff]  ;;  %v340_v29 = vld [vmem:[%s3601_s19 + $0x68] sm:$0xff]  ;;  %v341_v31 = vld [vmem:[%s3601_s19 + $0x70] sm:$0xff]  ;;  %3217 = vmatpush1.bf16.msra.mxu0 %v3216_v60 }
  0x82   : > { %v983_v28 = vld [vmem:[%s3606_s22 + $0x60] sm:$0xff]  ;;  %v984_v30 = vld [vmem:[%s3606_s22 + $0x68] sm:$0xff]  ;;  %v985_v32 = vld [vmem:[%s3606_s22 + $0x70] sm:$0xff]  ;;  %3231 = vmatpush1.bf16.msra.mxu1 %v3216_v60  ;;  %3219 = vmatprep.subr.bf16.mxu0 %v3218_v5 }
  0x83   : > { %3013 = vmatmul.mubr.msk.f32.gmra.mrb[4].mxu0 %vm393_vm0, %v332_v13  ;;  %v342_v33 = vld [vmem:[%s3601_s19 + $0x78] sm:$0xff]  ;;  %v343_v35 = vld [vmem:[%s3601_s19 + $0x80] sm:$0xff]  ;;  %v344_v37 = vld [vmem:[%s3601_s19 + $0x88] sm:$0xff]  ;;  %3228 = vmatprep.subr.bf16.mxu1 %v3218_v5 }
  0x84   : > { %3113 = vmatmul.mubr.msk.f32.gmra.mrb[4].mxu1 %vm393_vm0, %v976_v14  ;;  %3015 = vmatprep.mubr.msk.f32.mxu0 %vm393_vm0, %v333_v15  ;;  %v986_v34 = vld [vmem:[%s3606_s22 + $0x78] sm:$0xff]  ;;  %v987_v36 = vld [vmem:[%s3606_s22 + $0x80] sm:$0xff]  ;;  %v988_v38 = vld [vmem:[%s3606_s22 + $0x88] sm:$0xff] }
  0x85   : > { %3115 = vmatprep.mubr.msk.f32.mxu1 %vm393_vm0, %v977_v16  ;;  %v345_v39 = vld [vmem:[%s3601_s19 + $0x90] sm:$0xff]  ;;  %v346_v46 = vld [vmem:[%s3601_s19 + $0x98] sm:$0xff]  ;;  %v347_v49 = vld [vmem:[%s3601_s19 + $0xa0] sm:$0xff]  ;;  %3221 = vmatpush1.bf16.msra.mxu0 %v3220_v6 }
  0x86   : > { %v989_v40 = vld [vmem:[%s3606_s22 + $0x90] sm:$0xff]  ;;  %v990_v47 = vld [vmem:[%s3606_s22 + $0x98] sm:$0xff]  ;;  %v991_v50 = vld [vmem:[%s3606_s22 + $0xa0] sm:$0xff]  ;;  %3232 = vmatpush1.bf16.msra.mxu1 %v3220_v6 }
  0x87   : > { %3016 = vmatmul.mubr.msk.f32.gmra.mrb[6].mxu0 %vm393_vm0, %v334_v17  ;;  %v348_v51 = vld [vmem:[%s3601_s19 + $0xa8] sm:$0xff]  ;;  %v349_v53 = vld [vmem:[%s3601_s19 + $0xb0] sm:$0xff]  ;;  %v350_v1 = vld [vmem:[%s3601_s19 + $0xb8] sm:$0xff] }
  0x88   : > { %3116 = vmatmul.mubr.msk.f32.gmra.mrb[6].mxu1 %vm393_vm0, %v978_v18  ;;  %3018 = vmatprep.mubr.msk.f32.mxu0 %vm393_vm0, %v335_v19  ;;  %v992_v52 = vld [vmem:[%s3606_s22 + $0xa8] sm:$0xff]  ;;  %v993_v54 = vld [vmem:[%s3606_s22 + $0xb0] sm:$0xff]  ;;  %v994_v2 = vld [vmem:[%s3606_s22 + $0xb8] sm:$0xff] }
  0x89   : > { %3118 = vmatprep.mubr.msk.f32.mxu1 %vm393_vm0, %v979_v20  ;;  %v351_v3 = vld [vmem:[%s3601_s19 + $0xc0] sm:$0xff]  ;;  %v352_v7 = vld [vmem:[%s3601_s19 + $0xc8] sm:$0xff]  ;;  %v353_v9 = vld [vmem:[%s3601_s19 + $0xd0] sm:$0xff] }
  0x8a   : > { %v995_v4 = vld [vmem:[%s3606_s22 + $0xc0] sm:$0xff]  ;;  %v996_v8 = vld [vmem:[%s3606_s22 + $0xc8] sm:$0xff]  ;;  %v997_v10 = vld [vmem:[%s3606_s22 + $0xd0] sm:$0xff] }
  0x8b   : > { %3019 = vmatmul.mubr.msk.f32.gmra.mrb[8].mxu0 %vm393_vm0, %v336_v21  ;;  %v354_v11 = vld [vmem:[%s3601_s19 + $0xd8] sm:$0xff]  ;;  %v355_v13 = vld [vmem:[%s3601_s19 + $0xe0] sm:$0xff]  ;;  %v356_v15 = vld [vmem:[%s3601_s19 + $0xe8] sm:$0xff] }
  0x8c   : > { %3119 = vmatmul.mubr.msk.f32.gmra.mrb[8].mxu1 %vm393_vm0, %v980_v22  ;;  %3021 = vmatprep.mubr.msk.f32.mxu0 %vm393_vm0, %v337_v23  ;;  %v998_v12 = vld [vmem:[%s3606_s22 + $0xd8] sm:$0xff]  ;;  %v999_v14 = vld [vmem:[%s3606_s22 + $0xe0] sm:$0xff]  ;;  %v1000_v16 = vld [vmem:[%s3606_s22 + $0xe8] sm:$0xff] }
  0x8d   : > { %3121 = vmatprep.mubr.msk.f32.mxu1 %vm393_vm0, %v981_v24  ;;  %v357_v17 = vld [vmem:[%s3601_s19 + $0xf0] sm:$0xff]  ;;  %v358_v19 = vld [vmem:[%s3601_s19 + $0xf8] sm:$0xff]  ;;  %v359_v21 = vld [vmem:[%s3601_s19 + $0x100] sm:$0xff] }
  0x8e   : > { %v1001_v18 = vld [vmem:[%s3606_s22 + $0xf0] sm:$0xff]  ;;  %v1002_v20 = vld [vmem:[%s3606_s22 + $0xf8] sm:$0xff]  ;;  %v1003_v22 = vld [vmem:[%s3606_s22 + $0x100] sm:$0xff] }
  0x8f   : > { %3022 = vmatmul.mubr.msk.f32.gmra.mrb[10].mxu0 %vm393_vm0, %v338_v25  ;;  %v360_v23 = vld [vmem:[%s3601_s19 + $0x108] sm:$0xff]  ;;  %v361_v25 = vld [vmem:[%s3601_s19 + $0x110] sm:$0xff]  ;;  %v370_v43 = vld [vmem:[%s3601_s19 + $0x158] sm:$0xff] }
  0x90   : > { %3122 = vmatmul.mubr.msk.f32.gmra.mrb[10].mxu1 %vm393_vm0, %v982_v26  ;;  %3024 = vmatprep.mubr.msk.f32.mxu0 %vm393_vm0, %v339_v27  ;;  %v1004_v24 = vld [vmem:[%s3606_s22 + $0x108] sm:$0xff]  ;;  %v1005_v26 = vld [vmem:[%s3606_s22 + $0x110] sm:$0xff]  ;;  %v362_v27 = vld [vmem:[%s3601_s19 + $0x118] sm:$0xff] }
  0x91   : > { %3124 = vmatprep.mubr.msk.f32.mxu1 %vm393_vm0, %v983_v28  ;;  %v1006_v28 = vld [vmem:[%s3606_s22 + $0x118] sm:$0xff]  ;;  %v369_v41 = vld [vmem:[%s3601_s19 + $0x150] sm:$0xff]  ;;  %v371_v45 = vld [vmem:[%s3601_s19 + $0x160] sm:$0xff] }
  0x92   : > { %v1013_v42 = vld [vmem:[%s3606_s22 + $0x150] sm:$0xff]  ;;  %v1014_v44 = vld [vmem:[%s3606_s22 + $0x158] sm:$0xff]  ;;  %v375_v59 = vld [vmem:[%s3601_s19 + $0x180] sm:$0xff] }
  0x93   : > { %3025 = vmatmul.mubr.msk.f32.gmra.mrb[12].mxu0 %vm393_vm0, %v340_v29  ;;  %v363_v29 = vld [vmem:[%s3601_s19 + $0x120] sm:$0xff]  ;;  %v1762_v48 = vld [vmem:[#allocation6 + $0x78] sm:$0xff]  ;;  %v374_v57 = vld [vmem:[%s3601_s19 + $0x178] sm:$0xff] }
  0x94   : > { %3125 = vmatmul.mubr.msk.f32.gmra.mrb[12].mxu1 %vm393_vm0, %v984_v30  ;;  %3027 = vmatprep.mubr.msk.f32.mxu0 %vm393_vm0, %v341_v31  ;;  %v1007_v30 = vld [vmem:[%s3606_s22 + $0x120] sm:$0xff]  ;;  %v364_v31 = vld [vmem:[%s3601_s19 + $0x128] sm:$0xff]  ;;  %v373_v55 = vld [vmem:[%s3601_s19 + $0x170] sm:$0xff] }
  0x95   : > { %3127 = vmatprep.mubr.msk.f32.mxu1 %vm393_vm0, %v985_v32  ;;  %v1008_v32 = vld [vmem:[%s3606_s22 + $0x128] sm:$0xff]  ;;  %v1017_v56 = vld [vmem:[%s3606_s22 + $0x170] sm:$0xff]  ;;  %v1018_v58 = vld [vmem:[%s3606_s22 + $0x178] sm:$0xff] }
  0x96   : > { %v1019_v60 = vld [vmem:[%s3606_s22 + $0x180] sm:$0xff]  ;;  %v376_v61 = vld [vmem:[%s3601_s19 + $0x188] sm:$0xff]  ;;  %v377_v63 = vld [vmem:[%s3601_s19 + $0x190] sm:$0xff] }
  0x97   : > { %3028 = vmatmul.mubr.msk.f32.gmra.mrb[14].mxu0 %vm393_vm0, %v342_v33  ;;  %v365_v33 = vld [vmem:[%s3601_s19 + $0x130] sm:$0xff]  ;;  %v1020_v62 = vld [vmem:[%s3606_s22 + $0x188] sm:$0xff] }
  0x98   : > { %3128 = vmatmul.mubr.msk.f32.gmra.mrb[14].mxu1 %vm393_vm0, %v986_v34  ;;  %3030 = vmatprep.mubr.msk.f32.mxu0 %vm393_vm0, %v343_v35  ;;  %v1009_v34 = vld [vmem:[%s3606_s22 + $0x130] sm:$0xff]  ;;  %v366_v35 = vld [vmem:[%s3601_s19 + $0x138] sm:$0xff]  ;;  %v380_v5 = vld [vmem:[%s3601_s19 + $0x1a8] sm:$0xff] }
  0x99   : > { %3130 = vmatprep.mubr.msk.f32.mxu1 %vm393_vm0, %v987_v36  ;;  %v1010_v36 = vld [vmem:[%s3606_s22 + $0x138] sm:$0xff]  ;;  %v1021_v0 = vld [vmem:[%s3606_s22 + $0x190] sm:$0xff]  ;;  %v1024_v6 = vld [vmem:[%s3606_s22 + $0x1a8] sm:$0xff] }
  0x9b   : > { %3031 = vmatmul.mubr.msk.f32.gmra.mrb[16].mxu0 %vm393_vm0, %v344_v37  ;;  %v367_v37 = vld [vmem:[%s3601_s19 + $0x140] sm:$0xff] }
  0x9c   : > { %3131 = vmatmul.mubr.msk.f32.gmra.mrb[16].mxu1 %vm393_vm0, %v988_v38  ;;  %3033 = vmatprep.mubr.msk.f32.mxu0 %vm393_vm0, %v345_v39  ;;  %v1011_v38 = vld [vmem:[%s3606_s22 + $0x140] sm:$0xff]  ;;  %v368_v39 = vld [vmem:[%s3601_s19 + $0x148] sm:$0xff] }
  0x9d   : > { %3133 = vmatprep.mubr.msk.f32.mxu1 %vm393_vm0, %v989_v40  ;;  %v1012_v40 = vld [vmem:[%s3606_s22 + $0x148] sm:$0xff] }
  0x9f   : > { %3034 = vmatmul.mubr.msk.f32.gmra.mrb[18].mxu0 %vm393_vm0, %v346_v46  ;;  %v1015_v46 = vld [vmem:[%s3606_s22 + $0x160] sm:$0xff] }
  0xa0   : > { %3134 = vmatmul.mubr.msk.f32.gmra.mrb[18].mxu1 %vm393_vm0, %v990_v47  ;;  %3036 = vmatprep.mubr.msk.f32.mxu0 %vm393_vm0, %v347_v49  ;;  %v1760_v47 = vld [vmem:[#allocation6 + $0x68] sm:$0xff] }
  0xa1   : > { %3136 = vmatprep.mubr.msk.f32.mxu1 %vm393_vm0, %v991_v50  ;;  %v3222_v49 = vpack.c.bf16 %v1762_v48, %v1760_v47  ;;  %v1759_v50 = vld [vmem:[#allocation6 + $0x60] sm:$0xff] }
  0xa3   : > { %3037 = vmatmul.mubr.msk.f32.gmra.mrb[20].mxu0 %vm393_vm0, %v348_v51  ;;  %v1761_v51 = vld [vmem:[#allocation6 + $0x70] sm:$0xff]  ;;  %3223 = vmatprep.subr.bf16.mxu0 %v3222_v49 }
  0xa4   : > { %3137 = vmatmul.mubr.msk.f32.gmra.mrb[20].mxu1 %vm393_vm0, %v992_v52  ;;  %3039 = vmatprep.mubr.msk.f32.mxu0 %vm393_vm0, %v349_v53  ;;  %v3224_v52 = vpack.c.bf16 %v1761_v51, %v1759_v50  ;;  %v372_v53 = vld [vmem:[%s3601_s19 + $0x168] sm:$0xff] }
  0xa5   : > { %3139 = vmatprep.mubr.msk.f32.mxu1 %vm393_vm0, %v993_v54  ;;  %v1016_v54 = vld [vmem:[%s3606_s22 + $0x168] sm:$0xff]  ;;  %3229 = vmatprep.subr.bf16.mxu1 %v3222_v49 }
  0xa6   : > { %3225 = vmatpush1.bf16.msra.mxu0 %v3224_v52  ;;  %3233 = vmatpush1.bf16.msra.mxu1 %v3224_v52 }
  0xa7   : > { %3040 = vmatmul.mubr.msk.f32.gmra.mrb[22].mxu0 %vm393_vm0, %v350_v1  ;;  %v378_v1 = vld [vmem:[%s3601_s19 + $0x198] sm:$0xff] }
  0xa8   : > { %3140 = vmatmul.mubr.msk.f32.gmra.mrb[22].mxu1 %vm393_vm0, %v994_v2  ;;  %3042 = vmatprep.mubr.msk.f32.mxu0 %vm393_vm0, %v351_v3  ;;  %v1022_v2 = vld [vmem:[%s3606_s22 + $0x198] sm:$0xff]  ;;  %v379_v3 = vld [vmem:[%s3601_s19 + $0x1a0] sm:$0xff] }
  0xa9   : > { %3142 = vmatprep.mubr.msk.f32.mxu1 %vm393_vm0, %v995_v4  ;;  %v1023_v4 = vld [vmem:[%s3606_s22 + $0x1a0] sm:$0xff] }
  0xab   : > { %3043 = vmatmul.mubr.msk.f32.gmra.mrb[24].mxu0 %vm393_vm0, %v352_v7  ;;  %v381_v7 = vld [vmem:[%s3601_s19 + $0x1b0] sm:$0xff] }
  0xac   : > { %3143 = vmatmul.mubr.msk.f32.gmra.mrb[24].mxu1 %vm393_vm0, %v996_v8  ;;  %3045 = vmatprep.mubr.msk.f32.mxu0 %vm393_vm0, %v353_v9  ;;  %v1025_v8 = vld [vmem:[%s3606_s22 + $0x1b0] sm:$0xff]  ;;  %v382_v9 = vld [vmem:[%s3601_s19 + $0x1b8] sm:$0xff] }
  0xad   : > { %3145 = vmatprep.mubr.msk.f32.mxu1 %vm393_vm0, %v997_v10  ;;  %v1026_v10 = vld [vmem:[%s3606_s22 + $0x1b8] sm:$0xff] }
  0xaf   : > { %3046 = vmatmul.mubr.msk.f32.gmra.mrb[26].mxu0 %vm393_vm0, %v354_v11  ;;  %v383_v11 = vld [vmem:[%s3601_s19 + $0x1c0] sm:$0xff] }
  0xb0   : > { %3146 = vmatmul.mubr.msk.f32.gmra.mrb[26].mxu1 %vm393_vm0, %v998_v12  ;;  %3048 = vmatprep.mubr.msk.f32.mxu0 %vm393_vm0, %v355_v13  ;;  %v1027_v12 = vld [vmem:[%s3606_s22 + $0x1c0] sm:$0xff]  ;;  %v384_v13 = vld [vmem:[%s3601_s19 + $0x1c8] sm:$0xff] }
  0xb1   : > { %3148 = vmatprep.mubr.msk.f32.mxu1 %vm393_vm0, %v999_v14  ;;  %v1028_v14 = vld [vmem:[%s3606_s22 + $0x1c8] sm:$0xff] }
  0xb3   : > { %3049 = vmatmul.mubr.msk.f32.gmra.mrb[28].mxu0 %vm393_vm0, %v356_v15  ;;  %v385_v15 = vld [vmem:[%s3601_s19 + $0x1d0] sm:$0xff] }
  0xb4   : > { %3149 = vmatmul.mubr.msk.f32.gmra.mrb[28].mxu1 %vm393_vm0, %v1000_v16  ;;  %3051 = vmatprep.mubr.msk.f32.mxu0 %vm393_vm0, %v357_v17  ;;  %v1029_v16 = vld [vmem:[%s3606_s22 + $0x1d0] sm:$0xff]  ;;  %v386_v17 = vld [vmem:[%s3601_s19 + $0x1d8] sm:$0xff] }
  0xb5   : > { %3151 = vmatprep.mubr.msk.f32.mxu1 %vm393_vm0, %v1001_v18  ;;  %v1030_v18 = vld [vmem:[%s3606_s22 + $0x1d8] sm:$0xff] }
  0xb7   : > { %3052 = vmatmul.mubr.msk.f32.gmra.mrb[30].mxu0 %vm393_vm0, %v358_v19  ;;  %v387_v19 = vld [vmem:[%s3601_s19 + $0x1e0] sm:$0xff] }
  0xb8   : > { %3152 = vmatmul.mubr.msk.f32.gmra.mrb[30].mxu1 %vm393_vm0, %v1002_v20  ;;  %3054 = vmatprep.mubr.msk.f32.mxu0 %vm393_vm0, %v359_v21  ;;  %v1031_v20 = vld [vmem:[%s3606_s22 + $0x1e0] sm:$0xff]  ;;  %v388_v21 = vld [vmem:[%s3601_s19 + $0x1e8] sm:$0xff] }
  0xb9   : > { %3154 = vmatprep.mubr.msk.f32.mxu1 %vm393_vm0, %v1003_v22  ;;  %v1032_v22 = vld [vmem:[%s3606_s22 + $0x1e8] sm:$0xff] }
  0xbb   : > { %3055 = vmatmul.mubr.msk.f32.gmra.mrb[32].mxu0 %vm393_vm0, %v360_v23  ;;  %v389_v23 = vld [vmem:[%s3601_s19 + $0x1f0] sm:$0xff] }
  0xbc   : > { %3155 = vmatmul.mubr.msk.f32.gmra.mrb[32].mxu1 %vm393_vm0, %v1004_v24  ;;  %3057 = vmatprep.mubr.msk.f32.mxu0 %vm393_vm0, %v361_v25  ;;  %v1033_v24 = vld [vmem:[%s3606_s22 + $0x1f0] sm:$0xff]  ;;  %v390_v25 = vld [vmem:[%s3601_s19 + $0x1f8] sm:$0xf] }
  0xbd   : > { %3157 = vmatprep.mubr.msk.f32.mxu1 %vm393_vm0, %v1005_v26  ;;  %v1034_v26 = vld [vmem:[%s3606_s22 + $0x1f8] sm:$0xf] }
  0xbf   : > { %3058 = vmatmul.mubr.msk.f32.gmra.mrb[34].mxu0 %vm393_vm0, %v362_v27  ;;  %v3428_v27 = vmov 0.0  }
  0xc0   : > { %3158 = vmatmul.mubr.msk.f32.gmra.mrb[34].mxu1 %vm393_vm0, %v1006_v28  ;;  %3060 = vmatprep.mubr.msk.f32.mxu0 %vm393_vm0, %v363_v29 }
  0xc1   : > { %3160 = vmatprep.mubr.msk.f32.mxu1 %vm393_vm0, %v1007_v30 }
  0xc3   : > { %3061 = vmatmul.mubr.msk.f32.gmra.mrb[36].mxu0 %vm393_vm0, %v364_v31  ;;  %v3866_v31 = vld [vmem:[#allocation4] ss:$0 sm:$0xff] }
  0xc4   : > { %3161 = vmatmul.mubr.msk.f32.gmra.mrb[36].mxu1 %vm393_vm0, %v1008_v32  ;;  %3063 = vmatprep.mubr.msk.f32.mxu0 %vm393_vm0, %v365_v33 }
  0xc5   : > { %3163 = vmatprep.mubr.msk.f32.mxu1 %vm393_vm0, %v1009_v34 }
  0xc7   : > { %3064 = vmatmul.mubr.msk.f32.gmra.mrb[38].mxu0 %vm393_vm0, %v366_v35 }
  0xc8   : > { %3164 = vmatmul.mubr.msk.f32.gmra.mrb[38].mxu1 %vm393_vm0, %v1010_v36  ;;  %3066 = vmatprep.mubr.msk.f32.mxu0 %vm393_vm0, %v367_v37 }
  0xc9   : > { %3166 = vmatprep.mubr.msk.f32.mxu1 %vm393_vm0, %v1011_v38 }
  0xcb   : > { %3067 = vmatmul.mubr.msk.f32.gmra.mrb[40].mxu0 %vm393_vm0, %v368_v39 }
  0xcc   : > { %3167 = vmatmul.mubr.msk.f32.gmra.mrb[40].mxu1 %vm393_vm0, %v1012_v40  ;;  %3069 = vmatprep.mubr.msk.f32.mxu0 %vm393_vm0, %v369_v41 }
  0xcd   : > { %3169 = vmatprep.mubr.msk.f32.mxu1 %vm393_vm0, %v1013_v42 }
  0xcf   : > { %3070 = vmatmul.mubr.msk.f32.gmra.mrb[42].mxu0 %vm393_vm0, %v370_v43 }
  0xd0   : > { %3170 = vmatmul.mubr.msk.f32.gmra.mrb[42].mxu1 %vm393_vm0, %v1014_v44  ;;  %3072 = vmatprep.mubr.msk.f32.mxu0 %vm393_vm0, %v371_v45 }
  0xd1   : > { %3172 = vmatprep.mubr.msk.f32.mxu1 %vm393_vm0, %v1015_v46 }
  0xd3   : > { %3073 = vmatmul.mubr.msk.f32.gmra.mrb[44].mxu0 %vm393_vm0, %v372_v53 }
  0xd4   : > { %3173 = vmatmul.mubr.msk.f32.gmra.mrb[44].mxu1 %vm393_vm0, %v1016_v54  ;;  %3075 = vmatprep.mubr.msk.f32.mxu0 %vm393_vm0, %v373_v55 }
  0xd5   : > { %3175 = vmatprep.mubr.msk.f32.mxu1 %vm393_vm0, %v1017_v56 }
  0xd7   : > { %3076 = vmatmul.mubr.msk.f32.gmra.mrb[46].mxu0 %vm393_vm0, %v374_v57 }
  0xd8   : > { %3176 = vmatmul.mubr.msk.f32.gmra.mrb[46].mxu1 %vm393_vm0, %v1018_v58  ;;  %3078 = vmatprep.mubr.msk.f32.mxu0 %vm393_vm0, %v375_v59 }
  0xd9   : > { %3178 = vmatprep.mubr.msk.f32.mxu1 %vm393_vm0, %v1019_v60 }
  0xdb   : > { %3079 = vmatmul.mubr.msk.f32.gmra.mrb[48].mxu0 %vm393_vm0, %v376_v61 }
  0xdc   : > { %3179 = vmatmul.mubr.msk.f32.gmra.mrb[48].mxu1 %vm393_vm0, %v1020_v62  ;;  %3081 = vmatprep.mubr.msk.f32.mxu0 %vm393_vm0, %v377_v63 }
  0xdd   : > { %3181 = vmatprep.mubr.msk.f32.mxu1 %vm393_vm0, %v1021_v0 }
  0xdf   : > { %3082 = vmatmul.mubr.msk.f32.gmra.mrb[50].mxu0 %vm393_vm0, %v378_v1 }
  0xe0   : > { %3182 = vmatmul.mubr.msk.f32.gmra.mrb[50].mxu1 %vm393_vm0, %v1022_v2  ;;  %3084 = vmatprep.mubr.msk.f32.mxu0 %vm393_vm0, %v379_v3 }
  0xe1   : > { %3184 = vmatprep.mubr.msk.f32.mxu1 %vm393_vm0, %v1023_v4 }
  0xe3   : > { %3085 = vmatmul.mubr.msk.f32.gmra.mrb[52].mxu0 %vm393_vm0, %v380_v5 }
  0xe4   : > { %3185 = vmatmul.mubr.msk.f32.gmra.mrb[52].mxu1 %vm393_vm0, %v1024_v6  ;;  %3087 = vmatprep.mubr.msk.f32.mxu0 %vm393_vm0, %v381_v7 }
  0xe5   : > { %3187 = vmatprep.mubr.msk.f32.mxu1 %vm393_vm0, %v1025_v8 }
  0xe7   : > { %3088 = vmatmul.mubr.msk.f32.gmra.mrb[54].mxu0 %vm393_vm0, %v382_v9 }
  0xe8   : > { %3188 = vmatmul.mubr.msk.f32.gmra.mrb[54].mxu1 %vm393_vm0, %v1026_v10  ;;  %3090 = vmatprep.mubr.msk.f32.mxu0 %vm393_vm0, %v383_v11 }
  0xe9   : > { %3190 = vmatprep.mubr.msk.f32.mxu1 %vm393_vm0, %v1027_v12 }
  0xeb   : > { %3091 = vmatmul.mubr.msk.f32.gmra.mrb[56].mxu0 %vm393_vm0, %v384_v13 }
  0xec   : > { %3191 = vmatmul.mubr.msk.f32.gmra.mrb[56].mxu1 %vm393_vm0, %v1028_v14  ;;  %3093 = vmatprep.mubr.msk.f32.mxu0 %vm393_vm0, %v385_v15 }
  0xed   : > { %3193 = vmatprep.mubr.msk.f32.mxu1 %vm393_vm0, %v1029_v16 }
  0xef   : > { %3094 = vmatmul.mubr.msk.f32.gmra.mrb[58].mxu0 %vm393_vm0, %v386_v17 }
  0xf0   : > { %3194 = vmatmul.mubr.msk.f32.gmra.mrb[58].mxu1 %vm393_vm0, %v1030_v18  ;;  %3096 = vmatprep.mubr.msk.f32.mxu0 %vm393_vm0, %v387_v19 }
  0xf1   : > { %3196 = vmatprep.mubr.msk.f32.mxu1 %vm393_vm0, %v1031_v20 }
  0xf3   : > { %3097 = vmatmul.mubr.msk.f32.gmra.mrb[60].mxu0 %vm393_vm0, %v388_v21 }
  0xf4   : > { %3197 = vmatmul.mubr.msk.f32.gmra.mrb[60].mxu1 %vm393_vm0, %v1032_v22  ;;  %3099 = vmatprep.mubr.msk.f32.mxu0 %vm393_vm0, %v389_v23 }
  0xf5   : > { %3199 = vmatprep.mubr.msk.f32.mxu1 %vm393_vm0, %v1033_v24 }
  0xf7   : > { %3100 = vmatmul.mubr.msk.f32.gmra.mrb[62].mxu0 %vm393_vm0, %v390_v25 }
  0xf8   : > { %3200 = vmatmul.mubr.msk.f32.gmra.mrb[62].mxu1 %vm393_vm0, %v1034_v26  ;;  %2032 = vmatprep.mubr.f32.mxu0 %v3428_v27 }
  0xf9   : > { %2224 = vmatprep.mubr.f32.mxu1 %v3428_v27 }
 0x14e   : > { %v3008_v28 = vpop.f32.mrb[0].mxu0 }
 0x14f   : > { %v3108_v29 = vpop.f32.mrb[0].mxu1  ;;  %v652_v32 = vpop.f32.mrb[1].mxu0 }
 0x150   : > { %v1613_v30 = vmax.f32 %v3008_v28, %v3108_v29  ;;  %v1293_v33 = vpop.f32.mrb[1].mxu1 }
 0x151   : > { %v1612_v34 = vmax.f32 %v652_v32, %v1293_v33 }
 0x152   : > { %v3011_v36 = vpop.f32.mrb[2].mxu0  ;;  %v1684_v42 = vadd.f32 %v3866_v31, %v1613_v30 }
 0x153   : > { %v1683_v35 = vadd.f32 %v3866_v31, %v1612_v34  ;;  %v3111_v37 = vpop.f32.mrb[2].mxu1  ;;  %v662_v39 = vpop.f32.mrb[3].mxu0 }
 0x154   : > { %v1615_v38 = vmax.f32 %v3011_v36, %v3111_v37  ;;  %v1303_v40 = vpop.f32.mrb[3].mxu1 }
 0x155   : > { %v1614_v41 = vmax.f32 %v662_v39, %v1303_v40  ;;  %2801 = vmatmul.mubr.msk.f32.vlgmr.msra.gmra.mrb[64].mxu0 %vm1775_vm1, %v1683_v35 }
 0x156   : > { %2038 = vmatprep.mubr.f32.mxu0 %v3428_v27  ;;  %v3014_v43 = vpop.f32.mrb[4].mxu0  ;;  %v1686_v56 = vadd.f32 %v3866_v31, %v1615_v38 }
 0x157   : > { %v3114_v44 = vpop.f32.mrb[4].mxu1  ;;  %v672_v46 = vpop.f32.mrb[5].mxu0  ;;  %v1685_v49 = vadd.f32 %v3866_v31, %v1614_v41 }
 0x158   : > { %v1617_v45 = vmax.f32 %v3014_v43, %v3114_v44  ;;  %v1313_v47 = vpop.f32.mrb[5].mxu1 }
 0x159   : > { %v1616_v48 = vmax.f32 %v672_v46, %v1313_v47  ;;  %2802 = vmatmul.mubr.msk.f32.gmra.mrb[66].mxu0 %vm1775_vm1, %v1684_v42 }
 0x15a   : > { %2044 = vmatprep.mubr.f32.mxu0 %v3428_v27  ;;  %v3017_v50 = vpop.f32.mrb[6].mxu0  ;;  %v1688_v6 = vadd.f32 %v3866_v31, %v1617_v45 }
 0x15b   : > { %v3117_v51 = vpop.f32.mrb[6].mxu1  ;;  %v682_v53 = vpop.f32.mrb[7].mxu0  ;;  %v1687_v63 = vadd.f32 %v3866_v31, %v1616_v48 }
 0x15c   : > { %v1619_v52 = vmax.f32 %v3017_v50, %v3117_v51  ;;  %v1323_v54 = vpop.f32.mrb[7].mxu1 }
 0x15d   : > { %v1618_v55 = vmax.f32 %v682_v53, %v1323_v54  ;;  %2803 = vmatmul.mubr.msk.f32.gmra.mrb[68].mxu0 %vm1775_vm1, %v1685_v49 }
 0x15e   : > { %2050 = vmatprep.mubr.f32.mxu0 %v3428_v27  ;;  %v3020_v57 = vpop.f32.mrb[8].mxu0  ;;  %v1690_v20 = vadd.f32 %v3866_v31, %v1619_v52 }
 0x15f   : > { %v3120_v58 = vpop.f32.mrb[8].mxu1  ;;  %v692_v60 = vpop.f32.mrb[9].mxu0  ;;  %v1689_v13 = vadd.f32 %v3866_v31, %v1618_v55 }
 0x160   : > { %v1621_v59 = vmax.f32 %v3020_v57, %v3120_v58  ;;  %v1333_v61 = vpop.f32.mrb[9].mxu1 }
 0x161   : > { %v1620_v62 = vmax.f32 %v692_v60, %v1333_v61  ;;  %2804 = vmatmul.mubr.msk.f32.gmra.mrb[70].mxu0 %vm1775_vm1, %v1686_v56 }
 0x162   : > { %2056 = vmatprep.mubr.f32.mxu0 %v3428_v27  ;;  %v3881_v0 = vpop.f32.mrb[10].mxu0  ;;  %v1692_v36 = vadd.f32 %v3866_v31, %v1621_v59 }
 0x163   : > { %v3123_v1 = vpop.f32.mrb[10].mxu1  ;;  %v702_v3 = vpop.f32.mrb[11].mxu0  ;;  %v1691_v28 = vadd.f32 %v3866_v31, %v1620_v62 }
 0x164   : > { %v1623_v2 = vmax.f32 %v3881_v0, %v3123_v1  ;;  %v1343_v4 = vpop.f32.mrb[11].mxu1 }
 0x165   : > { %v1622_v5 = vmax.f32 %v702_v3, %v1343_v4  ;;  %2805 = vmatmul.mubr.msk.f32.gmra.mrb[72].mxu0 %vm1775_vm1, %v1687_v63 }
 0x166   : > { %2062 = vmatprep.mubr.f32.mxu0 %v3428_v27  ;;  %v3887_v7 = vpop.f32.mrb[12].mxu0  ;;  %v1694_v50 = vadd.f32 %v3866_v31, %v1623_v2 }
 0x167   : > { %v3889_v8 = vpop.f32.mrb[12].mxu1  ;;  %v712_v10 = vpop.f32.mrb[13].mxu0  ;;  %v1693_v43 = vadd.f32 %v3866_v31, %v1622_v5 }
 0x168   : > { %v1625_v9 = vmax.f32 %v3887_v7, %v3889_v8  ;;  %v1353_v11 = vpop.f32.mrb[13].mxu1 }
 0x169   : > { %v1624_v12 = vmax.f32 %v712_v10, %v1353_v11  ;;  %2806 = vmatmul.mubr.msk.f32.gmra.mrb[74].mxu0 %vm1775_vm1, %v1688_v6 }
 0x16a   : > { %2068 = vmatprep.mubr.f32.mxu0 %v3428_v27  ;;  %v3896_v14 = vpop.f32.mrb[14].mxu0  ;;  %v1696_v0 = vadd.f32 %v3866_v31, %v1625_v9 }
 0x16b   : > { %v3898_v15 = vpop.f32.mrb[14].mxu1  ;;  %v3902_v17 = vpop.f32.mrb[15].mxu0  ;;  %v1695_v57 = vadd.f32 %v3866_v31, %v1624_v12 }
 0x16c   : > { %v1627_v16 = vmax.f32 %v3896_v14, %v3898_v15  ;;  %v3904_v18 = vpop.f32.mrb[15].mxu1 }
 0x16d   : > { %v1626_v19 = vmax.f32 %v3902_v17, %v3904_v18  ;;  %2807 = vmatmul.mubr.msk.f32.gmra.mrb[76].mxu0 %vm1775_vm1, %v1689_v13 }
 0x16e   : > { %2074 = vmatprep.mubr.f32.mxu0 %v3428_v27  ;;  %v3911_v21 = vpop.f32.mrb[16].mxu0  ;;  %v1698_v17 = vadd.f32 %v3866_v31, %v1627_v16 }
 0x16f   : > { %v3913_v22 = vpop.f32.mrb[16].mxu1  ;;  %v3917_v24 = vpop.f32.mrb[17].mxu0  ;;  %v1697_v7 = vadd.f32 %v3866_v31, %v1626_v19 }
 0x170   : > { %v1629_v23 = vmax.f32 %v3911_v21, %v3913_v22  ;;  %v3919_v25 = vpop.f32.mrb[17].mxu1 }
 0x171   : > { %v1628_v26 = vmax.f32 %v3917_v24, %v3919_v25  ;;  %2808 = vmatmul.mubr.msk.f32.gmra.mrb[78].mxu0 %vm1775_vm1, %v1690_v20 }
 0x172   : > { %2080 = vmatprep.mubr.f32.mxu0 %v3428_v27  ;;  %v3926_v29 = vpop.f32.mrb[18].mxu0  ;;  %v1700_v24 = vadd.f32 %v3866_v31, %v1629_v23 }
 0x173   : > { %v3928_v30 = vpop.f32.mrb[18].mxu1  ;;  %v3932_v33 = vpop.f32.mrb[19].mxu0 }
 0x174   : > { %v1631_v32 = vmax.f32 %v3926_v29, %v3928_v30  ;;  %v3934_v34 = vpop.f32.mrb[19].mxu1 }
 0x175   : > { %v1630_v35 = vmax.f32 %v3932_v33, %v3934_v34  ;;  %2809 = vmatmul.mubr.msk.f32.gmra.mrb[80].mxu0 %vm1775_vm1, %v1691_v28 }
 0x176   : > { %2086 = vmatprep.mubr.f32.mxu0 %v3428_v27  ;;  %v3941_v37 = vpop.f32.mrb[20].mxu0  ;;  %v1702_v33 = vadd.f32 %v3866_v31, %v1631_v32 }
 0x177   : > { %v3943_v38 = vpop.f32.mrb[20].mxu1  ;;  %v3947_v40 = vpop.f32.mrb[21].mxu0  ;;  %v1701_v21 = vadd.f32 %v3866_v31, %v1630_v35 }
 0x178   : > { %v1633_v39 = vmax.f32 %v3941_v37, %v3943_v38  ;;  %v3949_v41 = vpop.f32.mrb[21].mxu1 }
 0x179   : > { %v1632_v42 = vmax.f32 %v3947_v40, %v3949_v41  ;;  %2810 = vmatmul.mubr.msk.f32.gmra.mrb[82].mxu0 %vm1775_vm1, %v1692_v36 }
 0x17a   : > { %2092 = vmatprep.mubr.f32.mxu0 %v3428_v27  ;;  %v3956_v44 = vpop.f32.mrb[22].mxu0  ;;  %v1704_v40 = vadd.f32 %v3866_v31, %v1633_v39 }
 0x17b   : > { %v3958_v45 = vpop.f32.mrb[22].mxu1  ;;  %v3962_v47 = vpop.f32.mrb[23].mxu0  ;;  %v1703_v30 = vadd.f32 %v3866_v31, %v1632_v42 }
 0x17c   : > { %v1635_v46 = vmax.f32 %v3956_v44, %v3958_v45  ;;  %v3964_v48 = vpop.f32.mrb[23].mxu1 }
 0x17d   : > { %v1634_v49 = vmax.f32 %v3962_v47, %v3964_v48  ;;  %2811 = vmatmul.mubr.msk.f32.gmra.mrb[84].mxu0 %vm1775_vm1, %v1693_v43 }
 0x17e   : > { %2098 = vmatprep.mubr.f32.mxu0 %v3428_v27  ;;  %v3971_v51 = vpop.f32.mrb[24].mxu0  ;;  %v1706_v48 = vadd.f32 %v3866_v31, %v1635_v46 }
 0x17f   : > { %v3973_v52 = vpop.f32.mrb[24].mxu1  ;;  %v3977_v54 = vpop.f32.mrb[25].mxu0  ;;  %v1705_v38 = vadd.f32 %v3866_v31, %v1634_v49 }
 0x180   : > { %v1637_v53 = vmax.f32 %v3971_v51, %v3973_v52  ;;  %v3979_v55 = vpop.f32.mrb[25].mxu1 }
 0x181   : > { %v1636_v56 = vmax.f32 %v3977_v54, %v3979_v55  ;;  %2812 = vmatmul.mubr.msk.f32.gmra.mrb[86].mxu0 %vm1775_vm1, %v1694_v50  ;;  %v1699_v50 = vadd.f32 %v3866_v31, %v1628_v26 }
 0x182   : > { %2104 = vmatprep.mubr.f32.mxu0 %v3428_v27  ;;  %v3986_v58 = vpop.f32.mrb[26].mxu0  ;;  %v1708_v55 = vadd.f32 %v3866_v31, %v1637_v53 }
 0x183   : > { %v3988_v59 = vpop.f32.mrb[26].mxu1  ;;  %v3992_v61 = vpop.f32.mrb[27].mxu0  ;;  %v1707_v45 = vadd.f32 %v3866_v31, %v1636_v56 }
 0x184   : > { %v1639_v60 = vmax.f32 %v3986_v58, %v3988_v59  ;;  %v3994_v62 = vpop.f32.mrb[27].mxu1 }
 0x185   : > { %v1638_v63 = vmax.f32 %v3992_v61, %v3994_v62  ;;  %2813 = vmatmul.mubr.msk.f32.gmra.mrb[88].mxu0 %vm1775_vm1, %v1695_v57 }
 0x186   : > { %2110 = vmatprep.mubr.f32.mxu0 %v3428_v27  ;;  %v4004_v1 = vpop.f32.mrb[28].mxu0  ;;  %v1710_v62 = vadd.f32 %v3866_v31, %v1639_v60 }
 0x187   : > { %v4006_v2 = vpop.f32.mrb[28].mxu1  ;;  %v4010_v4 = vpop.f32.mrb[29].mxu0  ;;  %v1709_v53 = vadd.f32 %v3866_v31, %v1638_v63 }
 0x188   : > { %v1641_v3 = vmax.f32 %v4004_v1, %v4006_v2  ;;  %v4012_v5 = vpop.f32.mrb[29].mxu1 }
 0x189   : > { %v1640_v6 = vmax.f32 %v4010_v4, %v4012_v5  ;;  %2814 = vmatmul.mubr.msk.f32.gmra.mrb[90].mxu0 %vm1775_vm1, %v1696_v0 }
 0x18a   : > { %2116 = vmatprep.mubr.f32.mxu0 %v3428_v27  ;;  %v4022_v8 = vpop.f32.mrb[30].mxu0  ;;  %v1712_v5 = vadd.f32 %v3866_v31, %v1641_v3 }
 0x18b   : > { %v4024_v9 = vpop.f32.mrb[30].mxu1  ;;  %v4028_v11 = vpop.f32.mrb[31].mxu0  ;;  %v1711_v60 = vadd.f32 %v3866_v31, %v1640_v6 }
 0x18c   : > { %v1643_v10 = vmax.f32 %v4022_v8, %v4024_v9  ;;  %v4030_v12 = vpop.f32.mrb[31].mxu1 }
 0x18d   : > { %v1642_v13 = vmax.f32 %v4028_v11, %v4030_v12  ;;  %2815 = vmatmul.mubr.msk.f32.gmra.mrb[92].mxu0 %vm1775_vm1, %v1697_v7 }
 0x18e   : > { %2122 = vmatprep.mubr.f32.mxu0 %v3428_v27  ;;  %v3056_v18 = vpop.f32.mrb[32].mxu0  ;;  %v1714_v11 = vadd.f32 %v3866_v31, %v1643_v10 }
 0x18f   : > { %v3156_v19 = vpop.f32.mrb[32].mxu1  ;;  %v812_v28 = vpop.f32.mrb[33].mxu0  ;;  %v1713_v3 = vadd.f32 %v3866_v31, %v1642_v13 }
 0x190   : > { %v1645_v20 = vmax.f32 %v3056_v18, %v3156_v19  ;;  %v1453_v36 = vpop.f32.mrb[33].mxu1 }
 0x191   : > { %v1644_v43 = vmax.f32 %v812_v28, %v1453_v36  ;;  %2816 = vmatmul.mubr.msk.f32.gmra.mrb[94].mxu0 %vm1775_vm1, %v1698_v17 }
 0x192   : > { %2128 = vmatprep.mubr.f32.mxu0 %v3428_v27  ;;  %v3059_v14 = vpop.f32.mrb[34].mxu0  ;;  %v1716_v25 = vadd.f32 %v3866_v31, %v1645_v20 }
 0x193   : > { %v1715_v57 = vadd.f32 %v3866_v31, %v1644_v43  ;;  %v3159_v15 = vpop.f32.mrb[34].mxu1  ;;  %v822_v0 = vpop.f32.mrb[35].mxu0 }
 0x194   : > { %v1647_v16 = vmax.f32 %v3059_v14, %v3159_v15  ;;  %v1463_v7 = vpop.f32.mrb[35].mxu1 }
 0x195   : > { %2817 = vmatmul.mubr.msk.f32.gmra.mrb[96].mxu0 %vm1775_vm1, %v1699_v50  ;;  %2833 = vmatmul.mubr.msk.f32.vlgmr.msra.gmra.mrb[64].mxu1 %vm1775_vm1, %v1715_v57  ;;  %v1646_v18 = vmax.f32 %v822_v0, %v1463_v7 }
 0x196   : > { %2134 = vmatprep.mubr.f32.mxu0 %v3428_v27  ;;  %2230 = vmatprep.mubr.f32.mxu1 %v3428_v27  ;;  %v3062_v26 = vpop.f32.mrb[36].mxu0  ;;  %v1718_v34 = vadd.f32 %v3866_v31, %v1647_v16 }
 0x197   : > { %v3162_v17 = vpop.f32.mrb[36].mxu1  ;;  %v832_v28 = vpop.f32.mrb[37].mxu0  ;;  %v1717_v43 = vadd.f32 %v3866_v31, %v1646_v18 }
 0x198   : > { %v1649_v19 = vmax.f32 %v3062_v26, %v3162_v17  ;;  %v1473_v36 = vpop.f32.mrb[37].mxu1 }
 0x199   : > { %2818 = vmatmul.mubr.msk.f32.gmra.mrb[98].mxu0 %vm1775_vm1, %v1700_v24  ;;  %2834 = vmatmul.mubr.msk.f32.gmra.mrb[66].mxu1 %vm1775_vm1, %v1716_v25  ;;  %v1648_v50 = vmax.f32 %v832_v28, %v1473_v36 }
 0x19a   : > { %2140 = vmatprep.mubr.f32.mxu0 %v3428_v27  ;;  %2236 = vmatprep.mubr.f32.mxu1 %v3428_v27  ;;  %v3065_v22 = vpop.f32.mrb[38].mxu0  ;;  %v1720_v41 = vadd.f32 %v3866_v31, %v1649_v19 }
 0x19b   : > { %v3165_v23 = vpop.f32.mrb[38].mxu1  ;;  %v842_v57 = vpop.f32.mrb[39].mxu0  ;;  %v1719_v25 = vadd.f32 %v3866_v31, %v1648_v50 }
 0x19c   : > { %v1651_v20 = vmax.f32 %v3065_v22, %v3165_v23  ;;  %v1483_v14 = vpop.f32.mrb[39].mxu1 }
 0x19d   : > { %2819 = vmatmul.mubr.msk.f32.gmra.mrb[100].mxu0 %vm1775_vm1, %v1701_v21  ;;  %2835 = vmatmul.mubr.msk.f32.gmra.mrb[68].mxu1 %vm1775_vm1, %v1717_v43  ;;  %v1650_v15 = vmax.f32 %v842_v57, %v1483_v14 }
 0x19e   : > { %2146 = vmatprep.mubr.f32.mxu0 %v3428_v27  ;;  %2242 = vmatprep.mubr.f32.mxu1 %v3428_v27  ;;  %v4074_v35 = vpop.f32.mrb[40].mxu0  ;;  %v1722_v49 = vadd.f32 %v3866_v31, %v1651_v20 }
 0x19f   : > { %v4076_v0 = vpop.f32.mrb[40].mxu1  ;;  %v852_v18 = vpop.f32.mrb[41].mxu0  ;;  %v1721_v23 = vadd.f32 %v3866_v31, %v1650_v15 }
 0x1a0   : > { %v1653_v7 = vmax.f32 %v4074_v35, %v4076_v0  ;;  %v1493_v24 = vpop.f32.mrb[41].mxu1 }
 0x1a1   : > { %2820 = vmatmul.mubr.msk.f32.gmra.mrb[102].mxu0 %vm1775_vm1, %v1702_v33  ;;  %2836 = vmatmul.mubr.msk.f32.gmra.mrb[70].mxu1 %vm1775_vm1, %v1718_v34  ;;  %v1652_v29 = vmax.f32 %v852_v18, %v1493_v24 }
 0x1a2   : > { %2152 = vmatprep.mubr.f32.mxu0 %v3428_v27  ;;  %2248 = vmatprep.mubr.f32.mxu1 %v3428_v27  ;;  %v4089_v32 = vpop.f32.mrb[42].mxu0  ;;  %v1724_v56 = vadd.f32 %v3866_v31, %v1653_v7 }
 0x1a3   : > { %v4091_v16 = vpop.f32.mrb[42].mxu1  ;;  %v4095_v17 = vpop.f32.mrb[43].mxu0 }
 0x1a4   : > { %v1655_v26 = vmax.f32 %v4089_v32, %v4091_v16  ;;  %v1503_v28 = vpop.f32.mrb[43].mxu1 }
 0x1a5   : > { %2821 = vmatmul.mubr.msk.f32.gmra.mrb[104].mxu0 %vm1775_vm1, %v1703_v30  ;;  %2837 = vmatmul.mubr.msk.f32.gmra.mrb[72].mxu1 %vm1775_vm1, %v1719_v25  ;;  %v1654_v36 = vmax.f32 %v4095_v17, %v1503_v28  ;;  %v1723_v30 = vadd.f32 %v3866_v31, %v1652_v29 }
 0x1a6   : > { %2158 = vmatprep.mubr.f32.mxu0 %v3428_v27  ;;  %2254 = vmatprep.mubr.f32.mxu1 %v3428_v27  ;;  %v4107_v42 = vpop.f32.mrb[44].mxu0  ;;  %v1726_v63 = vadd.f32 %v3866_v31, %v1655_v26 }
 0x1a7   : > { %v4109_v43 = vpop.f32.mrb[44].mxu1  ;;  %v4113_v21 = vpop.f32.mrb[45].mxu0  ;;  %v1725_v51 = vadd.f32 %v3866_v31, %v1654_v36 }
 0x1a8   : > { %v1657_v50 = vmax.f32 %v4107_v42, %v4109_v43  ;;  %v4115_v22 = vpop.f32.mrb[45].mxu1 }
 0x1a9   : > { %2822 = vmatmul.mubr.msk.f32.gmra.mrb[106].mxu0 %vm1775_vm1, %v1704_v40  ;;  %2838 = vmatmul.mubr.msk.f32.gmra.mrb[74].mxu1 %vm1775_vm1, %v1720_v41  ;;  %v1656_v37 = vmax.f32 %v4113_v21, %v4115_v22 }
 0x1aa   : > { %2164 = vmatprep.mubr.f32.mxu0 %v3428_v27  ;;  %2260 = vmatprep.mubr.f32.mxu1 %v3428_v27  ;;  %v4128_v39 = vpop.f32.mrb[46].mxu0  ;;  %v1728_v6 = vadd.f32 %v3866_v31, %v1657_v50 }
 0x1ab   : > { %v4130_v19 = vpop.f32.mrb[46].mxu1  ;;  %v4134_v14 = vpop.f32.mrb[47].mxu0  ;;  %v1727_v58 = vadd.f32 %v3866_v31, %v1656_v37 }
 0x1ac   : > { %v1659_v57 = vmax.f32 %v4128_v39, %v4130_v19  ;;  %v4136_v15 = vpop.f32.mrb[47].mxu1 }
 0x1ad   : > { %2823 = vmatmul.mubr.msk.f32.gmra.mrb[108].mxu0 %vm1775_vm1, %v1705_v38  ;;  %2839 = vmatmul.mubr.msk.f32.gmra.mrb[76].mxu1 %vm1775_vm1, %v1721_v23  ;;  %v1658_v47 = vmax.f32 %v4134_v14, %v4136_v15 }
 0x1ae   : > { %2170 = vmatprep.mubr.f32.mxu0 %v3428_v27  ;;  %2266 = vmatprep.mubr.f32.mxu1 %v3428_v27  ;;  %v4149_v33 = vpop.f32.mrb[48].mxu0  ;;  %v1730_v12 = vadd.f32 %v3866_v31, %v1659_v57 }
 0x1af   : > { %v4151_v34 = vpop.f32.mrb[48].mxu1  ;;  %v4155_v24 = vpop.f32.mrb[49].mxu0  ;;  %v1729_v1 = vadd.f32 %v3866_v31, %v1658_v47 }
 0x1b0   : > { %v1661_v18 = vmax.f32 %v4149_v33, %v4151_v34  ;;  %v4157_v25 = vpop.f32.mrb[49].mxu1 }
 0x1b1   : > { %2824 = vmatmul.mubr.msk.f32.gmra.mrb[110].mxu0 %vm1775_vm1, %v1706_v48  ;;  %2840 = vmatmul.mubr.msk.f32.gmra.mrb[78].mxu1 %vm1775_vm1, %v1722_v49  ;;  %v1660_v44 = vmax.f32 %v4155_v24, %v4157_v25 }
 0x1b2   : > { %2176 = vmatprep.mubr.f32.mxu0 %v3428_v27  ;;  %2272 = vmatprep.mubr.f32.mxu1 %v3428_v27  ;;  %v4170_v46 = vpop.f32.mrb[50].mxu0  ;;  %v1732_v8 = vadd.f32 %v3866_v31, %v1661_v18 }
 0x1b3   : > { %v4172_v20 = vpop.f32.mrb[50].mxu1  ;;  %v4176_v17 = vpop.f32.mrb[51].mxu0  ;;  %v1731_v13 = vadd.f32 %v3866_v31, %v1660_v44 }
 0x1b4   : > { %v1663_v29 = vmax.f32 %v4170_v46, %v4172_v20  ;;  %v4178_v28 = vpop.f32.mrb[51].mxu1 }
 0x1b5   : > { %2825 = vmatmul.mubr.msk.f32.gmra.mrb[112].mxu0 %vm1775_vm1, %v1707_v45  ;;  %2841 = vmatmul.mubr.msk.f32.gmra.mrb[80].mxu1 %vm1775_vm1, %v1723_v30  ;;  %v1662_v54 = vmax.f32 %v4176_v17, %v4178_v28  ;;  %v1765_v17 = vlaneseq }
 0x1b6   : > { %2182 = vmatprep.mubr.f32.mxu0 %v3428_v27  ;;  %2278 = vmatprep.mubr.f32.mxu1 %v3428_v27  ;;  %v4194_v40 = vpop.f32.mrb[52].mxu0  ;;  %v1734_v10 = vadd.f32 %v3866_v31, %v1663_v29 }
 0x1b7   : > { %v4196_v41 = vpop.f32.mrb[52].mxu1  ;;  %v4200_v38 = vpop.f32.mrb[53].mxu0  ;;  %v1733_v9 = vadd.f32 %v3866_v31, %v1662_v54  ;;  %v1766_v28 = vshrl.u32 %v1765_v17, 7 }
 0x1b8   : > { %v1665_v23 = vmax.f32 %v4194_v40, %v4196_v41  ;;  %v4202_v48 = vpop.f32.mrb[53].mxu1  ;;  %v1763_v40 = vld [vmem:[#allocation7] sm:$0x3] }
 0x1b9   : > { %2826 = vmatmul.mubr.msk.f32.gmra.mrb[114].mxu0 %vm1775_vm1, %v1708_v55  ;;  %2842 = vmatmul.mubr.msk.f32.gmra.mrb[82].mxu1 %vm1775_vm1, %v1724_v56  ;;  %v1664_v52 = vmax.f32 %v4200_v38, %v4202_v48  ;;  %v1767_v54 = vsub.s32 0, %v1766_v28  ;;  %v1771_v41 = vsub.s32 1, %v1766_v28 }
 0x1ba   : > { %2188 = vmatprep.mubr.f32.mxu0 %v3428_v27  ;;  %2284 = vmatprep.mubr.f32.mxu1 %v3428_v27  ;;  %v4215_v35 = vpop.f32.mrb[54].mxu0  ;;  %v1736_v19 = vadd.f32 %v3866_v31, %v1665_v23 }
 0x1bb   : > { %v4217_v0 = vpop.f32.mrb[54].mxu1  ;;  %v4221_v36 = vpop.f32.mrb[55].mxu0  ;;  %v1735_v39 = vadd.f32 %v3866_v31, %v1664_v52  ;;  %v4404_v23 = vrot.slane %v1763_v40, %v1767_v54  ;;  %v4406_v38 = vrot.slane %v1763_v40, %v1771_v41 }
 0x1bc   : > { %v1667_v7 = vmax.f32 %v4215_v35, %v4217_v0  ;;  %v4223_v49 = vpop.f32.mrb[55].mxu1 }
 0x1bd   : > { %2827 = vmatmul.mubr.msk.f32.gmra.mrb[116].mxu0 %vm1775_vm1, %v1709_v53  ;;  %2843 = vmatmul.mubr.msk.f32.gmra.mrb[84].mxu1 %vm1775_vm1, %v1725_v51  ;;  %v1666_v61 = vmax.f32 %v4221_v36, %v4223_v49 }
 0x1be   : > { %2194 = vmatprep.mubr.f32.mxu0 %v3428_v27  ;;  %2290 = vmatprep.mubr.f32.mxu1 %v3428_v27  ;;  %v4239_v30 = vpop.f32.mrb[56].mxu0  ;;  %v1738_v33 = vadd.f32 %v3866_v31, %v1667_v7 }
 0x1bf   : > { %v4241_v45 = vpop.f32.mrb[56].mxu1  ;;  %v4245_v56 = vpop.f32.mrb[57].mxu0  ;;  %v1737_v57 = vadd.f32 %v3866_v31, %v1666_v61 }
 0x1c0   : > { %v1669_v55 = vmax.f32 %v4239_v30, %v4241_v45  ;;  %v4247_v51 = vpop.f32.mrb[57].mxu1 }
 0x1c1   : > { %2828 = vmatmul.mubr.msk.f32.gmra.mrb[118].mxu0 %vm1775_vm1, %v1710_v62  ;;  %2844 = vmatmul.mubr.msk.f32.gmra.mrb[86].mxu1 %vm1775_vm1, %v1726_v63  ;;  %v1668_v59 = vmax.f32 %v4245_v56, %v4247_v51 }
 0x1c2   : > { %2200 = vmatprep.mubr.f32.mxu0 %v3428_v27  ;;  %2296 = vmatprep.mubr.f32.mxu1 %v3428_v27  ;;  %v4263_v32 = vpop.f32.mrb[58].mxu0  ;;  %v1740_v18 = vadd.f32 %v3866_v31, %v1669_v55 }
 0x1c3   : > { %v4265_v16 = vpop.f32.mrb[58].mxu1  ;;  %v4269_v21 = vpop.f32.mrb[59].mxu0  ;;  %v1739_v34 = vadd.f32 %v3866_v31, %v1668_v59 }
 0x1c4   : > { %v1671_v26 = vmax.f32 %v4263_v32, %v4265_v16  ;;  %v4271_v22 = vpop.f32.mrb[59].mxu1 }
 0x1c5   : > { %2829 = vmatmul.mubr.msk.f32.gmra.mrb[120].mxu0 %vm1775_vm1, %v1711_v60  ;;  %2845 = vmatmul.mubr.msk.f32.gmra.mrb[88].mxu1 %vm1775_vm1, %v1727_v58  ;;  %v1670_v4 = vmax.f32 %v4269_v21, %v4271_v22 }
 0x1c6   : > { %2206 = vmatprep.mubr.f32.mxu0 %v3428_v27  ;;  %2302 = vmatprep.mubr.f32.mxu1 %v3428_v27  ;;  %v4287_v37 = vpop.f32.mrb[60].mxu0  ;;  %v1742_v25 = vadd.f32 %v3866_v31, %v1671_v26 }
 0x1c7   : > { %v4289_v53 = vpop.f32.mrb[60].mxu1  ;;  %v952_v63 = vpop.f32.mrb[61].mxu0  ;;  %v1741_v24 = vadd.f32 %v3866_v31, %v1670_v4 }
 0x1c8   : > { %v1673_v62 = vmax.f32 %v4287_v37, %v4289_v53  ;;  %v1593_v58 = vpop.f32.mrb[61].mxu1 }
 0x1c9   : > { %2830 = vmatmul.mubr.msk.f32.gmra.mrb[122].mxu0 %vm1775_vm1, %v1712_v5  ;;  %2846 = vmatmul.mubr.msk.f32.gmra.mrb[90].mxu1 %vm1775_vm1, %v1728_v6  ;;  %v1672_v2 = vmax.f32 %v952_v63, %v1593_v58 }
 0x1ca   : > { %2212 = vmatprep.mubr.f32.mxu0 %v3428_v27  ;;  %2308 = vmatprep.mubr.f32.mxu1 %v3428_v27  ;;  %v3101_v42 = vpop.f32.mrb[62].mxu0  ;;  %v1744_v46 = vadd.f32 %v3866_v31, %v1673_v62 }
 0x1cb   : > { %v3201_v43 = vpop.f32.mrb[62].mxu1  ;;  %v962_v14 = vpop.f32.mrb[63].mxu0  ;;  %v1743_v44 = vadd.f32 %v3866_v31, %v1672_v2 }
 0x1cc   : > { %v1675_v50 = vmax.f32 %v3101_v42, %v3201_v43  ;;  %v1603_v15 = vpop.f32.mrb[63].mxu1 }
 0x1cd   : > { %2831 = vmatmul.mubr.msk.f32.gmra.mrb[124].mxu0 %vm1775_vm1, %v1713_v3  ;;  %2847 = vmatmul.mubr.msk.f32.gmra.mrb[92].mxu1 %vm1775_vm1, %v1729_v1  ;;  %v1674_v47 = vmax.f32 %v962_v14, %v1603_v15 }
 0x1ce   : > { %2218 = vmatprep.mubr.f32.mxu0 %v3428_v27  ;;  %2314 = vmatprep.mubr.f32.mxu1 %v3428_v27  ;;  %v1746_v29 = vadd.f32 %v3866_v31, %v1675_v50 }
 0x1cf   : > { %v1745_v20 = vadd.f32 %v3866_v31, %v1674_v47 }
 0x1d1   : > { %2832 = vmatmul.mubr.msk.f32.gmra.mrb[126].mxu0 %vm1775_vm1, %v1714_v11  ;;  %2848 = vmatmul.mubr.msk.f32.gmra.mrb[94].mxu1 %vm1775_vm1, %v1730_v12 }
 0x1d2   : > { %2320 = vmatprep.mubr.f32.mxu1 %v3428_v27 }
 0x1d5   : > { %2849 = vmatmul.mubr.msk.f32.gmra.mrb[96].mxu1 %vm1775_vm1, %v1731_v13 }
 0x1d6   : > { %2326 = vmatprep.mubr.f32.mxu1 %v3428_v27 }
 0x1d9   : > { %2850 = vmatmul.mubr.msk.f32.gmra.mrb[98].mxu1 %vm1775_vm1, %v1732_v8 }
 0x1da   : > { %2332 = vmatprep.mubr.f32.mxu1 %v3428_v27 }
 0x1dd   : > { %2851 = vmatmul.mubr.msk.f32.gmra.mrb[100].mxu1 %vm1775_vm1, %v1733_v9 }
 0x1de   : > { %2338 = vmatprep.mubr.f32.mxu1 %v3428_v27 }
 0x1e1   : > { %2852 = vmatmul.mubr.msk.f32.gmra.mrb[102].mxu1 %vm1775_vm1, %v1734_v10 }
 0x1e2   : > { %2344 = vmatprep.mubr.f32.mxu1 %v3428_v27 }
 0x1e5   : > { %2853 = vmatmul.mubr.msk.f32.gmra.mrb[104].mxu1 %vm1775_vm1, %v1735_v39 }
 0x1e6   : > { %2350 = vmatprep.mubr.f32.mxu1 %v3428_v27 }
 0x1e9   : > { %2854 = vmatmul.mubr.msk.f32.gmra.mrb[106].mxu1 %vm1775_vm1, %v1736_v19 }
 0x1ea   : > { %2356 = vmatprep.mubr.f32.mxu1 %v3428_v27 }
 0x1ed   : > { %2855 = vmatmul.mubr.msk.f32.gmra.mrb[108].mxu1 %vm1775_vm1, %v1737_v57 }
 0x1ee   : > { %2362 = vmatprep.mubr.f32.mxu1 %v3428_v27 }
 0x1f1   : > { %2856 = vmatmul.mubr.msk.f32.gmra.mrb[110].mxu1 %vm1775_vm1, %v1738_v33 }
 0x1f2   : > { %2368 = vmatprep.mubr.f32.mxu1 %v3428_v27 }
 0x1f5   : > { %2857 = vmatmul.mubr.msk.f32.gmra.mrb[112].mxu1 %vm1775_vm1, %v1739_v34 }
 0x1f6   : > { %2374 = vmatprep.mubr.f32.mxu1 %v3428_v27 }
 0x1f9   : > { %2858 = vmatmul.mubr.msk.f32.gmra.mrb[114].mxu1 %vm1775_vm1, %v1740_v18 }
 0x1fa   : > { %2380 = vmatprep.mubr.f32.mxu1 %v3428_v27 }
 0x1fd   : > { %2859 = vmatmul.mubr.msk.f32.gmra.mrb[116].mxu1 %vm1775_vm1, %v1741_v24 }
 0x1fe   : > { %2386 = vmatprep.mubr.f32.mxu1 %v3428_v27 }
 0x201   : > { %2860 = vmatmul.mubr.msk.f32.gmra.mrb[118].mxu1 %vm1775_vm1, %v1742_v25 }
 0x202   : > { %2392 = vmatprep.mubr.f32.mxu1 %v3428_v27 }
 0x205   : > { %2861 = vmatmul.mubr.msk.f32.gmra.mrb[120].mxu1 %vm1775_vm1, %v1743_v44 }
 0x206   : > { %2398 = vmatprep.mubr.f32.mxu1 %v3428_v27 }
 0x209   : > { %2862 = vmatmul.mubr.msk.f32.gmra.mrb[122].mxu1 %vm1775_vm1, %v1744_v46 }
 0x20a   : > { %2404 = vmatprep.mubr.f32.mxu1 %v3428_v27 }
 0x20d   : > { %2863 = vmatmul.mubr.msk.f32.gmra.mrb[124].mxu1 %vm1775_vm1, %v1745_v20 }
 0x20e   : > { %2410 = vmatprep.mubr.f32.mxu1 %v3428_v27 }
 0x211   : > { %2864 = vmatmul.mubr.msk.f32.gmra.mrb[126].mxu1 %vm1775_vm1, %v1746_v29 }
 0x228   : > { %v2034_v27 = vpop.f32.mrb[64].mxu0 }
 0x229   : > { %v2035_v31 = vadd.f32 %v2034_v27, %v4404_v23  ;;  %v2036_v48 = vpop.f32.mrb[65].mxu0 }
 0x22a   : > { %v2037_v52 = vadd.f32 %v2036_v48, %v4406_v38 }
 0x22b   : > { %2417 = vst [vmem:[%s4411_s8] sm:$0xff] %v2035_v31 }
 0x22c   : > { %2418 = vst [vmem:[%s4411_s8 + $0x8] sm:$0xff] %v2037_v52  ;;  %v2040_v35 = vpop.f32.mrb[66].mxu0 }
 0x22d   : > { %v2041_v0 = vadd.f32 %v2040_v35, %v4404_v23  ;;  %v2042_v7 = vpop.f32.mrb[67].mxu0 }
 0x22e   : > { %v2043_v36 = vadd.f32 %v2042_v7, %v4406_v38 }
 0x22f   : > { %2419 = vst [vmem:[%s4411_s8 + $0x10] sm:$0xff] %v2041_v0 }
 0x230   : > { %2420 = vst [vmem:[%s4411_s8 + $0x18] sm:$0xff] %v2043_v36  ;;  %v2046_v49 = vpop.f32.mrb[68].mxu0 }
 0x231   : > { %v2047_v61 = vadd.f32 %v2046_v49, %v4404_v23  ;;  %v2048_v30 = vpop.f32.mrb[69].mxu0 }
 0x232   : > { %v2049_v45 = vadd.f32 %v2048_v30, %v4406_v38 }
 0x233   : > { %2421 = vst [vmem:[%s4411_s8 + $0x20] sm:$0xff] %v2047_v61 }
 0x234   : > { %2422 = vst [vmem:[%s4411_s8 + $0x28] sm:$0xff] %v2049_v45  ;;  %v2052_v55 = vpop.f32.mrb[70].mxu0 }
 0x235   : > { %v2053_v56 = vadd.f32 %v2052_v55, %v4404_v23  ;;  %v2054_v51 = vpop.f32.mrb[71].mxu0 }
 0x236   : > { %v2055_v59 = vadd.f32 %v2054_v51, %v4406_v38 }
 0x237   : > { %2423 = vst [vmem:[%s4411_s8 + $0x30] sm:$0xff] %v2053_v56 }
 0x238   : > { %2424 = vst [vmem:[%s4411_s8 + $0x38] sm:$0xff] %v2055_v59  ;;  %v2058_v60 = vpop.f32.mrb[72].mxu0 }
 0x239   : > { %v2059_v32 = vadd.f32 %v2058_v60, %v4404_v23  ;;  %v2060_v16 = vpop.f32.mrb[73].mxu0 }
 0x23a   : > { %v2061_v26 = vadd.f32 %v2060_v16, %v4406_v38 }
 0x23b   : > { %2425 = vst [vmem:[%s4411_s8 + $0x40] sm:$0xff] %v2059_v32 }
 0x23c   : > { %2426 = vst [vmem:[%s4411_s8 + $0x48] sm:$0xff] %v2061_v26  ;;  %v2064_v21 = vpop.f32.mrb[74].mxu0 }
 0x23d   : > { %v2065_v22 = vadd.f32 %v2064_v21, %v4404_v23  ;;  %v2066_v4 = vpop.f32.mrb[75].mxu0 }
 0x23e   : > { %v2067_v5 = vadd.f32 %v2066_v4, %v4406_v38 }
 0x23f   : > { %2427 = vst [vmem:[%s4411_s8 + $0x50] sm:$0xff] %v2065_v22 }
 0x240   : > { %2428 = vst [vmem:[%s4411_s8 + $0x58] sm:$0xff] %v2067_v5  ;;  %v2070_v6 = vpop.f32.mrb[76].mxu0 }
 0x241   : > { %v2071_v37 = vadd.f32 %v2070_v6, %v4404_v23  ;;  %v2072_v53 = vpop.f32.mrb[77].mxu0 }
 0x242   : > { %v2073_v62 = vadd.f32 %v2072_v53, %v4406_v38 }
 0x243   : > { %2429 = vst [vmem:[%s4411_s8 + $0x60] sm:$0xff] %v2071_v37 }
 0x244   : > { %2430 = vst [vmem:[%s4411_s8 + $0x68] sm:$0xff] %v2073_v62  ;;  %v2076_v63 = vpop.f32.mrb[78].mxu0 }
 0x245   : > { %v2077_v58 = vadd.f32 %v2076_v63, %v4404_v23  ;;  %v2078_v1 = vpop.f32.mrb[79].mxu0 }
 0x246   : > { %v2079_v2 = vadd.f32 %v2078_v1, %v4406_v38 }
 0x247   : > { %2431 = vst [vmem:[%s4411_s8 + $0x70] sm:$0xff] %v2077_v58 }
 0x248   : > { %2432 = vst [vmem:[%s4411_s8 + $0x78] sm:$0xff] %v2079_v2  ;;  %v2082_v3 = vpop.f32.mrb[80].mxu0 }
 0x249   : > { %v2083_v42 = vadd.f32 %v2082_v3, %v4404_v23  ;;  %v2084_v43 = vpop.f32.mrb[81].mxu0 }
 0x24a   : > { %v2085_v50 = vadd.f32 %v2084_v43, %v4406_v38 }
 0x24b   : > { %2433 = vst [vmem:[%s4411_s8 + $0x80] sm:$0xff] %v2083_v42 }
 0x24c   : > { %2434 = vst [vmem:[%s4411_s8 + $0x88] sm:$0xff] %v2085_v50  ;;  %v2088_v14 = vpop.f32.mrb[82].mxu0 }
 0x24d   : > { %v2089_v15 = vadd.f32 %v2088_v14, %v4404_v23  ;;  %v2090_v47 = vpop.f32.mrb[83].mxu0 }
 0x24e   : > { %v2091_v11 = vadd.f32 %v2090_v47, %v4406_v38 }
 0x24f   : > { %2435 = vst [vmem:[%s4411_s8 + $0x90] sm:$0xff] %v2089_v15 }
 0x250   : > { %2436 = vst [vmem:[%s4411_s8 + $0x98] sm:$0xff] %v2091_v11  ;;  %v2094_v12 = vpop.f32.mrb[84].mxu0 }
 0x251   : > { %v2095_v13 = vadd.f32 %v2094_v12, %v4404_v23  ;;  %v2096_v8 = vpop.f32.mrb[85].mxu0 }
 0x252   : > { %v2097_v9 = vadd.f32 %v2096_v8, %v4406_v38 }
 0x253   : > { %2437 = vst [vmem:[%s4411_s8 + $0xa0] sm:$0xff] %v2095_v13 }
 0x254   : > { %2438 = vst [vmem:[%s4411_s8 + $0xa8] sm:$0xff] %v2097_v9  ;;  %v2100_v10 = vpop.f32.mrb[86].mxu0 }
 0x255   : > { %v2101_v39 = vadd.f32 %v2100_v10, %v4404_v23  ;;  %v2102_v19 = vpop.f32.mrb[87].mxu0 }
 0x256   : > { %v2103_v57 = vadd.f32 %v2102_v19, %v4406_v38 }
 0x257   : > { %2439 = vst [vmem:[%s4411_s8 + $0xb0] sm:$0xff] %v2101_v39 }
 0x258   : > { %2440 = vst [vmem:[%s4411_s8 + $0xb8] sm:$0xff] %v2103_v57  ;;  %v2106_v33 = vpop.f32.mrb[88].mxu0 }
 0x259   : > { %v2107_v34 = vadd.f32 %v2106_v33, %v4404_v23  ;;  %v2108_v18 = vpop.f32.mrb[89].mxu0 }
 0x25a   : > { %v2109_v24 = vadd.f32 %v2108_v18, %v4406_v38 }
 0x25b   : > { %2441 = vst [vmem:[%s4411_s8 + $0xc0] sm:$0xff] %v2107_v34 }
 0x25c   : > { %2442 = vst [vmem:[%s4411_s8 + $0xc8] sm:$0xff] %v2109_v24  ;;  %v2112_v25 = vpop.f32.mrb[90].mxu0 }
 0x25d   : > { %v2113_v44 = vadd.f32 %v2112_v25, %v4404_v23  ;;  %v2114_v46 = vpop.f32.mrb[91].mxu0 }
 0x25e   : > { %v2115_v20 = vadd.f32 %v2114_v46, %v4406_v38 }
 0x25f   : > { %2443 = vst [vmem:[%s4411_s8 + $0xd0] sm:$0xff] %v2113_v44 }
 0x260   : > { %2444 = vst [vmem:[%s4411_s8 + $0xd8] sm:$0xff] %v2115_v20  ;;  %v2118_v29 = vpop.f32.mrb[92].mxu0 }
 0x261   : > { %v2119_v17 = vadd.f32 %v2118_v29, %v4404_v23  ;;  %v2120_v28 = vpop.f32.mrb[93].mxu0 }
 0x262   : > { %v2121_v54 = vadd.f32 %v2120_v28, %v4406_v38 }
 0x263   : > { %2445 = vst [vmem:[%s4411_s8 + $0xe0] sm:$0xff] %v2119_v17 }
 0x264   : > { %2446 = vst [vmem:[%s4411_s8 + $0xe8] sm:$0xff] %v2121_v54  ;;  %v2124_v40 = vpop.f32.mrb[94].mxu0 }
 0x265   : > { %v2125_v41 = vadd.f32 %v2124_v40, %v4404_v23  ;;  %v2126_v27 = vpop.f32.mrb[95].mxu0 }
 0x266   : > { %v2127_v31 = vadd.f32 %v2126_v27, %v4406_v38 }
 0x267   : > { %2447 = vst [vmem:[%s4411_s8 + $0xf0] sm:$0xff] %v2125_v41 }
 0x268   : > { %2448 = vst [vmem:[%s4411_s8 + $0xf8] sm:$0xff] %v2127_v31  ;;  %v2130_v48 = vpop.f32.mrb[96].mxu0  ;;  %v2226_v52 = vpop.f32.mrb[64].mxu1 }
 0x269   : > { %v2131_v35 = vadd.f32 %v2130_v48, %v4404_v23  ;;  %v2227_v0 = vadd.f32 %v2226_v52, %v4404_v23  ;;  %v2132_v7 = vpop.f32.mrb[97].mxu0  ;;  %v2228_v36 = vpop.f32.mrb[65].mxu1 }
 0x26a   : > { %v2133_v49 = vadd.f32 %v2132_v7, %v4406_v38  ;;  %v2229_v61 = vadd.f32 %v2228_v36, %v4406_v38 }
 0x26b   : > { %2449 = vst [vmem:[%s4411_s8 + $0x100] sm:$0xff] %v2131_v35  ;;  %2481 = vst [vmem:[%s4411_s8 + $0x200] sm:$0xff] %v2227_v0 }
 0x26c   : > { %2450 = vst [vmem:[%s4411_s8 + $0x108] sm:$0xff] %v2133_v49  ;;  %2482 = vst [vmem:[%s4411_s8 + $0x208] sm:$0xff] %v2229_v61  ;;  %v2136_v30 = vpop.f32.mrb[98].mxu0  ;;  %v2232_v45 = vpop.f32.mrb[66].mxu1 }
 0x26d   : > { %v2137_v55 = vadd.f32 %v2136_v30, %v4404_v23  ;;  %v2233_v56 = vadd.f32 %v2232_v45, %v4404_v23  ;;  %v2138_v51 = vpop.f32.mrb[99].mxu0  ;;  %v2234_v59 = vpop.f32.mrb[67].mxu1 }
 0x26e   : > { %v2139_v60 = vadd.f32 %v2138_v51, %v4406_v38  ;;  %v2235_v32 = vadd.f32 %v2234_v59, %v4406_v38 }
 0x26f   : > { %2451 = vst [vmem:[%s4411_s8 + $0x110] sm:$0xff] %v2137_v55  ;;  %2483 = vst [vmem:[%s4411_s8 + $0x210] sm:$0xff] %v2233_v56 }
 0x270   : > { %2452 = vst [vmem:[%s4411_s8 + $0x118] sm:$0xff] %v2139_v60  ;;  %2484 = vst [vmem:[%s4411_s8 + $0x218] sm:$0xff] %v2235_v32  ;;  %v2142_v16 = vpop.f32.mrb[100].mxu0  ;;  %v2238_v26 = vpop.f32.mrb[68].mxu1 }
 0x271   : > { %v2143_v21 = vadd.f32 %v2142_v16, %v4404_v23  ;;  %v2239_v22 = vadd.f32 %v2238_v26, %v4404_v23  ;;  %v2144_v4 = vpop.f32.mrb[101].mxu0  ;;  %v2240_v5 = vpop.f32.mrb[69].mxu1 }
 0x272   : > { %v2145_v6 = vadd.f32 %v2144_v4, %v4406_v38  ;;  %v2241_v37 = vadd.f32 %v2240_v5, %v4406_v38 }
 0x273   : > { %2453 = vst [vmem:[%s4411_s8 + $0x120] sm:$0xff] %v2143_v21  ;;  %2485 = vst [vmem:[%s4411_s8 + $0x220] sm:$0xff] %v2239_v22 }
 0x274   : > { %2454 = vst [vmem:[%s4411_s8 + $0x128] sm:$0xff] %v2145_v6  ;;  %2486 = vst [vmem:[%s4411_s8 + $0x228] sm:$0xff] %v2241_v37  ;;  %v2148_v53 = vpop.f32.mrb[102].mxu0  ;;  %v2244_v62 = vpop.f32.mrb[70].mxu1 }
 0x275   : > { %v2149_v63 = vadd.f32 %v2148_v53, %v4404_v23  ;;  %v2245_v58 = vadd.f32 %v2244_v62, %v4404_v23  ;;  %v2150_v1 = vpop.f32.mrb[103].mxu0  ;;  %v2246_v2 = vpop.f32.mrb[71].mxu1 }
 0x276   : > { %v2151_v3 = vadd.f32 %v2150_v1, %v4406_v38  ;;  %v2247_v42 = vadd.f32 %v2246_v2, %v4406_v38 }
 0x277   : > { %2455 = vst [vmem:[%s4411_s8 + $0x130] sm:$0xff] %v2149_v63  ;;  %2487 = vst [vmem:[%s4411_s8 + $0x230] sm:$0xff] %v2245_v58 }
 0x278   : > { %2456 = vst [vmem:[%s4411_s8 + $0x138] sm:$0xff] %v2151_v3  ;;  %2488 = vst [vmem:[%s4411_s8 + $0x238] sm:$0xff] %v2247_v42  ;;  %v2154_v43 = vpop.f32.mrb[104].mxu0  ;;  %v2250_v50 = vpop.f32.mrb[72].mxu1 }
 0x279   : > { %v2155_v14 = vadd.f32 %v2154_v43, %v4404_v23  ;;  %v2251_v15 = vadd.f32 %v2250_v50, %v4404_v23  ;;  %v2156_v47 = vpop.f32.mrb[105].mxu0  ;;  %v2252_v11 = vpop.f32.mrb[73].mxu1 }
 0x27a   : > { %v2157_v12 = vadd.f32 %v2156_v47, %v4406_v38  ;;  %v2253_v13 = vadd.f32 %v2252_v11, %v4406_v38 }
 0x27b   : > { %2457 = vst [vmem:[%s4411_s8 + $0x140] sm:$0xff] %v2155_v14  ;;  %2489 = vst [vmem:[%s4411_s8 + $0x240] sm:$0xff] %v2251_v15 }
 0x27c   : > { %2458 = vst [vmem:[%s4411_s8 + $0x148] sm:$0xff] %v2157_v12  ;;  %2490 = vst [vmem:[%s4411_s8 + $0x248] sm:$0xff] %v2253_v13  ;;  %v2160_v8 = vpop.f32.mrb[106].mxu0  ;;  %v2256_v9 = vpop.f32.mrb[74].mxu1 }
 0x27d   : > { %v2161_v10 = vadd.f32 %v2160_v8, %v4404_v23  ;;  %v2257_v39 = vadd.f32 %v2256_v9, %v4404_v23  ;;  %v2162_v19 = vpop.f32.mrb[107].mxu0  ;;  %v2258_v57 = vpop.f32.mrb[75].mxu1 }
 0x27e   : > { %v2163_v33 = vadd.f32 %v2162_v19, %v4406_v38  ;;  %v2259_v34 = vadd.f32 %v2258_v57, %v4406_v38 }
 0x27f   : > { %2459 = vst [vmem:[%s4411_s8 + $0x150] sm:$0xff] %v2161_v10  ;;  %2491 = vst [vmem:[%s4411_s8 + $0x250] sm:$0xff] %v2257_v39 }
 0x280   : > { %2460 = vst [vmem:[%s4411_s8 + $0x158] sm:$0xff] %v2163_v33  ;;  %2492 = vst [vmem:[%s4411_s8 + $0x258] sm:$0xff] %v2259_v34  ;;  %v2166_v18 = vpop.f32.mrb[108].mxu0  ;;  %v2262_v24 = vpop.f32.mrb[76].mxu1 }
 0x281   : > { %v2167_v25 = vadd.f32 %v2166_v18, %v4404_v23  ;;  %v2263_v44 = vadd.f32 %v2262_v24, %v4404_v23  ;;  %v2168_v46 = vpop.f32.mrb[109].mxu0  ;;  %v2264_v20 = vpop.f32.mrb[77].mxu1 }
 0x282   : > { %v2169_v29 = vadd.f32 %v2168_v46, %v4406_v38  ;;  %v2265_v17 = vadd.f32 %v2264_v20, %v4406_v38 }
 0x283   : > { %2461 = vst [vmem:[%s4411_s8 + $0x160] sm:$0xff] %v2167_v25  ;;  %2493 = vst [vmem:[%s4411_s8 + $0x260] sm:$0xff] %v2263_v44 }
 0x284   : > { %2462 = vst [vmem:[%s4411_s8 + $0x168] sm:$0xff] %v2169_v29  ;;  %2494 = vst [vmem:[%s4411_s8 + $0x268] sm:$0xff] %v2265_v17  ;;  %v2172_v28 = vpop.f32.mrb[110].mxu0  ;;  %v2268_v54 = vpop.f32.mrb[78].mxu1 }
 0x285   : > { %v2173_v40 = vadd.f32 %v2172_v28, %v4404_v23  ;;  %v2269_v41 = vadd.f32 %v2268_v54, %v4404_v23  ;;  %v2174_v27 = vpop.f32.mrb[111].mxu0  ;;  %v2270_v31 = vpop.f32.mrb[79].mxu1 }
 0x286   : > { %v2175_v48 = vadd.f32 %v2174_v27, %v4406_v38  ;;  %v2271_v52 = vadd.f32 %v2270_v31, %v4406_v38 }
 0x287   : > { %2463 = vst [vmem:[%s4411_s8 + $0x170] sm:$0xff] %v2173_v40  ;;  %2495 = vst [vmem:[%s4411_s8 + $0x270] sm:$0xff] %v2269_v41 }
 0x288   : > { %2464 = vst [vmem:[%s4411_s8 + $0x178] sm:$0xff] %v2175_v48  ;;  %2496 = vst [vmem:[%s4411_s8 + $0x278] sm:$0xff] %v2271_v52  ;;  %v2178_v35 = vpop.f32.mrb[112].mxu0  ;;  %v2274_v0 = vpop.f32.mrb[80].mxu1 }
 0x289   : > { %v2179_v7 = vadd.f32 %v2178_v35, %v4404_v23  ;;  %v2275_v36 = vadd.f32 %v2274_v0, %v4404_v23  ;;  %v2180_v49 = vpop.f32.mrb[113].mxu0  ;;  %v2276_v61 = vpop.f32.mrb[81].mxu1 }
 0x28a   : > { %v2181_v30 = vadd.f32 %v2180_v49, %v4406_v38  ;;  %v2277_v45 = vadd.f32 %v2276_v61, %v4406_v38 }
 0x28b   : > { %2465 = vst [vmem:[%s4411_s8 + $0x180] sm:$0xff] %v2179_v7  ;;  %2497 = vst [vmem:[%s4411_s8 + $0x280] sm:$0xff] %v2275_v36 }
 0x28c   : > { %2466 = vst [vmem:[%s4411_s8 + $0x188] sm:$0xff] %v2181_v30  ;;  %2498 = vst [vmem:[%s4411_s8 + $0x288] sm:$0xff] %v2277_v45  ;;  %v2184_v55 = vpop.f32.mrb[114].mxu0  ;;  %v2280_v56 = vpop.f32.mrb[82].mxu1 }
 0x28d   : > { %v2185_v51 = vadd.f32 %v2184_v55, %v4404_v23  ;;  %v2281_v59 = vadd.f32 %v2280_v56, %v4404_v23  ;;  %v2186_v60 = vpop.f32.mrb[115].mxu0  ;;  %v2282_v32 = vpop.f32.mrb[83].mxu1 }
 0x28e   : > { %v2187_v16 = vadd.f32 %v2186_v60, %v4406_v38  ;;  %v2283_v26 = vadd.f32 %v2282_v32, %v4406_v38 }
 0x28f   : > { %2467 = vst [vmem:[%s4411_s8 + $0x190] sm:$0xff] %v2185_v51  ;;  %2499 = vst [vmem:[%s4411_s8 + $0x290] sm:$0xff] %v2281_v59 }
 0x290   : > { %2468 = vst [vmem:[%s4411_s8 + $0x198] sm:$0xff] %v2187_v16  ;;  %2500 = vst [vmem:[%s4411_s8 + $0x298] sm:$0xff] %v2283_v26  ;;  %v2190_v21 = vpop.f32.mrb[116].mxu0  ;;  %v2286_v22 = vpop.f32.mrb[84].mxu1 }
 0x291   : > { %v2191_v4 = vadd.f32 %v2190_v21, %v4404_v23  ;;  %v2287_v5 = vadd.f32 %v2286_v22, %v4404_v23  ;;  %v2192_v6 = vpop.f32.mrb[117].mxu0  ;;  %v2288_v37 = vpop.f32.mrb[85].mxu1 }
 0x292   : > { %v2193_v53 = vadd.f32 %v2192_v6, %v4406_v38  ;;  %v2289_v62 = vadd.f32 %v2288_v37, %v4406_v38 }
 0x293   : > { %2469 = vst [vmem:[%s4411_s8 + $0x1a0] sm:$0xff] %v2191_v4  ;;  %2501 = vst [vmem:[%s4411_s8 + $0x2a0] sm:$0xff] %v2287_v5 }
 0x294   : > { %2470 = vst [vmem:[%s4411_s8 + $0x1a8] sm:$0xff] %v2193_v53  ;;  %2502 = vst [vmem:[%s4411_s8 + $0x2a8] sm:$0xff] %v2289_v62  ;;  %v2196_v63 = vpop.f32.mrb[118].mxu0  ;;  %v2292_v58 = vpop.f32.mrb[86].mxu1 }
 0x295   : > { %v2197_v1 = vadd.f32 %v2196_v63, %v4404_v23  ;;  %v2293_v2 = vadd.f32 %v2292_v58, %v4404_v23  ;;  %v2198_v3 = vpop.f32.mrb[119].mxu0  ;;  %v2294_v42 = vpop.f32.mrb[87].mxu1 }
 0x296   : > { %v2199_v43 = vadd.f32 %v2198_v3, %v4406_v38  ;;  %v2295_v50 = vadd.f32 %v2294_v42, %v4406_v38 }
 0x297   : > { %2471 = vst [vmem:[%s4411_s8 + $0x1b0] sm:$0xff] %v2197_v1  ;;  %2503 = vst [vmem:[%s4411_s8 + $0x2b0] sm:$0xff] %v2293_v2 }
 0x298   : > { %2472 = vst [vmem:[%s4411_s8 + $0x1b8] sm:$0xff] %v2199_v43  ;;  %2504 = vst [vmem:[%s4411_s8 + $0x2b8] sm:$0xff] %v2295_v50  ;;  %v2202_v14 = vpop.f32.mrb[120].mxu0  ;;  %v2298_v15 = vpop.f32.mrb[88].mxu1 }
 0x299   : > { %v2203_v47 = vadd.f32 %v2202_v14, %v4404_v23  ;;  %v2299_v11 = vadd.f32 %v2298_v15, %v4404_v23  ;;  %v2204_v12 = vpop.f32.mrb[121].mxu0  ;;  %v2300_v13 = vpop.f32.mrb[89].mxu1 }
 0x29a   : > { %v2205_v8 = vadd.f32 %v2204_v12, %v4406_v38  ;;  %v2301_v9 = vadd.f32 %v2300_v13, %v4406_v38 }
 0x29b   : > { %2473 = vst [vmem:[%s4411_s8 + $0x1c0] sm:$0xff] %v2203_v47  ;;  %2505 = vst [vmem:[%s4411_s8 + $0x2c0] sm:$0xff] %v2299_v11 }
 0x29c   : > { %2474 = vst [vmem:[%s4411_s8 + $0x1c8] sm:$0xff] %v2205_v8  ;;  %2506 = vst [vmem:[%s4411_s8 + $0x2c8] sm:$0xff] %v2301_v9  ;;  %v2208_v10 = vpop.f32.mrb[122].mxu0  ;;  %v2304_v39 = vpop.f32.mrb[90].mxu1 }
 0x29d   : > { %v2209_v19 = vadd.f32 %v2208_v10, %v4404_v23  ;;  %v2305_v57 = vadd.f32 %v2304_v39, %v4404_v23  ;;  %v2210_v33 = vpop.f32.mrb[123].mxu0  ;;  %v2306_v34 = vpop.f32.mrb[91].mxu1 }
 0x29e   : > { %v2211_v18 = vadd.f32 %v2210_v33, %v4406_v38  ;;  %v2307_v24 = vadd.f32 %v2306_v34, %v4406_v38 }
 0x29f   : > { %2475 = vst [vmem:[%s4411_s8 + $0x1d0] sm:$0xff] %v2209_v19  ;;  %2507 = vst [vmem:[%s4411_s8 + $0x2d0] sm:$0xff] %v2305_v57 }
 0x2a0   : > { %2476 = vst [vmem:[%s4411_s8 + $0x1d8] sm:$0xff] %v2211_v18  ;;  %2508 = vst [vmem:[%s4411_s8 + $0x2d8] sm:$0xff] %v2307_v24  ;;  %v2214_v25 = vpop.f32.mrb[124].mxu0  ;;  %v2310_v44 = vpop.f32.mrb[92].mxu1 }
 0x2a1   : > { %v2215_v46 = vadd.f32 %v2214_v25, %v4404_v23  ;;  %v2311_v20 = vadd.f32 %v2310_v44, %v4404_v23  ;;  %v2216_v29 = vpop.f32.mrb[125].mxu0  ;;  %v2312_v17 = vpop.f32.mrb[93].mxu1 }
 0x2a2   : > { %v2217_v28 = vadd.f32 %v2216_v29, %v4406_v38  ;;  %v2313_v54 = vadd.f32 %v2312_v17, %v4406_v38 }
 0x2a3   : > { %2477 = vst [vmem:[%s4411_s8 + $0x1e0] sm:$0xff] %v2215_v46  ;;  %2509 = vst [vmem:[%s4411_s8 + $0x2e0] sm:$0xff] %v2311_v20 }
 0x2a4   : > { %2478 = vst [vmem:[%s4411_s8 + $0x1e8] sm:$0xff] %v2217_v28  ;;  %2510 = vst [vmem:[%s4411_s8 + $0x2e8] sm:$0xff] %v2313_v54  ;;  %v2220_v40 = vpop.f32.mrb[126].mxu0  ;;  %v2316_v41 = vpop.f32.mrb[94].mxu1 }
 0x2a5   : > { %v2221_v27 = vadd.f32 %v2220_v40, %v4404_v23  ;;  %v2317_v31 = vadd.f32 %v2316_v41, %v4404_v23  ;;  %v2222_v48 = vpop.f32.mrb[127].mxu0  ;;  %v2318_v52 = vpop.f32.mrb[95].mxu1 }
 0x2a6   : > { %v2223_v35 = vadd.f32 %v2222_v48, %v4406_v38  ;;  %v2319_v0 = vadd.f32 %v2318_v52, %v4406_v38 }
 0x2a7   : > { %2479 = vst [vmem:[%s4411_s8 + $0x1f0] sm:$0xff] %v2221_v27  ;;  %2511 = vst [vmem:[%s4411_s8 + $0x2f0] sm:$0xff] %v2317_v31 }
 0x2a8   : > { %2480 = vst [vmem:[%s4411_s8 + $0x1f8] sm:$0xff] %v2223_v35  ;;  %2512 = vst [vmem:[%s4411_s8 + $0x2f8] sm:$0xff] %v2319_v0  ;;  %v2322_v7 = vpop.f32.mrb[96].mxu1 }
 0x2a9   : > { %v2323_v36 = vadd.f32 %v2322_v7, %v4404_v23  ;;  %v2324_v49 = vpop.f32.mrb[97].mxu1 }
 0x2aa   : > { %v2325_v61 = vadd.f32 %v2324_v49, %v4406_v38 }
 0x2ab   : > { %2513 = vst [vmem:[%s4411_s8 + $0x300] sm:$0xff] %v2323_v36 }
 0x2ac   : > { %2514 = vst [vmem:[%s4411_s8 + $0x308] sm:$0xff] %v2325_v61  ;;  %v2328_v30 = vpop.f32.mrb[98].mxu1 }
 0x2ad   : > { %v2329_v45 = vadd.f32 %v2328_v30, %v4404_v23  ;;  %v2330_v55 = vpop.f32.mrb[99].mxu1 }
 0x2ae   : > { %v2331_v56 = vadd.f32 %v2330_v55, %v4406_v38 }
 0x2af   : > { %2515 = vst [vmem:[%s4411_s8 + $0x310] sm:$0xff] %v2329_v45 }
 0x2b0   : > { %2516 = vst [vmem:[%s4411_s8 + $0x318] sm:$0xff] %v2331_v56  ;;  %v2334_v51 = vpop.f32.mrb[100].mxu1 }
 0x2b1   : > { %v2335_v59 = vadd.f32 %v2334_v51, %v4404_v23  ;;  %v2336_v60 = vpop.f32.mrb[101].mxu1 }
 0x2b2   : > { %v2337_v32 = vadd.f32 %v2336_v60, %v4406_v38 }
 0x2b3   : > { %2517 = vst [vmem:[%s4411_s8 + $0x320] sm:$0xff] %v2335_v59 }
 0x2b4   : > { %2518 = vst [vmem:[%s4411_s8 + $0x328] sm:$0xff] %v2337_v32  ;;  %v2340_v16 = vpop.f32.mrb[102].mxu1 }
 0x2b5   : > { %v2341_v26 = vadd.f32 %v2340_v16, %v4404_v23  ;;  %v2342_v21 = vpop.f32.mrb[103].mxu1 }
 0x2b6   : > { %v2343_v22 = vadd.f32 %v2342_v21, %v4406_v38 }
 0x2b7   : > { %2519 = vst [vmem:[%s4411_s8 + $0x330] sm:$0xff] %v2341_v26 }
 0x2b8   : > { %2520 = vst [vmem:[%s4411_s8 + $0x338] sm:$0xff] %v2343_v22  ;;  %v2346_v4 = vpop.f32.mrb[104].mxu1 }
 0x2b9   : > { %v2347_v5 = vadd.f32 %v2346_v4, %v4404_v23  ;;  %v2348_v6 = vpop.f32.mrb[105].mxu1 }
 0x2ba   : > { %v2349_v37 = vadd.f32 %v2348_v6, %v4406_v38 }
 0x2bb   : > { %2521 = vst [vmem:[%s4411_s8 + $0x340] sm:$0xff] %v2347_v5 }
 0x2bc   : > { %2522 = vst [vmem:[%s4411_s8 + $0x348] sm:$0xff] %v2349_v37  ;;  %v2352_v53 = vpop.f32.mrb[106].mxu1 }
 0x2bd   : > { %v2353_v62 = vadd.f32 %v2352_v53, %v4404_v23  ;;  %v2354_v63 = vpop.f32.mrb[107].mxu1 }
 0x2be   : > { %v2355_v58 = vadd.f32 %v2354_v63, %v4406_v38 }
 0x2bf   : > { %2523 = vst [vmem:[%s4411_s8 + $0x350] sm:$0xff] %v2353_v62 }
 0x2c0   : > { %2524 = vst [vmem:[%s4411_s8 + $0x358] sm:$0xff] %v2355_v58  ;;  %v2358_v1 = vpop.f32.mrb[108].mxu1 }
 0x2c1   : > { %v2359_v2 = vadd.f32 %v2358_v1, %v4404_v23  ;;  %v2360_v3 = vpop.f32.mrb[109].mxu1 }
 0x2c2   : > { %v2361_v42 = vadd.f32 %v2360_v3, %v4406_v38 }
 0x2c3   : > { %2525 = vst [vmem:[%s4411_s8 + $0x360] sm:$0xff] %v2359_v2 }
 0x2c4   : > { %2526 = vst [vmem:[%s4411_s8 + $0x368] sm:$0xff] %v2361_v42  ;;  %v2364_v43 = vpop.f32.mrb[110].mxu1 }
 0x2c5   : > { %v2365_v50 = vadd.f32 %v2364_v43, %v4404_v23  ;;  %v2366_v14 = vpop.f32.mrb[111].mxu1 }
 0x2c6   : > { %v2367_v15 = vadd.f32 %v2366_v14, %v4406_v38 }
 0x2c7   : > { %2527 = vst [vmem:[%s4411_s8 + $0x370] sm:$0xff] %v2365_v50 }
 0x2c8   : > { %2528 = vst [vmem:[%s4411_s8 + $0x378] sm:$0xff] %v2367_v15  ;;  %v2370_v47 = vpop.f32.mrb[112].mxu1 }
 0x2c9   : > { %v2371_v11 = vadd.f32 %v2370_v47, %v4404_v23  ;;  %v2372_v12 = vpop.f32.mrb[113].mxu1 }
 0x2ca   : > { %v2373_v13 = vadd.f32 %v2372_v12, %v4406_v38 }
 0x2cb   : > { %2529 = vst [vmem:[%s4411_s8 + $0x380] sm:$0xff] %v2371_v11 }
 0x2cc   : > { %2530 = vst [vmem:[%s4411_s8 + $0x388] sm:$0xff] %v2373_v13  ;;  %v2376_v8 = vpop.f32.mrb[114].mxu1 }
 0x2cd   : > { %v2377_v9 = vadd.f32 %v2376_v8, %v4404_v23  ;;  %v2378_v10 = vpop.f32.mrb[115].mxu1 }
 0x2ce   : > { %v2379_v39 = vadd.f32 %v2378_v10, %v4406_v38 }
 0x2cf   : > { %2531 = vst [vmem:[%s4411_s8 + $0x390] sm:$0xff] %v2377_v9 }
 0x2d0   : > { %2532 = vst [vmem:[%s4411_s8 + $0x398] sm:$0xff] %v2379_v39  ;;  %v2382_v19 = vpop.f32.mrb[116].mxu1 }
 0x2d1   : > { %v2383_v57 = vadd.f32 %v2382_v19, %v4404_v23  ;;  %v2384_v33 = vpop.f32.mrb[117].mxu1 }
 0x2d2   : > { %v2385_v34 = vadd.f32 %v2384_v33, %v4406_v38 }
 0x2d3   : > { %2533 = vst [vmem:[%s4411_s8 + $0x3a0] sm:$0xff] %v2383_v57 }
 0x2d4   : > { %2534 = vst [vmem:[%s4411_s8 + $0x3a8] sm:$0xff] %v2385_v34  ;;  %v2388_v18 = vpop.f32.mrb[118].mxu1 }
 0x2d5   : > { %v2389_v24 = vadd.f32 %v2388_v18, %v4404_v23  ;;  %v2390_v25 = vpop.f32.mrb[119].mxu1 }
 0x2d6   : > { %v2391_v44 = vadd.f32 %v2390_v25, %v4406_v38 }
 0x2d7   : > { %2535 = vst [vmem:[%s4411_s8 + $0x3b0] sm:$0xff] %v2389_v24 }
 0x2d8   : > { %2536 = vst [vmem:[%s4411_s8 + $0x3b8] sm:$0xff] %v2391_v44  ;;  %v2394_v46 = vpop.f32.mrb[120].mxu1 }
 0x2d9   : > { %v2395_v20 = vadd.f32 %v2394_v46, %v4404_v23  ;;  %v2396_v29 = vpop.f32.mrb[121].mxu1 }
 0x2da   : > { %v2397_v17 = vadd.f32 %v2396_v29, %v4406_v38 }
 0x2db   : > { %2537 = vst [vmem:[%s4411_s8 + $0x3c0] sm:$0xff] %v2395_v20 }
 0x2dc   : > { %2538 = vst [vmem:[%s4411_s8 + $0x3c8] sm:$0xff] %v2397_v17  ;;  %v2400_v28 = vpop.f32.mrb[122].mxu1 }
 0x2dd   : > { %v2401_v54 = vadd.f32 %v2400_v28, %v4404_v23  ;;  %v2402_v40 = vpop.f32.mrb[123].mxu1 }
 0x2de   : > { %v2403_v41 = vadd.f32 %v2402_v40, %v4406_v38 }
 0x2df   : > { %2539 = vst [vmem:[%s4411_s8 + $0x3d0] sm:$0xff] %v2401_v54 }
 0x2e0   : > { %2540 = vst [vmem:[%s4411_s8 + $0x3d8] sm:$0xff] %v2403_v41  ;;  %v2406_v27 = vpop.f32.mrb[124].mxu1 }
 0x2e1   : > { %v2407_v31 = vadd.f32 %v2406_v27, %v4404_v23  ;;  %v2408_v48 = vpop.f32.mrb[125].mxu1 }
 0x2e2   : > { %v2409_v52 = vadd.f32 %v2408_v48, %v4406_v38 }
 0x2e3   : > { %2541 = vst [vmem:[%s4411_s8 + $0x3e0] sm:$0xff] %v2407_v31 }
 0x2e4   : > { %2542 = vst [vmem:[%s4411_s8 + $0x3e8] sm:$0xff] %v2409_v52  ;;  %v2412_v35 = vpop.f32.mrb[126].mxu1 }
 0x2e5   : > { %v2413_v0 = vadd.f32 %v2412_v35, %v4404_v23  ;;  %v2414_v7 = vpop.f32.mrb[127].mxu1 }
 0x2e6   : > { %v2415_v36 = vadd.f32 %v2414_v7, %v4406_v38 }
 0x2e7   : > { %2543 = vst [vmem:[%s4411_s8 + $0x3f0] sm:$0xf] %v2413_v0 }
 0x2e8   : > { %2544 = vst [vmem:[%s4411_s8 + $0x3f8] sm:$0xf] %v2415_v36 }
 0x2e9 PF: > { %s19_s21 = sadd.s32 1, %s3418_s21  }
 0x2ea   : > { %p16_p11 = scmp.ge.s32.totalorder %s19_s21, 4  }
 0x2ec   :  { %18 = sbr.rel (!%p16_p11) target bundleno = 3 (0x3), region = 94 }
 0x2f3   :  { %2566 = vsyncpa [#allocation3], 1 }
 0x2f4   :  { %2568 = vsyncpa [#allocation3 + $0x1], 1 }
 0x2f5   :  { %2569 = vsyncpa [#allocation5], 1 }
 0x2f6   :  { %2570 = vsyncpa [#allocation8], 1 }

// kernel: cldnn_g_forward.4
= control target key start
LH: loop header
LB: loop body
LE: loop exit
PB: predicated region body
PF: predicated region fallthrough
CT: control target
= control target key end

     0   :  { %10 = vsyncpa [#allocation3], 0  ;;  %s913_s0 = inlined_call_operand.vmem [shape: f32[508,2,256], index: 0, kind: input, shape index: {}]   ;;  %s914_s1 = inlined_call_operand.hbm [shape: f32[64,256], index: 1, kind: input, shape index: {}]   ;;  %s915_s2 = inlined_call_operand.hbm [shape: f32[64,256], index: 2, kind: input, shape index: {}]   ;;  %s916_s3 = inlined_call_operand.hbm [shape: f32[64,256], index: 3, kind: input, shape index: {}]   ;;  %s917_s4 = inlined_call_operand.hbm [shape: f32[1,256], index: 4, kind: input, shape index: {}]   ;;  %s918_s5 = inlined_call_operand.vmem [shape: f32[508,2,64], index: 5, kind: output, shape index: {}]  }
   0x1   :  { %11 = vsyncpa [#allocation5], 0 }
   0x2   :  { %12 = vsyncpa [#allocation8], 0  ;;  %s743_s18 = smov [#allocation4]   ;;  %s744_s20 = smov [#allocation2]  }
   0x3   :  { %s32_s19 = sshll.u32 %s743_s18, 4  ;;  %s20_s21 = sshll.u32 %s744_s20, 4  ;;  %s33_s19 = int_to_ptr.vmem [resolvable:$true] %s32_s19  ;;  %s782_s21 = int_to_ptr.vmem [resolvable:$true] %s20_s21 }
   0x4   :  { %s609_s24 = scalar_lea.hbm %s915_s2, 2048 }
   0x5   :  { %p610_p0 = scmp.ne.s32.totalorder %s915_s2, %s609_s24  ;;  %p613_p1 = scmp.lt.u32.totalorder %s609_s24, %s915_s2 }
   0x7   :  { %p615_p2 = pnand %p613_p1, %p610_p0 }
   0x9   :  { %618 = shalt.err (!%p615_p2)
}
   0xa   :  { %s619_s29 = scalar_lea.vmem %s33_s19, 2048  ;;  %p624_p4 = scmp.lt.s32.totalorder %s33_s19, %s33_s19 }
   0xb   :  { %p620_p3 = scmp.ne.s32.totalorder %s33_s19, %s619_s29  ;;  %p625_p5 = scmp.lt.s32.totalorder %s619_s29, %s619_s29 }
   0xd   :  { %p626_p6 = por %p625_p5, %p624_p4 }
   0xf   :  { %p627_p7 = pnand %p626_p6, %p620_p3 }
  0x11   :  { %630 = shalt.err (!%p627_p7)
}
  0x12   :  { %s745_s30 = smov 256   ;;  %s746_s6 = smov 16  }
  0x13   :  { %38 = dma.hbm_to_vmem [thread:$0]  %s915_s2, 2048, %s33_s19, [#allocation5], %s745_s30, %s745_s30, %s746_s6  }
  0x14   :  { %s631_s11 = scalar_lea.hbm %s914_s1, 2048 }
  0x15   :  { %p632_p8 = scmp.ne.s32.totalorder %s914_s1, %s631_s11  ;;  %p635_p9 = scmp.lt.u32.totalorder %s631_s11, %s914_s1 }
  0x17   :  { %p637_p10 = pnand %p635_p9, %p632_p8 }
  0x19   :  { %640 = shalt.err (!%p637_p10)
}
  0x1a   :  { %s641_s16 = scalar_lea.vmem %s782_s21, 2048  ;;  %p646_p12 = scmp.lt.s32.totalorder %s782_s21, %s782_s21 }
  0x1b   :  { %p642_p11 = scmp.ne.s32.totalorder %s782_s21, %s641_s16  ;;  %p647_p13 = scmp.lt.s32.totalorder %s641_s16, %s641_s16 }
  0x1d   :  { %p648_p0 = por %p647_p13, %p646_p12 }
  0x1f   :  { %p649_p1 = pnand %p648_p0, %p642_p11 }
  0x21   :  { %652 = shalt.err (!%p649_p1)
}
  0x22   :  { %26 = dma.hbm_to_vmem [thread:$0]  %s914_s1, 2048, %s782_s21, [#allocation3], %s745_s30, %s745_s30, %s746_s6  }
  0x23   :  { %s747_s18 = smov [#allocation6]   ;;  %s748_s20 = smov [#allocation7]  }
  0x24   :  { %s44_s19 = sshll.u32 %s747_s18, 4  ;;  %s57_s22 = sshll.u32 %s748_s20, 4  ;;  %s45_s19 = int_to_ptr.vmem [resolvable:$true] %s44_s19  ;;  %s58_s22 = int_to_ptr.vmem [resolvable:$true] %s57_s22 }
  0x25   :  { %s653_s25 = scalar_lea.hbm %s916_s3, 2048 }
  0x26   :  { %p654_p2 = scmp.ne.s32.totalorder %s916_s3, %s653_s25  ;;  %p657_p3 = scmp.lt.u32.totalorder %s653_s25, %s916_s3 }
  0x28   :  { %p659_p4 = pnand %p657_p3, %p654_p2 }
  0x2a   :  { %662 = shalt.err (!%p659_p4)
}
  0x2b   :  { %s663_s1 = scalar_lea.vmem %s45_s19, 2048  ;;  %p668_p6 = scmp.lt.s32.totalorder %s45_s19, %s45_s19 }
  0x2c   :  { %p664_p5 = scmp.ne.s32.totalorder %s45_s19, %s663_s1  ;;  %p669_p7 = scmp.lt.s32.totalorder %s663_s1, %s663_s1 }
  0x2e   :  { %p670_p8 = por %p669_p7, %p668_p6 }
  0x30   :  { %p671_p9 = pnand %p670_p8, %p664_p5 }
  0x32   :  { %674 = shalt.err (!%p671_p9)
}
  0x33   :  { %50 = dma.hbm_to_vmem [thread:$0]  %s916_s3, 2048, %s45_s19, [#allocation5], %s745_s30, %s745_s30, %s746_s6  }
  0x34   :  { %s675_s10 = scalar_lea.hbm %s917_s4, 32 }
  0x35   :  { %p676_p10 = scmp.ne.s32.totalorder %s917_s4, %s675_s10  ;;  %p679_p11 = scmp.lt.u32.totalorder %s675_s10, %s917_s4 }
  0x37   :  { %p681_p12 = pnand %p679_p11, %p676_p10 }
  0x39   :  { %684 = shalt.err (!%p681_p12)
}
  0x3a   :  { %s685_s15 = scalar_lea.vmem %s58_s22, 32  ;;  %p690_p0 = scmp.lt.s32.totalorder %s58_s22, %s58_s22 }
  0x3b   :  { %p686_p13 = scmp.ne.s32.totalorder %s58_s22, %s685_s15  ;;  %p691_p1 = scmp.lt.s32.totalorder %s685_s15, %s685_s15 }
  0x3d   :  { %p692_p2 = por %p691_p1, %p690_p0 }
  0x3f   :  { %p693_p3 = pnand %p692_p2, %p686_p13 }
  0x41   :  { %696 = shalt.err (!%p693_p3)
}
  0x42   :  { %60 = dma.hbm_to_vmem [thread:$0]  %s917_s4, 32, %s58_s22, [#allocation8]  }
  0x43   :  { %717 = dma.done.wait [#allocation3], 2048  }
  0x44   :  { %718 = vsyncadd [#allocation3], 4294965248 }
  0x45   :  { %719 = dma.done.wait [#allocation5], 4096  }
  0x46   :  { %720 = vsyncadd [#allocation5], 4294963200 }
  0x47   :  { %721 = dma.done.wait [#allocation8], 32  }
  0x48   :  { %722 = vsyncadd [#allocation8], 4294967264  ;;  %v846_v0 = vld [vmem:[#allocation7] sm:$0x3]  ;;  %v848_v1 = vmov 0.0   ;;  %v850_v2 = vmov 0.0  }
  0x49   :  { %v852_v3 = vmov 0.0   ;;  %v854_v4 = vmov 0.0   ;;  %s856_s6 = smov 0  }
  0x4a LB: > { %v193_v5 = vld [vmem:[#allocation2 + $0x8] sm:$0xff]  ;;  %v195_v6 = vld [vmem:[#allocation2 + $0x18] sm:$0xff]  ;;  %v192_v7 = vld [vmem:[#allocation2] sm:$0xff]  ;;  %v749_v12 = vmov 0.0   ;;  %vm114_vm0 = vcmask 523264   ;;  %v101_v30 = vlaneseq  ;;  %s483_s4 = sshll.u32 %s741_s6, 2  ;;  %s741_s6 = sphi %s856_s6, %s79_s6   ;;  %v737_v4 = vphi %v854_v4, %v326_v4   ;;  %v733_v3 = vphi %v852_v3, %v320_v3   ;;  %v729_v2 = vphi %v850_v2, %v438_v2   ;;  %v725_v1 = vphi %v848_v1, %v436_v1  }
  0x4b   : > { %v500_v8 = vpack.c.bf16 %v195_v6, %v193_v5  ;;  %v194_v9 = vld [vmem:[#allocation2 + $0x10] sm:$0xff]  ;;  %v197_v10 = vld [vmem:[#allocation2 + $0x28] sm:$0xff]  ;;  %v199_v11 = vld [vmem:[#allocation2 + $0x38] sm:$0xff]  ;;  %275 = vmatprep.mubr.f32.mxu1 %v749_v12  ;;  %181 = vmatprep.mubr.f32.mxu0 %v749_v12  ;;  %v750_v31 = vmov 1983009808   ;;  %s190_s17 = scalar_lea.vmem %s913_s0, %s483_s4  ;;  %s751_s18 = smov 64  }
  0x4c   : > { %v502_v13 = vpack.c.bf16 %v194_v9, %v192_v7  ;;  %v504_v14 = vpack.c.bf16 %v199_v11, %v197_v10  ;;  %v196_v15 = vld [vmem:[#allocation2 + $0x20] sm:$0xff]  ;;  %v198_v16 = vld [vmem:[#allocation2 + $0x30] sm:$0xff]  ;;  %v201_v17 = vld [vmem:[#allocation2 + $0x48] sm:$0xff]  ;;  %v286_v32 = vunpack.c.l.s4 %v750_v31  ;;  %v872_v33 = vshrl.u32 %v101_v30, 7  ;;  %112 = vrot.lane.b32.xlu1 %v729_v2, %s751_s18  ;;  %s475_s19 = sshll.u32 %s741_s6, 1  ;;  %s79_s6 = sadd.s32 1, %s741_s6  }
  0x4d   : > { %501 = vmatprep.subr.bf16.mxu1 %v500_v8  ;;  %v203_v18 = vld [vmem:[#allocation2 + $0x58] sm:$0xff]  ;;  %v506_v19 = vpack.c.bf16 %v198_v16, %v196_v15  ;;  %v200_v21 = vld [vmem:[#allocation2 + $0x40] sm:$0xff]  ;;  %v202_v22 = vld [vmem:[#allocation2 + $0x50] sm:$0xff]  ;;  %s443_s23 = scalar_lea.vmem %s918_s5, %s475_s19  ;;  %vm444_vm1 = vcmask 517120   ;;  %p76_p4 = scmp.ge.s32.totalorder %s79_s6, 508  }
  0x4e   : > { %503 = vmatpush1.bf16.msra.mxu1 %v502_v13  ;;  %v508_v20 = vpack.c.bf16 %v203_v18, %v201_v17  ;;  %v205_v23 = vld [vmem:[#allocation2 + $0x68] sm:$0xff]  ;;  %v207_v24 = vld [vmem:[#allocation2 + $0x78] sm:$0xff]  ;;  %v510_v25 = vpack.c.bf16 %v202_v22, %v200_v21  ;;  %v204_v27 = vld [vmem:[#allocation2 + $0x60] sm:$0xff]  ;;  %v287_v34 = vunpack.c.0.s8 %v286_v32 }
  0x4f   : > { %505 = vmatprep.subr.bf16.mxu1 %v504_v14  ;;  %v512_v26 = vpack.c.bf16 %v207_v24, %v205_v23  ;;  %v206_v28 = vld [vmem:[#allocation2 + $0x70] sm:$0xff]  ;;  %v191_v39 = vld [vmem:[%s190_s17] sm:$0xf]  ;;  %v85_v49 = vld [vmem:[#allocation6 + $0x8] sm:$0xff] }
  0x50   : > { %v514_v29 = vpack.c.bf16 %v206_v28, %v204_v27  ;;  %v290_v36 = vsub.s32 %v287_v34, %v872_v33  ;;  %v87_v50 = vld [vmem:[#allocation6 + $0x18] sm:$0xff]  ;;  %v84_v51 = vld [vmem:[#allocation6] sm:$0xff]  ;;  %v86_v53 = vld [vmem:[#allocation6 + $0x10] sm:$0xff] }
  0x51   : > { %v484_v52 = vpack.c.bf16 %v87_v50, %v85_v49  ;;  %v89_v54 = vld [vmem:[#allocation6 + $0x28] sm:$0xff]  ;;  %v91_v55 = vld [vmem:[#allocation6 + $0x38] sm:$0xff]  ;;  %v486_v56 = vpack.c.bf16 %v86_v53, %v84_v51  ;;  %v88_v58 = vld [vmem:[#allocation6 + $0x20] sm:$0xff] }
  0x52   : > { %507 = vmatpush1.bf16.msra.mxu1 %v506_v19  ;;  %v488_v57 = vpack.c.bf16 %v91_v55, %v89_v54  ;;  %v90_v59 = vld [vmem:[#allocation6 + $0x30] sm:$0xff]  ;;  %v93_v60 = vld [vmem:[#allocation6 + $0x48] sm:$0xff]  ;;  %v95_v61 = vld [vmem:[#allocation6 + $0x58] sm:$0xff]  ;;  %v107_v54 = vsub.s32 1, %v872_v33 }
  0x53   : > { %509 = vmatprep.subr.bf16.mxu1 %v508_v20  ;;  %485 = vmatprep.subr.bf16.mxu0 %v484_v52  ;;  %v490_v62 = vpack.c.bf16 %v90_v59, %v88_v58  ;;  %v492_v63 = vpack.c.bf16 %v95_v61, %v93_v60  ;;  %v92_v2 = vld [vmem:[#allocation6 + $0x40] sm:$0xff]  ;;  %v97_v5 = vld [vmem:[#allocation6 + $0x68] sm:$0xff]  ;;  %v99_v6 = vld [vmem:[#allocation6 + $0x78] sm:$0xff] }
  0x54   : > { %487 = vmatpush1.bf16.msra.mxu0 %v486_v56  ;;  %v496_v8 = vpack.c.bf16 %v99_v6, %v97_v5  ;;  %v96_v9 = vld [vmem:[#allocation6 + $0x60] sm:$0xff]  ;;  %v98_v10 = vld [vmem:[#allocation6 + $0x70] sm:$0xff]  ;;  %v328_v11 = vld [vmem:[#allocation4 + $0x8] sm:$0xff]  ;;  %v108_v55 = vrot.slane %v846_v0, %v107_v54 }
  0x55   : > { %489 = vmatprep.subr.bf16.mxu0 %v488_v57  ;;  %v330_v13 = vld [vmem:[#allocation4 + $0x18] sm:$0xff]  ;;  %v498_v14 = vpack.c.bf16 %v98_v10, %v96_v9  ;;  %v327_v16 = vld [vmem:[#allocation4] sm:$0xff]  ;;  %v329_v17 = vld [vmem:[#allocation4 + $0x10] sm:$0xff] }
  0x56   : > { %511 = vmatpush1.bf16.msra.mxu1 %v510_v25  ;;  %v516_v15 = vpack.c.bf16 %v330_v13, %v328_v11  ;;  %v332_v18 = vld [vmem:[#allocation4 + $0x28] sm:$0xff]  ;;  %v334_v19 = vld [vmem:[#allocation4 + $0x38] sm:$0xff]  ;;  %v518_v20 = vpack.c.bf16 %v329_v17, %v327_v16  ;;  %v331_v22 = vld [vmem:[#allocation4 + $0x20] sm:$0xff] }
  0x57   : > { %513 = vmatprep.subr.bf16.mxu1 %v512_v26  ;;  %v520_v21 = vpack.c.bf16 %v334_v19, %v332_v18  ;;  %v333_v23 = vld [vmem:[#allocation4 + $0x30] sm:$0xff]  ;;  %v336_v25 = vld [vmem:[#allocation4 + $0x48] sm:$0xff]  ;;  %v338_v26 = vld [vmem:[#allocation4 + $0x58] sm:$0xff] }
  0x58   : > { %491 = vmatpush1.bf16.msra.mxu0 %v490_v62  ;;  %v522_v27 = vpack.c.bf16 %v333_v23, %v331_v22  ;;  %v524_v28 = vpack.c.bf16 %v338_v26, %v336_v25  ;;  %v337_v30 = vld [vmem:[#allocation4 + $0x50] sm:$0xff]  ;;  %v340_v31 = vld [vmem:[#allocation4 + $0x68] sm:$0xff]  ;;  %v342_v32 = vld [vmem:[#allocation4 + $0x78] sm:$0xff] }
  0x59   : > { %493 = vmatprep.subr.bf16.mxu0 %v492_v63 }
  0x5a   : > { %515 = vmatpush1.bf16.msra.mxu1 %v514_v29  ;;  %v335_v29 = vld [vmem:[#allocation4 + $0x40] sm:$0xff] }
  0x5b   : > { %v526_v34 = vpack.c.bf16 %v337_v30, %v335_v29 }
  0x5d   : > { %477 = vmatmul.mubr.msk.f32.vlgmr.msra.gmra.mrb[0].mxu1 %vm114_vm0, %v737_v4  ;;  %v94_v4 = vld [vmem:[#allocation6 + $0x50] sm:$0xff] }
  0x5e   : > { %v494_v7 = vpack.c.bf16 %v94_v4, %v92_v2 }
  0x60   : > { %495 = vmatpush1.bf16.msra.mxu0 %v494_v7 }
  0x61   : > { %497 = vmatprep.subr.bf16.mxu0 %v496_v8 }
  0x64   : > { %499 = vmatpush1.bf16.msra.mxu0 %v498_v14 }
  0x65   : > { %517 = vmatprep.subr.bf16.mxu0 %v516_v15 }
  0xbe   : > { %v113_v24 = vpop.permute.xlu1 %112 }
  0xbf   : > { %474 = vmatmul.mubr.msk.f32.vlgmr.msra.gmra.mrb[0].mxu0 %vm114_vm0, %v113_v24 }
  0xc0   : > { %519 = vmatpush1.bf16.msra.mxu0 %v518_v20  ;;  %410 = vmatprep.mubr.f32.mxu0 %v749_v12 }
  0xc1   : > { %521 = vmatprep.subr.bf16.mxu0 %v520_v21 }
  0xc4   : > { %523 = vmatpush1.bf16.msra.mxu0 %v522_v27 }
  0xc5   : > { %525 = vmatprep.subr.bf16.mxu0 %v524_v28 }
  0xc8   : > { %527 = vmatpush1.bf16.msra.mxu0 %v526_v34 }
 0x130   : > { %v277_v35 = vpop.f32.mrb[0].mxu1 }
 0x131   : > { %v279_v37 = vpop.f32.mrb[1].mxu1 }
 0x132   : > { %v284_v38 = vcombine.low %v277_v35, %v279_v37  ;;  %v528_v35 = vpack.c.bf16 %v342_v32, %v340_v31  ;;  %v341_v37 = vld [vmem:[#allocation4 + $0x70] sm:$0xff] }
 0x134   : > { %v291_v40 = vrot.slane %v284_v38, %v290_v36  ;;  %v339_v36 = vld [vmem:[#allocation4 + $0x60] sm:$0xff]  ;;  %529 = vmatprep.subr.bf16.mxu0 %v528_v35 }
 0x135   : > { %v530_v38 = vpack.c.bf16 %v341_v37, %v339_v36 }
 0x136   : > { %v293_v41 = vadd.f32 %v291_v40, %v191_v39 }
 0x137   : > { %531 = vmatpush1.bf16.msra.mxu0 %v530_v38 }
 0x138   : > { %v478_v42 = vmul.f32 -1.442695, %v293_v41  ;;  %v301_v43 = vrot.slane %v293_v41, 2 }
 0x13a   : > { %585 = vpow2.f32 %v478_v42 }
 0x13b   : > { %587 = vtanh.f32 %v301_v43 }
 0x144   : > { %v586_v44 = vpop.eup %585 }
 0x145   : > { %v297_v45 = vadd.f32 1.0, %v586_v44  ;;  %v588_v46 = vpop.eup %587 }
 0x147   : > { %589 = vrcp.f32 %v297_v45 }
 0x151   : > { %v880_v47 = vpop.eup %589 }
 0x152   : > { %v315_v48 = vmul.f32 %v880_v47, %v588_v46  ;;  %v314_v39 = vmul.f32 %v733_v3, %v880_v47  ;;  %v103_v47 = vsub.s32 0, %v872_v33 }
 0x154   : > { %317 = vrot.lane.b32.xlu0 %v315_v48, %s751_s18  ;;  %v104_v49 = vrot.slane %v846_v0, %v103_v47 }
 0x158   : > { %304 = vrot.lane.b32.xlu0 %v293_v41, %s751_s18 }
 0x1c6   : > { %v318_v40 = vpop.permute.xlu0 %317 }
 0x1c7   : > { %v320_v3 = vadd.f32 %v318_v40, %v314_v39  }
 0x1c9   : > { %591 = vtanh.f32 %v320_v3 }
 0x1ca   : > { %v305_v41 = vpop.permute.xlu0 %304 }
 0x1cb   : > { %v306_v42 = vrot.slane %v305_v41, 2 }
 0x1cd   : > { %v479_v43 = vmul.f32 -1.442695, %v306_v42 }
 0x1cf   : > { %593 = vpow2.f32 %v479_v43 }
 0x1d3   : > { %v592_v12 = vpop.eup %591 }
 0x1d4   : > { %323 = vrot.lane.b32.xlu1 %v592_v12, %s751_s18 }
 0x1d9   : > { %v594_v44 = vpop.eup %593 }
 0x1da   : > { %v311_v45 = vadd.f32 1.0, %v594_v44 }
 0x1dc   : > { %595 = vrcp.f32 %v311_v45 }
 0x1e6   : > { %v596_v46 = vpop.eup %595 }
 0x246   : > { %v324_v48 = vpop.permute.xlu1 %323 }
 0x247   : > { %v326_v4 = vmul.f32 %v596_v46, %v324_v48  }
 0x249   : > { %480 = vmatmul.mubr.msk.f32.vlgmr.msra.gmra.mrb[0].mxu0 %vm114_vm0, %v326_v4 }
 0x31c   : > { %v412_v50 = vpop.f32.mrb[0].mxu0 }
 0x31d   : > { %v532_v51 = vadd.f32 %v412_v50, %v104_v49  ;;  %v414_v52 = vpop.f32.mrb[1].mxu0 }
 0x31e   : > { %v533_v56 = vadd.f32 %v414_v52, %v108_v55 }
 0x31f   : > { %v481_v53 = vmul.f32 -1.442695, %v532_v51 }
 0x320   : > { %v482_v62 = vmul.f32 -1.442695, %v533_v56 }
 0x321   : > { %597 = vpow2.f32 %v481_v53 }
 0x322   : > { %599 = vtanh.f32 %v533_v56 }
 0x32b   : > { %v598_v57 = vpop.eup %597 }
 0x32c   : > { %v420_v58 = vadd.f32 1.0, %v598_v57  ;;  %v600_v59 = vpop.eup %599 }
 0x32e   : > { %601 = vrcp.f32 %v420_v58 }
 0x32f   : > { %603 = vpow2.f32 %v482_v62 }
 0x338   : > { %v602_v60 = vpop.eup %601 }
 0x339   : > { %v431_v61 = vmul.f32 %v602_v60, %v600_v59  ;;  %v604_v63 = vpop.eup %603  ;;  %v430_v5 = vmul.f32 %v725_v1, %v602_v60 }
 0x33a   : > { %v427_v2 = vadd.f32 1.0, %v604_v63 }
 0x33b   : > { %433 = vrot.lane.b32.xlu0 %v431_v61, %s751_s18 }
 0x33c   : > { %605 = vrcp.f32 %v427_v2 }
 0x346   : > { %v606_v6 = vpop.eup %605 }
 0x3ad   : > { %v434_v33 = vpop.permute.xlu0 %433 }
 0x3ae   : > { %v436_v1 = vadd.f32 %v434_v33, %v430_v5  }
 0x3b0   : > { %607 = vtanh.f32 %v436_v1 }
 0x3ba   : > { %v608_v7 = vpop.eup %607 }
 0x3bb   : > { %v438_v2 = vmul.f32 %v608_v7, %v606_v6  }
 0x3bd   : > { %440 = vrot.lane.b32.xlu1 %v438_v2, %s751_s18 }
 0x42a   :  { %78 = sbr.rel (!%p76_p4) target bundleno = 74 (0x4a), region = 65 }
 0x42f   : > { %v441_v8 = vpop.permute.xlu1 %440 }
 0x430   : > { %445 = vst.msk [vmem:[%s443_s23] sm:$0x3] %vm444_vm1, %v441_v8 }
 0x431   :  { %450 = vsyncpa [#allocation3], 1 }
 0x432   :  { %451 = vsyncpa [#allocation5], 1 }
 0x433   :  { %452 = vsyncpa [#allocation8], 1 }

// kernel: cldnn_g_forward.5
= control target key start
LH: loop header
LB: loop body
LE: loop exit
PB: predicated region body
PF: predicated region fallthrough
CT: control target
= control target key end

     0   :  { %s4072_s0 = inlined_call_operand.vmem [shape: bf16[2,32768], index: 0, kind: input, shape index: {}]   ;;  %s4073_s1 = inlined_call_operand.hbm [shape: bf16[32768,512], index: 1, kind: input, shape index: {}]   ;;  %s4074_s2 = inlined_call_operand.hbm [shape: f32[1,512], index: 2, kind: input, shape index: {}]   ;;  %s4075_s3 = inlined_call_operand.hbm [shape: f32[2,512], index: 3, kind: output, shape index: {}]  }
   0x1   :  { %4083 = sst [smem:[#allocation14_spill]] %s4073_s1 }
   0x2   :  { %8 = vsyncpa [#allocation4], 0 }
   0x3   :  { %10 = vsyncpa [#allocation4 + $0x1], 0 }
   0x4   :  { %11 = vsyncpa [#allocation7], 0 }
   0x5   :  { %13 = vsyncpa [#allocation7 + $0x1], 0 }
   0x6   :  { %14 = vsyncpa [#allocation5], 0 }
   0x7   :  { %16 = vsyncpa [#allocation5 + $0x1], 0  ;;  %s3450_s12 = smov 0   ;;  %s3452_s13 = smov 0  }
   0x8   :  { %s3454_s14 = smov 0   ;;  %s3456_s15 = smov 0  }
   0x9   :  { %s3458_s16 = smov 0   ;;  %s3460_s17 = smov 0  }
   0xa   :  { %s3462_s18 = smov 0   ;;  %s3464_s19 = smov 0  }
   0xb   :  { %s3466_s20 = smov 0   ;;  %s3468_s21 = smov 0  }
   0xc   :  { %s3470_s22 = smov 0  }
   0xd LB: > { %s31_s23 = sadd.s32 1, %s3411_s20  ;;  %p76_p1 = scmp.ne.s32.totalorder %s3399_s17, %s3395_s16  ;;  %s3419_s22 = sphi %s3470_s22, %s22_s22   ;;  %s3415_s21 = sphi %s3468_s21, %s4113_s21   ;;  %s3411_s20 = sphi %s3466_s20, %s4112_s20   ;;  %s3407_s19 = sphi %s3464_s19, %s4111_s19   ;;  %s3403_s18 = sphi %s3462_s18, %s4110_s18   ;;  %s3399_s17 = sphi %s3460_s17, %s4109_s17   ;;  %s3395_s16 = sphi %s3458_s16, %s4108_s16   ;;  %s3391_s15 = sphi %s3456_s15, %s4107_s15   ;;  %s3387_s14 = sphi %s3454_s14, %s4106_s14   ;;  %s3383_s13 = sphi %s3452_s13, %s4105_s13   ;;  %s3379_s12 = sphi %s3450_s12, %s4104_s12  }
   0xe   : > { %p3506_p0 = scmp.ge.s32.totalorder %s31_s23, 16  ;;  %p4077_p2 = scmp.eq.s32.totalorder %s3419_s22, 0 }
   0xf   : > { %s69_s25 = sadd.s32 1, %s3399_s17  ;;  %p4076_p4 = scmp.lt.s32.totalorder %s3419_s22, 32 }
  0x10   : > { %s4115_s23 = smov (%p3506_p0, %s31_s23), 0  ;;  %p78_p3 = por %p4077_p2, %p76_p1 }
  0x11   : > { %4085 = sst [smem:[#allocation12_spill]] %s4115_s23  ;;  %s166_s26 = sand.u32 1, %s3399_s17  }
  0x12   : > { %s2429_s27 = sshll.u32 %s166_s26, 11  ;;  %s2431_s28 = sshll.u32 %s3415_s21, 1 }
  0x13   : > { %s2705_s29 = sshll.u32 %s3411_s20, 10  ;;  %s170_s30 = scalar_lea.vmem [#allocation3], %s2429_s27 }
  0x14   : > { %s180_s4 = sshll.u32 %s170_s30, 4  ;;  %s177_s5 = sadd.s32 %s2705_s29, %s2431_s28  ;;  %s3524_s4 = int_to_ptr.vmem [resolvable:$true] %s180_s4 }
  0x15   : > { %s2433_s6 = sshll.u32 %s177_s5, 6  ;;  %p3528_p5 = pnand %p4076_p4, %p78_p3 }
  0x16   : > { %s4087_s1 = sld [smem:[#allocation14_spill]]  ;;  %s3538_s11 = scalar_lea.sflag [#allocation4], %s166_s26 }
  0x17   : > { %p3235_p8 = pneg %p3528_p5 }
  0x1c   : > { %s3535_s10 = scalar_lea.hbm %s4087_s1, %s2433_s6  ;;  %s3238_s30 = scalar_lea.hbm %s4087_s1, 1048576 }
  0x1d   : > { %s3233_s27 = scalar_lea.hbm %s3535_s10, 32768  ;;  %p3239_p11 = scmp.lt.u32.totalorder %s3535_s10, %s4087_s1 }
  0x1e   : > { %p3234_p7 = scmp.ne.s32.totalorder %s3535_s10, %s3233_s27  ;;  %p3240_p12 = scmp.lt.u32.totalorder %s3238_s30, %s3233_s27 }
  0x1f   : > { %p3242_p1 = scmp.lt.u32.totalorder %s3233_s27, %s3535_s10 }
  0x20   : > { %p3236_p9 = pnand %p3235_p8, %p3234_p7  ;;  %p3241_p13 = por %p3240_p12, %p3239_p11 }
  0x22   : > { %p3237_p10 = pneg %p3236_p9  ;;  %p3243_p3 = por %p3242_p1, %p3241_p13 }
  0x24   : > { %p3244_p4 = pnand %p3243_p3, %p3237_p10 }
  0x26   : > { %3247 = shalt.err (!%p3244_p4)
}
  0x27   : > { %s3248_s26 = scalar_lea.vmem %s3524_s4, 32768  ;;  %s3421_s8 = smov [#allocation3]  }
  0x28   : > { %p3249_p7 = scmp.ne.s32.totalorder %s3524_s4, %s3248_s26  ;;  %s3253_s9 = sshll.u32 %s3421_s8, 4  ;;  %s3254_s9 = int_to_ptr.vmem [resolvable:$false] %s3253_s9 }
  0x29   : > { %s3255_s28 = scalar_lea.vmem %s3254_s9, 65536  ;;  %p3256_p6 = scmp.lt.s32.totalorder %s3524_s4, %s3254_s9 }
  0x2a   : > { %p3251_p9 = pnand %p3249_p7, %p3235_p8  ;;  %p3257_p11 = scmp.lt.s32.totalorder %s3255_s28, %s3248_s26 }
  0x2c   : > { %p3252_p2 = pneg %p3251_p9  ;;  %p3258_p12 = por %p3257_p11, %p3256_p6 }
  0x2e   : > { %p3259_p13 = pnand %p3258_p12, %p3252_p2 }
  0x30   : > { %3262 = shalt.err (!%p3259_p13)
}
  0x31   : > { %s3422_s27 = smov 256   ;;  %s3423_s29 = smov 128  }
  0x32   : > { %s3424_s30 = smov 8   ;;  %p207_p2 = scmp.lt.s32.totalorder %s3419_s22, 33 }
  0x33   : > { %2743 = dma.hbm_to_vmem [thread:$0]  (!%p3528_p5), %s3535_s10, 32768, %s3524_s4, %s3538_s11, %s3422_s27, %s3423_s29, %s3424_s30  }
  0x34   : > { %p4088_p4 = scmp.ge.s32.totalorder %s3419_s22, 1  ;;  %s64_s6 = ssub.s32 %s3411_s20, %s4115_s23 }
  0x35   : > { %s2425_s26 = sadd.s32 4294967295, %s3419_s22   ;;  %s34_s8 = sadd.s32 1, %s3415_s21 }
  0x36   : > { %p3569_p6 = pnand %p4088_p4, %p207_p2  ;;  %p82_p8 = scmp.ne.s32.totalorder %s3395_s16, %s3391_s15 }
  0x37   : > { %s4117_s8 = smov (!%p3506_p0, %s34_s8), %s3415_s21  ;;  %s2426_s7 = sadd.s32 4294967294, %s3419_s22  }
  0x38   : > { %p83_p5 = scmp.eq.s32.totalorder %s2425_s26, 0  ;;  %p36_p10 = scmp.ge.s32.totalorder %s4117_s8, 2 }
  0x39   : > { %s95_s4 = sadd.s32 1, %s3387_s14  ;;  %p108_p3 = scmp.ne.s32.totalorder %s3383_s13, %s3379_s12 }
  0x3a   : > { %p3584_p1 = por %p83_p5, %p82_p8  ;;  %s4119_s8 = smov (%p36_p10, %s4117_s8), 0 }
  0x3b   : > { %4091 = sst [smem:[#allocation13_spill]] %s4119_s8  ;;  %p102_p0 = scmp.ne.s32.totalorder %s3387_s14, %s3383_s13 }
  0x3c   : > { %s4090_s10 = scalar_select %p3584_p1, 1, 0 }
  0x3d   : > { %p3597_p7 = por %p108_p3, %p83_p5  ;;  %s65_s24 = ssub.s32 %s3415_s21, %s4119_s8 }
  0x3e   : > { %p132_p9 = scmp.eq.s32.totalorder %s2425_s26, 31  ;;  %s66_s11 = sor.u32 %s65_s24, %s64_s6 }
  0x3f   : > { %s4092_s15 = scalar_select %p3597_p7, 1, 0 }
  0x40   : > { %p93_p11 = scmp.eq.s32.totalorder %s65_s24, 0  ;;  %p67_p12 = scmp.eq.s32.totalorder %s66_s11, 0 }
  0x41   : > { %p3603_p13 = por %p132_p9, %p102_p0  ;;  %p138_p2 = scmp.eq.s32.totalorder %s2426_s7, 31 }
  0x42   : > { %s3608_s28 = scalar_select %p93_p11, %s3387_s14, %s95_s4  }
  0x43   : > { %s4093_s9 = scalar_select %p3603_p13, 1, 0 }
  0x44   : > { %s3613_s27 = scalar_select %p67_p12, %s3399_s17, %s69_s25  }
  0x45   : > { %s190_s29 = sand.u32 1, %s3387_s14   ;;  %p4094_p4 = scmp.eq.s32.totalorder %s3419_s22, 0 }
  0x46   : > { %s2434_s30 = sshll.u32 %s190_s29, 1  ;;  %p3621_p5 = por %p138_p2, %p108_p3 }
  0x47   : > { %p104_p8 = por %p102_p0, %p4094_p4  ;;  %s2706_s26 = sshll.u32 %s3415_s21, 5 }
  0x48   : > { %s4095_s6 = scalar_select %p3621_p5, 1, 0 }
  0x49   : > { %s194_s24 = scalar_lea.vmem [#allocation6], %s2434_s30  ;;  %s3629_s4 = scalar_lea.hbm %s4074_s2, %s2706_s26 }
  0x4a   : > { %s202_s11 = sshll.u32 %s194_s24, 4  ;;  %p4096_p10 = scmp.lt.s32.totalorder %s3419_s22, 32  ;;  %s3631_s11 = int_to_ptr.vmem [resolvable:$true] %s202_s11 }
  0x4b   : > { %s191_s7 = scalar_lea.sflag [#allocation7], %s190_s29  ;;  %s3263_s30 = scalar_lea.hbm %s3629_s4, 32 }
  0x4c   : > { %p3635_p0 = pnand %p4096_p10, %p104_p8  ;;  %p3264_p3 = scmp.ne.s32.totalorder %s3629_s4, %s3263_s30 }
  0x4d   : > { %s3268_s26 = scalar_lea.hbm %s4074_s2, 64  ;;  %p3269_p2 = scmp.lt.u32.totalorder %s3629_s4, %s4074_s2 }
  0x4e   : > { %p3265_p9 = pneg %p3635_p0  ;;  %p3270_p4 = scmp.lt.u32.totalorder %s3268_s26, %s3263_s30 }
  0x4f   : > { %p3272_p10 = scmp.lt.u32.totalorder %s3263_s30, %s3629_s4 }
  0x50   : > { %p3266_p11 = pnand %p3265_p9, %p3264_p3  ;;  %p3271_p8 = por %p3270_p4, %p3269_p2 }
  0x52   : > { %p3267_p12 = pneg %p3266_p11  ;;  %p3273_p5 = por %p3272_p10, %p3271_p8 }
  0x54   : > { %p3274_p13 = pnand %p3273_p5, %p3267_p12 }
  0x56   : > { %3277 = shalt.err (!%p3274_p13)
}
  0x57   : > { %s3278_s29 = scalar_lea.vmem %s3631_s11, 32  ;;  %s3425_s1 = smov [#allocation6]  }
  0x58   : > { %p3279_p3 = scmp.ne.s32.totalorder %s3631_s11, %s3278_s29  ;;  %s3283_s8 = sshll.u32 %s3425_s1, 4  ;;  %s3284_s8 = int_to_ptr.vmem [resolvable:$false] %s3283_s8 }
  0x59   : > { %s3285_s23 = scalar_lea.vmem %s3284_s8, 64  ;;  %p3286_p1 = scmp.lt.s32.totalorder %s3631_s11, %s3284_s8 }
  0x5a   : > { %p3281_p11 = pnand %p3279_p3, %p3265_p9  ;;  %p3287_p2 = scmp.lt.s32.totalorder %s3285_s23, %s3278_s29 }
  0x5c   : > { %p3282_p7 = pneg %p3281_p11  ;;  %p3288_p4 = por %p3287_p2, %p3286_p1 }
  0x5e   : > { %p3289_p8 = pnand %p3288_p4, %p3282_p7 }
  0x60   : > { %3292 = shalt.err (!%p3289_p8)
}
  0x61   : > { %2746 = dma.hbm_to_vmem [thread:$0]  (!%p3635_p0), %s3629_s4, 32, %s3631_s11, %s191_s7  }
  0x62   : > { %211 = sbr.rel (%p3569_p6) target bundleno = 636 (0x27c), region = 32  ;;  %s213_s30 = sand.u32 (!%p3569_p6), 1, %s3395_s16  }
  0x63   : > { %s2438_s26 = sshll.u32 (!%p3569_p6), %s213_s30, 11  ;;  %s214_s24 = scalar_lea.sflag (!%p3569_p6), [#allocation4], %s213_s30 }
  0x64   : > { %s3667_s1 = scalar_lea.vmem (!%p3569_p6), [#allocation3], %s2438_s26  ;;  %p4098_p13 = scmp.ne.s32.totalorder (!%p3569_p6), %s4090_s10, 0 }
  0x69   : > { %3366 = dma.done.wait (%p4098_p13), %s214_s24, 32768  }
  0x6a   : > { %3368 = vsyncadd (%p4098_p13), %s214_s24, 4294934528  ;;  %s3674_s25 = sand.u32 1, %s3383_s13   ;;  %p4099_p6 = scmp.ne.s32.totalorder %s4092_s15, 0 }
  0x6b   : > { %s2439_s5 = sshll.u32 %s3674_s25, 1  ;;  %s223_s11 = scalar_lea.sflag [#allocation7], %s3674_s25 }
  0x6c   : > { %s3678_s4 = scalar_lea.vmem [#allocation6], %s2439_s5 }
  0x6d   : > { %3370 = dma.done.wait (%p4099_p6), %s223_s11, 32  }
  0x6e   : > { %3372 = vsyncadd (%p4099_p6), %s223_s11, 4294967264  ;;  %s2440_s7 = sshll.u32 %s3674_s25, 2  ;;  %s2441_s10 = sshll.u32 %s3403_s18, 4 }
  0x6f   : > { %p259_p1 = scmp.lt.s32.totalorder %s2441_s10, 255  ;;  %s3691_s30 = scalar_lea.vmem [#allocation8], %s2440_s7 }
  0x70   : > { %p2442_p7 = scmp.ne.s32.totalorder %s3403_s18, 0 }
  0x71   : > { %s4121_s10 = smov (!%p259_p1, %s2441_s10), 255  ;;  %v3426_v0 = vmov (!%p2442_p7), 0.0  }
  0x72   : > { %s3689_s23 = scalar_lea.vmem %s4072_s0, %s4121_s10  ;;  %270 = sbr.rel (%p2442_p7) target bundleno = 121 (0x79), region = 44  ;;  %271 = vst [vmem:[#allocation2] sm:$0xf] (!%p2442_p7), %v3426_v0 }
  0x79 PF: > { %v2847_v1 = vld [vmem:[%s3667_s1 + $0x4] ss:$8 sps:$4 sm:$0xff]   ;;  %v2851_v3 = vld [vmem:[%s3667_s1] ss:$8 sps:$4 sm:$0xff]   ;;  %v2853_v5 = vld [vmem:[%s3667_s1 + $0x14] ss:$8 sps:$4 sm:$0xff]   ;;  %v537_v39 = vlaneseq }
  0x7a   : > { %v2849_v2 = vld [vmem:[%s3667_s1 + $0x404] ss:$8 sps:$4 sm:$0xff]   ;;  %1927 = vmatprep.subr.bf16.mxu1 %v2847_v1  ;;  %v2852_v4 = vld [vmem:[%s3667_s1 + $0x400] ss:$8 sps:$4 sm:$0xff]   ;;  %v2855_v6 = vld [vmem:[%s3667_s1 + $0x414] ss:$8 sps:$4 sm:$0xff]  }
  0x7b   : > { %2091 = vmatprep.subr.bf16.mxu0 %v2849_v2  ;;  %1928 = vmatpush1.bf16.msra.mxu1 %v2851_v3  ;;  %v2857_v7 = vld [vmem:[%s3667_s1 + $0x10] ss:$8 sps:$4 sm:$0xff]   ;;  %v2859_v9 = vld [vmem:[%s3667_s1 + $0x24] ss:$8 sps:$4 sm:$0xff]   ;;  %v2863_v11 = vld [vmem:[%s3667_s1 + $0x20] ss:$8 sps:$4 sm:$0xff]  }
  0x7c   : > { %2092 = vmatpush1.bf16.msra.mxu0 %v2852_v4  ;;  %1929 = vmatprep.subr.bf16.mxu1 %v2853_v5  ;;  %v2858_v8 = vld [vmem:[%s3667_s1 + $0x410] ss:$8 sps:$4 sm:$0xff]   ;;  %v2861_v10 = vld [vmem:[%s3667_s1 + $0x424] ss:$8 sps:$4 sm:$0xff]   ;;  %v2864_v12 = vld [vmem:[%s3667_s1 + $0x420] ss:$8 sps:$4 sm:$0xff]  }
  0x7d   : > { %2093 = vmatprep.subr.bf16.mxu0 %v2855_v6  ;;  %v2865_v13 = vld [vmem:[%s3667_s1 + $0x34] ss:$8 sps:$4 sm:$0xff]   ;;  %v2869_v15 = vld [vmem:[%s3667_s1 + $0x30] ss:$8 sps:$4 sm:$0xff]   ;;  %v2871_v17 = vld [vmem:[%s3667_s1 + $0x44] ss:$8 sps:$4 sm:$0xff]  }
  0x7e   : > { %v2867_v14 = vld [vmem:[%s3667_s1 + $0x434] ss:$8 sps:$4 sm:$0xff]   ;;  %v2870_v16 = vld [vmem:[%s3667_s1 + $0x430] ss:$8 sps:$4 sm:$0xff]   ;;  %v2873_v18 = vld [vmem:[%s3667_s1 + $0x444] ss:$8 sps:$4 sm:$0xff]  }
  0x7f   : > { %1930 = vmatpush1.bf16.msra.mxu1 %v2857_v7  ;;  %v2875_v19 = vld [vmem:[%s3667_s1 + $0x40] ss:$8 sps:$4 sm:$0xff]   ;;  %v2877_v21 = vld [vmem:[%s3667_s1 + $0x54] ss:$8 sps:$4 sm:$0xff]   ;;  %v2881_v23 = vld [vmem:[%s3667_s1 + $0x50] ss:$8 sps:$4 sm:$0xff]  }
  0x80   : > { %2094 = vmatpush1.bf16.msra.mxu0 %v2858_v8  ;;  %1931 = vmatprep.subr.bf16.mxu1 %v2859_v9  ;;  %v2876_v20 = vld [vmem:[%s3667_s1 + $0x440] ss:$8 sps:$4 sm:$0xff]   ;;  %v2879_v22 = vld [vmem:[%s3667_s1 + $0x454] ss:$8 sps:$4 sm:$0xff]   ;;  %v2882_v24 = vld [vmem:[%s3667_s1 + $0x450] ss:$8 sps:$4 sm:$0xff]  }
  0x81   : > { %2095 = vmatprep.subr.bf16.mxu0 %v2861_v10  ;;  %v2883_v25 = vld [vmem:[%s3667_s1 + $0x64] ss:$8 sps:$4 sm:$0xff]   ;;  %v2887_v27 = vld [vmem:[%s3667_s1 + $0x60] ss:$8 sps:$4 sm:$0xff]   ;;  %v2889_v29 = vld [vmem:[%s3667_s1 + $0x74] ss:$8 sps:$4 sm:$0xff]  }
  0x82   : > { %v2885_v26 = vld [vmem:[%s3667_s1 + $0x464] ss:$8 sps:$4 sm:$0xff]   ;;  %v2888_v28 = vld [vmem:[%s3667_s1 + $0x460] ss:$8 sps:$4 sm:$0xff]   ;;  %v2891_v30 = vld [vmem:[%s3667_s1 + $0x474] ss:$8 sps:$4 sm:$0xff]  }
  0x83   : > { %1932 = vmatpush1.bf16.msra.mxu1 %v2863_v11  ;;  %v2893_v31 = vld [vmem:[%s3667_s1 + $0x70] ss:$8 sps:$4 sm:$0xff]   ;;  %v2895_v33 = vld [vmem:[%s3667_s1 + $0x84] ss:$8 sps:$4 sm:$0xff]   ;;  %v2899_v35 = vld [vmem:[%s3667_s1 + $0x80] ss:$8 sps:$4 sm:$0xff]  }
  0x84   : > { %2096 = vmatpush1.bf16.msra.mxu0 %v2864_v12  ;;  %1933 = vmatprep.subr.bf16.mxu1 %v2865_v13  ;;  %v2894_v32 = vld [vmem:[%s3667_s1 + $0x470] ss:$8 sps:$4 sm:$0xff]   ;;  %v2897_v34 = vld [vmem:[%s3667_s1 + $0x484] ss:$8 sps:$4 sm:$0xff]   ;;  %v2900_v36 = vld [vmem:[%s3667_s1 + $0x480] ss:$8 sps:$4 sm:$0xff]  }
  0x85   : > { %2097 = vmatprep.subr.bf16.mxu0 %v2867_v14  ;;  %v3427_v37 = vmov 1966171168   ;;  %v2901_v40 = vld [vmem:[%s3667_s1 + $0x94] ss:$8 sps:$4 sm:$0xff]   ;;  %v2905_v42 = vld [vmem:[%s3667_s1 + $0x90] ss:$8 sps:$4 sm:$0xff]  }
  0x86   : > { %v535_v38 = vunpack.c.l.s4 %v3427_v37  ;;  %v2903_v41 = vld [vmem:[%s3667_s1 + $0x494] ss:$8 sps:$4 sm:$0xff]   ;;  %v3733_v44 = vshrl.u32 %v537_v39, 7  ;;  %v2906_v45 = vld [vmem:[%s3667_s1 + $0x490] ss:$8 sps:$4 sm:$0xff]   ;;  %v274_v57 = vld [vmem:[%s3689_s23 + $0x8] sm:$0xff] }
  0x87   : > { %1934 = vmatpush1.bf16.msra.mxu1 %v2869_v15  ;;  %v2907_v46 = vld [vmem:[%s3667_s1 + $0xa4] ss:$8 sps:$4 sm:$0xff]   ;;  %v2911_v48 = vld [vmem:[%s3667_s1 + $0xa0] ss:$8 sps:$4 sm:$0xff]   ;;  %v2913_v51 = vld [vmem:[%s3667_s1 + $0xb4] ss:$8 sps:$4 sm:$0xff]   ;;  %v582_v14 = vcombine.high %v274_v57, %v274_v57 }
  0x88   : > { %2098 = vmatpush1.bf16.msra.mxu0 %v2870_v16  ;;  %1935 = vmatprep.subr.bf16.mxu1 %v2871_v17  ;;  %v536_v43 = vunpack.c.0.s8 %v535_v38  ;;  %v2909_v47 = vld [vmem:[%s3667_s1 + $0x4a4] ss:$8 sps:$4 sm:$0xff]   ;;  %v2912_v49 = vld [vmem:[%s3667_s1 + $0x4a0] ss:$8 sps:$4 sm:$0xff]   ;;  %v2915_v52 = vld [vmem:[%s3667_s1 + $0x4b4] ss:$8 sps:$4 sm:$0xff]  }
  0x89   : > { %2099 = vmatprep.subr.bf16.mxu0 %v2873_v18  ;;  %v273_v53 = vld [vmem:[%s3689_s23] sm:$0xff]  ;;  %v2917_v54 = vld [vmem:[%s3667_s1 + $0xb0] ss:$8 sps:$4 sm:$0xff]   ;;  %v2919_v58 = vld [vmem:[%s3667_s1 + $0xc4] ss:$8 sps:$4 sm:$0xff]   ;;  %p2699_p5 = scmp.ne.s32.totalorder %s3403_s18, 15 }
  0x8a   : > { %v3741_v50 = vsub.s32 %v536_v43, %v3733_v44  ;;  %v2918_v56 = vld [vmem:[%s3667_s1 + $0x4b0] ss:$8 sps:$4 sm:$0xff]   ;;  %v2921_v59 = vld [vmem:[%s3667_s1 + $0x4c4] ss:$8 sps:$4 sm:$0xff]   ;;  %v2923_v0 = vld [vmem:[%s3667_s1 + $0xc0] ss:$8 sps:$4 sm:$0xff]   ;;  %v533_v13 = vcombine.high %v273_v53, %v273_v53 }
  0x8b   : > { %1936 = vmatpush1.bf16.msra.mxu1 %v2875_v19  ;;  %v2924_v1 = vld [vmem:[%s3667_s1 + $0x4c0] ss:$8 sps:$4 sm:$0xff]   ;;  %v2925_v2 = vld [vmem:[%s3667_s1 + $0xd4] ss:$8 sps:$4 sm:$0xff]   ;;  %v2929_v5 = vld [vmem:[%s3667_s1 + $0xd0] ss:$8 sps:$4 sm:$0xff]  }
  0x8c   : > { %2100 = vmatpush1.bf16.msra.mxu0 %v2876_v20  ;;  %1937 = vmatprep.subr.bf16.mxu1 %v2877_v21  ;;  %v540_v55 = vrot.slane %v273_v53, %v3741_v50  ;;  %v589_v61 = vrot.slane %v274_v57, %v3741_v50  ;;  %v2927_v3 = vld [vmem:[%s3667_s1 + $0x4d4] ss:$8 sps:$4 sm:$0xff]   ;;  %v2930_v6 = vld [vmem:[%s3667_s1 + $0x4d0] ss:$8 sps:$4 sm:$0xff]   ;;  %v2931_v7 = vld [vmem:[%s3667_s1 + $0xe4] ss:$8 sps:$4 sm:$0xff]   ;;  %v547_v19 = vrot.slane %v533_v13, %v3741_v50 }
  0x8d   : > { %2101 = vmatprep.subr.bf16.mxu0 %v2879_v22  ;;  %v2933_v8 = vld [vmem:[%s3667_s1 + $0x4e4] ss:$8 sps:$4 sm:$0xff]   ;;  %v2935_v9 = vld [vmem:[%s3667_s1 + $0xe0] ss:$8 sps:$4 sm:$0xff]   ;;  %v2937_v11 = vld [vmem:[%s3667_s1 + $0xf4] ss:$8 sps:$4 sm:$0xff]   ;;  %v596_v20 = vrot.slane %v582_v14, %v3741_v50 }
  0x8e   : > { %v548_v60 = vcombine.high %v540_v55, %v540_v55  ;;  %v597_v63 = vcombine.high %v589_v61, %v589_v61  ;;  %v2936_v10 = vld [vmem:[%s3667_s1 + $0x4e0] ss:$8 sps:$4 sm:$0xff]   ;;  %v2939_v12 = vld [vmem:[%s3667_s1 + $0x4f4] ss:$8 sps:$4 sm:$0xff]   ;;  %v2941_v15 = vld [vmem:[%s3667_s1 + $0xf0] ss:$8 sps:$4 sm:$0xff]   ;;  %v3777_v21 = vrot.slane %v540_v55, %v3741_v50  ;;  %v3780_v22 = vrot.slane %v589_v61, %v3741_v50 }
  0x8f   : > { %1938 = vmatpush1.bf16.msra.mxu1 %v2881_v23  ;;  %v2942_v16 = vld [vmem:[%s3667_s1 + $0x4f0] ss:$8 sps:$4 sm:$0xff]   ;;  %v2946_v17 = vld [vmem:[%s3667_s1 + $0x104] ss:$8 sps:$4 sm:$0xff]   ;;  %v549_v23 = vcombine.high %v547_v19, %v547_v19  ;;  %v2957_v39 = vld [vmem:[%s3667_s1 + $0x120] ss:$8 sps:$4 sm:$0xff]  }
  0x90   : > { %2102 = vmatpush1.bf16.msra.mxu0 %v2882_v24  ;;  %1939 = vmatprep.subr.bf16.mxu1 %v2883_v25  ;;  %v3754_v62 = vrot.slane %v548_v60, %v3741_v50  ;;  %v619_v4 = vrot.slane %v597_v63, %v3741_v50  ;;  %v2950_v18 = vld [vmem:[%s3667_s1 + $0x504] ss:$8 sps:$4 sm:$0xff]   ;;  %v598_v24 = vcombine.high %v596_v20, %v596_v20  ;;  %v2944_v25 = vld [vmem:[%s3667_s1 + $0x100] ss:$8 sps:$4 sm:$0xff]   ;;  %v2963_v43 = vld [vmem:[%s3667_s1 + $0x130] ss:$8 sps:$4 sm:$0xff]  }
  0x91   : > { %2103 = vmatprep.subr.bf16.mxu0 %v2885_v26  ;;  %v2948_v26 = vld [vmem:[%s3667_s1 + $0x500] ss:$8 sps:$4 sm:$0xff]   ;;  %v2959_v37 = vld [vmem:[%s3667_s1 + $0x124] ss:$8 sps:$4 sm:$0xff]   ;;  %v2978_v53 = vld [vmem:[%s3667_s1 + $0x550] ss:$8 sps:$4 sm:$0xff]  }
  0x92   : > { %1959 = vmatprep.mubr.bf16.mxu1 %v3754_v62  ;;  %2123 = vmatprep.mubr.bf16.mxu0 %v619_v4  ;;  %v2962_v38 = vld [vmem:[%s3667_s1 + $0x524] ss:$8 sps:$4 sm:$0xff]   ;;  %v2984_v57 = vld [vmem:[%s3667_s1 + $0x560] ss:$8 sps:$4 sm:$0xff]   ;;  %v2987_v60 = vld [vmem:[%s3667_s1 + $0x170] ss:$8 sps:$4 sm:$0xff]  }
  0x93   : > { %1940 = vmatpush1.bf16.msra.mxu1 %v2887_v27  ;;  %v2953_v27 = vld [vmem:[%s3667_s1 + $0x114] ss:$8 sps:$4 sm:$0xff]   ;;  %v2986_v55 = vld [vmem:[%s3667_s1 + $0x564] ss:$8 sps:$4 sm:$0xff]   ;;  %v2990_v61 = vld [vmem:[%s3667_s1 + $0x570] ss:$8 sps:$4 sm:$0xff]  }
  0x94   : > { %2104 = vmatpush1.bf16.msra.mxu0 %v2888_v28  ;;  %1941 = vmatprep.subr.bf16.mxu1 %v2889_v29  ;;  %v2956_v28 = vld [vmem:[%s3667_s1 + $0x514] ss:$8 sps:$4 sm:$0xff]   ;;  %v3787_v29 = vrot.slane %v549_v23, %v3741_v50  ;;  %v2998_v63 = vld [vmem:[%s3667_s1 + $0x584] ss:$8 sps:$4 sm:$0xff]   ;;  %v3014_v13 = vld [vmem:[%s3667_s1 + $0x5b0] ss:$8 sps:$4 sm:$0xff]  }
  0x95   : > { %2105 = vmatprep.subr.bf16.mxu0 %v2891_v30  ;;  %v3790_v30 = vrot.slane %v598_v24, %v3741_v50  ;;  %v3019_v14 = vld [vmem:[%s3667_s1 + $0x1c4] ss:$8 sps:$4 sm:$0xff]   ;;  %v3026_v23 = vld [vmem:[%s3667_s1 + $0x5d0] ss:$8 sps:$4 sm:$0xff]  }
  0x96   : > { %v3031_v24 = vld [vmem:[%s3667_s1 + $0x1e4] ss:$8 sps:$4 sm:$0xff]  }
  0x97   : > { %1942 = vmatpush1.bf16.msra.mxu1 %v2893_v31  ;;  %v3793_v31 = vrot.slane %v547_v19, %v3741_v50  ;;  %v3028_v19 = vld [vmem:[%s3667_s1 + $0x5d4] ss:$8 sps:$4 sm:$0xff]  }
  0x98   : > { %2106 = vmatpush1.bf16.msra.mxu0 %v2894_v32  ;;  %1943 = vmatprep.subr.bf16.mxu1 %v2895_v33  ;;  %v580_v32 = vcombine.high %v3754_v62, %v3754_v62  ;;  %v629_v33 = vcombine.high %v619_v4, %v619_v4  ;;  %v2995_v62 = vld [vmem:[%s3667_s1 + $0x184] ss:$8 sps:$4 sm:$0xff]   ;;  %v2999_v4 = vld [vmem:[%s3667_s1 + $0x190] ss:$8 sps:$4 sm:$0xff]  }
  0x99   : > { %2107 = vmatprep.subr.bf16.mxu0 %v2897_v34  ;;  %v3798_v34 = vrot.slane %v596_v20, %v3741_v50  ;;  %v2977_v50 = vld [vmem:[%s3667_s1 + $0x154] ss:$8 sps:$4 sm:$0xff]   ;;  %v3023_v20 = vld [vmem:[%s3667_s1 + $0x1d0] ss:$8 sps:$4 sm:$0xff]  }
  0x9b   : > { %1944 = vmatpush1.bf16.msra.mxu1 %v2899_v35  ;;  %v2951_v35 = vld [vmem:[%s3667_s1 + $0x110] ss:$8 sps:$4 sm:$0xff]  }
  0x9c   : > { %2108 = vmatpush1.bf16.msra.mxu0 %v2900_v36  ;;  %1945 = vmatprep.subr.bf16.mxu1 %v2901_v40  ;;  %v2954_v36 = vld [vmem:[%s3667_s1 + $0x510] ss:$8 sps:$4 sm:$0xff]   ;;  %v2960_v40 = vld [vmem:[%s3667_s1 + $0x520] ss:$8 sps:$4 sm:$0xff]  }
  0x9d   : > { %2109 = vmatprep.subr.bf16.mxu0 %v2903_v41  ;;  %v2965_v41 = vld [vmem:[%s3667_s1 + $0x134] ss:$8 sps:$4 sm:$0xff]  }
  0x9f   : > { %1946 = vmatpush1.bf16.msra.mxu1 %v2905_v42  ;;  %v2968_v42 = vld [vmem:[%s3667_s1 + $0x534] ss:$8 sps:$4 sm:$0xff]  }
  0xa0   : > { %2110 = vmatpush1.bf16.msra.mxu0 %v2906_v45  ;;  %1947 = vmatprep.subr.bf16.mxu1 %v2907_v46  ;;  %v2966_v45 = vld [vmem:[%s3667_s1 + $0x530] ss:$8 sps:$4 sm:$0xff]   ;;  %v2971_v46 = vld [vmem:[%s3667_s1 + $0x144] ss:$8 sps:$4 sm:$0xff]  }
  0xa1   : > { %2111 = vmatprep.subr.bf16.mxu0 %v2909_v47  ;;  %v2974_v47 = vld [vmem:[%s3667_s1 + $0x544] ss:$8 sps:$4 sm:$0xff]  }
  0xa3   : > { %1948 = vmatpush1.bf16.msra.mxu1 %v2911_v48  ;;  %v2969_v48 = vld [vmem:[%s3667_s1 + $0x140] ss:$8 sps:$4 sm:$0xff]  }
  0xa4   : > { %2112 = vmatpush1.bf16.msra.mxu0 %v2912_v49  ;;  %1949 = vmatprep.subr.bf16.mxu1 %v2913_v51  ;;  %v2972_v49 = vld [vmem:[%s3667_s1 + $0x540] ss:$8 sps:$4 sm:$0xff]   ;;  %v2980_v51 = vld [vmem:[%s3667_s1 + $0x554] ss:$8 sps:$4 sm:$0xff]  }
  0xa5   : > { %2113 = vmatprep.subr.bf16.mxu0 %v2915_v52  ;;  %v2975_v52 = vld [vmem:[%s3667_s1 + $0x150] ss:$8 sps:$4 sm:$0xff]  }
  0xa7   : > { %1950 = vmatpush1.bf16.msra.mxu1 %v2917_v54  ;;  %v2983_v54 = vld [vmem:[%s3667_s1 + $0x164] ss:$8 sps:$4 sm:$0xff]  }
  0xa8   : > { %2114 = vmatpush1.bf16.msra.mxu0 %v2918_v56  ;;  %1951 = vmatprep.subr.bf16.mxu1 %v2919_v58  ;;  %v2981_v56 = vld [vmem:[%s3667_s1 + $0x160] ss:$8 sps:$4 sm:$0xff]   ;;  %v2989_v58 = vld [vmem:[%s3667_s1 + $0x174] ss:$8 sps:$4 sm:$0xff]  }
  0xa9   : > { %2115 = vmatprep.subr.bf16.mxu0 %v2921_v59  ;;  %v2992_v59 = vld [vmem:[%s3667_s1 + $0x574] ss:$8 sps:$4 sm:$0xff]  }
  0xab   : > { %1952 = vmatpush1.bf16.msra.mxu1 %v2923_v0  ;;  %v2993_v0 = vld [vmem:[%s3667_s1 + $0x180] ss:$8 sps:$4 sm:$0xff]  }
  0xac   : > { %2116 = vmatpush1.bf16.msra.mxu0 %v2924_v1  ;;  %1953 = vmatprep.subr.bf16.mxu1 %v2925_v2  ;;  %v2996_v1 = vld [vmem:[%s3667_s1 + $0x580] ss:$8 sps:$4 sm:$0xff]   ;;  %v3001_v2 = vld [vmem:[%s3667_s1 + $0x194] ss:$8 sps:$4 sm:$0xff]  }
  0xad   : > { %2117 = vmatprep.subr.bf16.mxu0 %v2927_v3  ;;  %v3004_v3 = vld [vmem:[%s3667_s1 + $0x594] ss:$8 sps:$4 sm:$0xff]  }
  0xaf   : > { %1954 = vmatpush1.bf16.msra.mxu1 %v2929_v5  ;;  %v3002_v5 = vld [vmem:[%s3667_s1 + $0x590] ss:$8 sps:$4 sm:$0xff]  }
  0xb0   : > { %2118 = vmatpush1.bf16.msra.mxu0 %v2930_v6  ;;  %1955 = vmatprep.subr.bf16.mxu1 %v2931_v7  ;;  %v3007_v6 = vld [vmem:[%s3667_s1 + $0x1a4] ss:$8 sps:$4 sm:$0xff]  }
  0xb1   : > { %2119 = vmatprep.subr.bf16.mxu0 %v2933_v8  ;;  %v3010_v7 = vld [vmem:[%s3667_s1 + $0x5a4] ss:$8 sps:$4 sm:$0xff]   ;;  %v3005_v8 = vld [vmem:[%s3667_s1 + $0x1a0] ss:$8 sps:$4 sm:$0xff]  }
  0xb3   : > { %1956 = vmatpush1.bf16.msra.mxu1 %v2935_v9  ;;  %v3008_v9 = vld [vmem:[%s3667_s1 + $0x5a0] ss:$8 sps:$4 sm:$0xff]  }
  0xb4   : > { %2120 = vmatpush1.bf16.msra.mxu0 %v2936_v10  ;;  %1957 = vmatprep.subr.bf16.mxu1 %v2937_v11  ;;  %v3013_v10 = vld [vmem:[%s3667_s1 + $0x1b4] ss:$8 sps:$4 sm:$0xff]  }
  0xb5   : > { %2121 = vmatprep.subr.bf16.mxu0 %v2939_v12  ;;  %v3016_v11 = vld [vmem:[%s3667_s1 + $0x5b4] ss:$8 sps:$4 sm:$0xff]   ;;  %v3011_v12 = vld [vmem:[%s3667_s1 + $0x1b0] ss:$8 sps:$4 sm:$0xff]  }
  0xb7   : > { %1958 = vmatpush1.bf16.msra.mxu1 %v2941_v15  ;;  %v3022_v15 = vld [vmem:[%s3667_s1 + $0x5c4] ss:$8 sps:$4 sm:$0xff]  }
  0xb8   : > { %2122 = vmatpush1.bf16.msra.mxu0 %v2942_v16  ;;  %1968 = vmatprep.subr.bf16.mxu1 %v2946_v17  ;;  %v3017_v16 = vld [vmem:[%s3667_s1 + $0x1c0] ss:$8 sps:$4 sm:$0xff]  }
  0xb9   : > { %2132 = vmatprep.subr.bf16.mxu0 %v2950_v18  ;;  %v3020_v17 = vld [vmem:[%s3667_s1 + $0x5c0] ss:$8 sps:$4 sm:$0xff]   ;;  %v3025_v18 = vld [vmem:[%s3667_s1 + $0x1d4] ss:$8 sps:$4 sm:$0xff]  }
  0xba   : > { %1960 = vmatmul.mubr.bf16.vlgmr.msra.gmra.mrb[0].mxu1 %v3777_v21 }
  0xbb   : > { %2124 = vmatmul.mubr.bf16.vlgmr.msra.gmra.mrb[0].mxu0 %v3780_v22  ;;  %1969 = vmatpush1.bf16.msra.mxu1 %v2944_v25  ;;  %v3034_v25 = vld [vmem:[%s3667_s1 + $0x5e4] ss:$8 sps:$4 sm:$0xff]  }
  0xbc   : > { %2133 = vmatpush1.bf16.msra.mxu0 %v2948_v26  ;;  %1970 = vmatprep.subr.bf16.mxu1 %v2953_v27  ;;  %v3029_v26 = vld [vmem:[%s3667_s1 + $0x1e0] ss:$8 sps:$4 sm:$0xff]  }
  0xbd   : > { %2134 = vmatprep.subr.bf16.mxu0 %v2956_v28  ;;  %2000 = vmatprep.mubr.bf16.mxu1 %v580_v32  ;;  %v3032_v27 = vld [vmem:[%s3667_s1 + $0x5e0] ss:$8 sps:$4 sm:$0xff]   ;;  %v3037_v28 = vld [vmem:[%s3667_s1 + $0x1f4] ss:$8 sps:$4 sm:$0xff]  }
  0xbe   : > { %2164 = vmatprep.mubr.bf16.mxu0 %v629_v33  ;;  %v3040_v32 = vld [vmem:[%s3667_s1 + $0x5f4] ss:$8 sps:$4 sm:$0xff]   ;;  %v3035_v33 = vld [vmem:[%s3667_s1 + $0x1f0] ss:$8 sps:$4 sm:$0xff]  }
  0xbf   : > { %1971 = vmatpush1.bf16.msra.mxu1 %v2951_v35  ;;  %v3038_v35 = vld [vmem:[%s3667_s1 + $0x5f0] ss:$8 sps:$4 sm:$0xff]  }
  0xc0   : > { %2135 = vmatpush1.bf16.msra.mxu0 %v2954_v36  ;;  %1972 = vmatprep.subr.bf16.mxu1 %v2959_v37  ;;  %v3043_v36 = vld [vmem:[%s3667_s1 + $0x204] ss:$8 sps:$4 sm:$0xff]  }
  0xc1   : > { %2136 = vmatprep.subr.bf16.mxu0 %v2962_v38  ;;  %v3046_v37 = vld [vmem:[%s3667_s1 + $0x604] ss:$8 sps:$4 sm:$0xff]   ;;  %v578_v38 = vcombine.high %v3777_v21, %v3777_v21  ;;  %v3047_v21 = vld [vmem:[%s3667_s1 + $0x210] ss:$8 sps:$4 sm:$0xff]  }
  0xc3   : > { %1973 = vmatpush1.bf16.msra.mxu1 %v2957_v39  ;;  %v627_v39 = vcombine.high %v3780_v22, %v3780_v22  ;;  %v3050_v22 = vld [vmem:[%s3667_s1 + $0x610] ss:$8 sps:$4 sm:$0xff]  }
  0xc4   : > { %2137 = vmatpush1.bf16.msra.mxu0 %v2960_v40  ;;  %1974 = vmatprep.subr.bf16.mxu1 %v2965_v41  ;;  %v3041_v40 = vld [vmem:[%s3667_s1 + $0x200] ss:$8 sps:$4 sm:$0xff]  }
  0xc5   : > { %2138 = vmatprep.subr.bf16.mxu0 %v2968_v42  ;;  %v3044_v41 = vld [vmem:[%s3667_s1 + $0x600] ss:$8 sps:$4 sm:$0xff]   ;;  %v3049_v42 = vld [vmem:[%s3667_s1 + $0x214] ss:$8 sps:$4 sm:$0xff]  }
  0xc7   : > { %1975 = vmatpush1.bf16.msra.mxu1 %v2963_v43  ;;  %v3052_v43 = vld [vmem:[%s3667_s1 + $0x614] ss:$8 sps:$4 sm:$0xff]  }
  0xc8   : > { %2139 = vmatpush1.bf16.msra.mxu0 %v2966_v45  ;;  %1976 = vmatprep.subr.bf16.mxu1 %v2971_v46  ;;  %v3055_v45 = vld [vmem:[%s3667_s1 + $0x224] ss:$8 sps:$4 sm:$0xff]  }
  0xc9   : > { %2140 = vmatprep.subr.bf16.mxu0 %v2974_v47  ;;  %v3058_v46 = vld [vmem:[%s3667_s1 + $0x624] ss:$8 sps:$4 sm:$0xff]   ;;  %v3053_v47 = vld [vmem:[%s3667_s1 + $0x220] ss:$8 sps:$4 sm:$0xff]  }
  0xcb   : > { %1977 = vmatpush1.bf16.msra.mxu1 %v2969_v48  ;;  %v3056_v48 = vld [vmem:[%s3667_s1 + $0x620] ss:$8 sps:$4 sm:$0xff]  }
  0xcc   : > { %2141 = vmatpush1.bf16.msra.mxu0 %v2972_v49  ;;  %1978 = vmatprep.subr.bf16.mxu1 %v2977_v50  ;;  %v3061_v49 = vld [vmem:[%s3667_s1 + $0x234] ss:$8 sps:$4 sm:$0xff]  }
  0xcd   : > { %2142 = vmatprep.subr.bf16.mxu0 %v2980_v51  ;;  %v3064_v50 = vld [vmem:[%s3667_s1 + $0x634] ss:$8 sps:$4 sm:$0xff]   ;;  %v3059_v51 = vld [vmem:[%s3667_s1 + $0x230] ss:$8 sps:$4 sm:$0xff]  }
  0xcf   : > { %1979 = vmatpush1.bf16.msra.mxu1 %v2975_v52  ;;  %v3062_v52 = vld [vmem:[%s3667_s1 + $0x630] ss:$8 sps:$4 sm:$0xff]  }
  0xd0   : > { %2143 = vmatpush1.bf16.msra.mxu0 %v2978_v53  ;;  %1980 = vmatprep.subr.bf16.mxu1 %v2983_v54  ;;  %v3067_v53 = vld [vmem:[%s3667_s1 + $0x244] ss:$8 sps:$4 sm:$0xff]  }
  0xd1   : > { %2144 = vmatprep.subr.bf16.mxu0 %v2986_v55  ;;  %v3070_v54 = vld [vmem:[%s3667_s1 + $0x644] ss:$8 sps:$4 sm:$0xff]   ;;  %v3065_v55 = vld [vmem:[%s3667_s1 + $0x240] ss:$8 sps:$4 sm:$0xff]  }
  0xd3   : > { %1981 = vmatpush1.bf16.msra.mxu1 %v2981_v56  ;;  %v3068_v56 = vld [vmem:[%s3667_s1 + $0x640] ss:$8 sps:$4 sm:$0xff]  }
  0xd4   : > { %2145 = vmatpush1.bf16.msra.mxu0 %v2984_v57  ;;  %1982 = vmatprep.subr.bf16.mxu1 %v2989_v58  ;;  %v3073_v57 = vld [vmem:[%s3667_s1 + $0x254] ss:$8 sps:$4 sm:$0xff]  }
  0xd5   : > { %2146 = vmatprep.subr.bf16.mxu0 %v2992_v59  ;;  %v3076_v58 = vld [vmem:[%s3667_s1 + $0x654] ss:$8 sps:$4 sm:$0xff]   ;;  %v3071_v59 = vld [vmem:[%s3667_s1 + $0x250] ss:$8 sps:$4 sm:$0xff]  }
  0xd7   : > { %1983 = vmatpush1.bf16.msra.mxu1 %v2987_v60  ;;  %v3074_v60 = vld [vmem:[%s3667_s1 + $0x650] ss:$8 sps:$4 sm:$0xff]  }
  0xd8   : > { %2147 = vmatpush1.bf16.msra.mxu0 %v2990_v61  ;;  %1984 = vmatprep.subr.bf16.mxu1 %v2995_v62  ;;  %v3079_v61 = vld [vmem:[%s3667_s1 + $0x264] ss:$8 sps:$4 sm:$0xff]  }
  0xd9   : > { %2148 = vmatprep.subr.bf16.mxu0 %v2998_v63  ;;  %v3082_v62 = vld [vmem:[%s3667_s1 + $0x664] ss:$8 sps:$4 sm:$0xff]   ;;  %v3077_v63 = vld [vmem:[%s3667_s1 + $0x260] ss:$8 sps:$4 sm:$0xff]  }
  0xdb   : > { %1985 = vmatpush1.bf16.msra.mxu1 %v2993_v0  ;;  %v3080_v0 = vld [vmem:[%s3667_s1 + $0x660] ss:$8 sps:$4 sm:$0xff]  }
  0xdc   : > { %2149 = vmatpush1.bf16.msra.mxu0 %v2996_v1  ;;  %1986 = vmatprep.subr.bf16.mxu1 %v3001_v2  ;;  %v3085_v1 = vld [vmem:[%s3667_s1 + $0x274] ss:$8 sps:$4 sm:$0xff]  }
  0xdd   : > { %2150 = vmatprep.subr.bf16.mxu0 %v3004_v3  ;;  %v3088_v2 = vld [vmem:[%s3667_s1 + $0x674] ss:$8 sps:$4 sm:$0xff]   ;;  %v3083_v3 = vld [vmem:[%s3667_s1 + $0x270] ss:$8 sps:$4 sm:$0xff]  }
  0xdf   : > { %1987 = vmatpush1.bf16.msra.mxu1 %v2999_v4  ;;  %v3086_v4 = vld [vmem:[%s3667_s1 + $0x670] ss:$8 sps:$4 sm:$0xff]  }
  0xe0   : > { %2151 = vmatpush1.bf16.msra.mxu0 %v3002_v5  ;;  %1988 = vmatprep.subr.bf16.mxu1 %v3007_v6  ;;  %v3091_v5 = vld [vmem:[%s3667_s1 + $0x284] ss:$8 sps:$4 sm:$0xff]  }
  0xe1   : > { %2152 = vmatprep.subr.bf16.mxu0 %v3010_v7  ;;  %v3094_v6 = vld [vmem:[%s3667_s1 + $0x684] ss:$8 sps:$4 sm:$0xff]   ;;  %v3089_v7 = vld [vmem:[%s3667_s1 + $0x280] ss:$8 sps:$4 sm:$0xff]  }
  0xe3   : > { %1989 = vmatpush1.bf16.msra.mxu1 %v3005_v8  ;;  %v3092_v8 = vld [vmem:[%s3667_s1 + $0x680] ss:$8 sps:$4 sm:$0xff]  }
  0xe4   : > { %2153 = vmatpush1.bf16.msra.mxu0 %v3008_v9  ;;  %1990 = vmatprep.subr.bf16.mxu1 %v3013_v10  ;;  %v3097_v9 = vld [vmem:[%s3667_s1 + $0x294] ss:$8 sps:$4 sm:$0xff]  }
  0xe5   : > { %2154 = vmatprep.subr.bf16.mxu0 %v3016_v11  ;;  %v3100_v10 = vld [vmem:[%s3667_s1 + $0x694] ss:$8 sps:$4 sm:$0xff]   ;;  %v3095_v11 = vld [vmem:[%s3667_s1 + $0x290] ss:$8 sps:$4 sm:$0xff]  }
  0xe7   : > { %1991 = vmatpush1.bf16.msra.mxu1 %v3011_v12  ;;  %v3098_v12 = vld [vmem:[%s3667_s1 + $0x690] ss:$8 sps:$4 sm:$0xff]  }
  0xe8   : > { %2155 = vmatpush1.bf16.msra.mxu0 %v3014_v13  ;;  %1992 = vmatprep.subr.bf16.mxu1 %v3019_v14  ;;  %v3103_v13 = vld [vmem:[%s3667_s1 + $0x2a4] ss:$8 sps:$4 sm:$0xff]  }
  0xe9   : > { %2156 = vmatprep.subr.bf16.mxu0 %v3022_v15  ;;  %v3106_v14 = vld [vmem:[%s3667_s1 + $0x6a4] ss:$8 sps:$4 sm:$0xff]   ;;  %v3101_v15 = vld [vmem:[%s3667_s1 + $0x2a0] ss:$8 sps:$4 sm:$0xff]  }
  0xeb   : > { %1993 = vmatpush1.bf16.msra.mxu1 %v3017_v16  ;;  %v3104_v16 = vld [vmem:[%s3667_s1 + $0x6a0] ss:$8 sps:$4 sm:$0xff]  }
  0xec   : > { %2157 = vmatpush1.bf16.msra.mxu0 %v3020_v17  ;;  %1994 = vmatprep.subr.bf16.mxu1 %v3025_v18  ;;  %v3109_v17 = vld [vmem:[%s3667_s1 + $0x2b4] ss:$8 sps:$4 sm:$0xff]  }
  0xed   : > { %2158 = vmatprep.subr.bf16.mxu0 %v3028_v19  ;;  %v3112_v18 = vld [vmem:[%s3667_s1 + $0x6b4] ss:$8 sps:$4 sm:$0xff]   ;;  %v3107_v19 = vld [vmem:[%s3667_s1 + $0x2b0] ss:$8 sps:$4 sm:$0xff]  }
  0xef   : > { %1995 = vmatpush1.bf16.msra.mxu1 %v3023_v20  ;;  %v3110_v20 = vld [vmem:[%s3667_s1 + $0x6b0] ss:$8 sps:$4 sm:$0xff]  }
  0xf0   : > { %2159 = vmatpush1.bf16.msra.mxu0 %v3026_v23  ;;  %1996 = vmatprep.subr.bf16.mxu1 %v3031_v24  ;;  %v3115_v23 = vld [vmem:[%s3667_s1 + $0x2c4] ss:$8 sps:$4 sm:$0xff]  }
  0xf1   : > { %2160 = vmatprep.subr.bf16.mxu0 %v3034_v25  ;;  %v3118_v24 = vld [vmem:[%s3667_s1 + $0x6c4] ss:$8 sps:$4 sm:$0xff]   ;;  %v3113_v25 = vld [vmem:[%s3667_s1 + $0x2c0] ss:$8 sps:$4 sm:$0xff]  }
  0xf3   : > { %1997 = vmatpush1.bf16.msra.mxu1 %v3029_v26  ;;  %v3116_v26 = vld [vmem:[%s3667_s1 + $0x6c0] ss:$8 sps:$4 sm:$0xff]  }
  0xf4   : > { %2161 = vmatpush1.bf16.msra.mxu0 %v3032_v27  ;;  %1998 = vmatprep.subr.bf16.mxu1 %v3037_v28  ;;  %v3121_v27 = vld [vmem:[%s3667_s1 + $0x2d4] ss:$8 sps:$4 sm:$0xff]  }
  0xf5   : > { %2162 = vmatprep.subr.bf16.mxu0 %v3040_v32  ;;  %v3124_v28 = vld [vmem:[%s3667_s1 + $0x6d4] ss:$8 sps:$4 sm:$0xff]   ;;  %v3119_v32 = vld [vmem:[%s3667_s1 + $0x2d0] ss:$8 sps:$4 sm:$0xff]  }
  0xf7   : > { %1999 = vmatpush1.bf16.msra.mxu1 %v3035_v33  ;;  %v3122_v33 = vld [vmem:[%s3667_s1 + $0x6d0] ss:$8 sps:$4 sm:$0xff]  }
  0xf8   : > { %2163 = vmatpush1.bf16.msra.mxu0 %v3038_v35  ;;  %2009 = vmatprep.subr.bf16.mxu1 %v3043_v36  ;;  %v3127_v35 = vld [vmem:[%s3667_s1 + $0x2e4] ss:$8 sps:$4 sm:$0xff]  }
  0xf9   : > { %2173 = vmatprep.subr.bf16.mxu0 %v3046_v37  ;;  %v3130_v36 = vld [vmem:[%s3667_s1 + $0x6e4] ss:$8 sps:$4 sm:$0xff]   ;;  %v3125_v37 = vld [vmem:[%s3667_s1 + $0x2e0] ss:$8 sps:$4 sm:$0xff]  }
  0xfa   : > { %2001 = vmatmul.mubr.bf16.vlgmr.msra.gmra.mrb[0].mxu1 %v578_v38  ;;  %v3128_v38 = vld [vmem:[%s3667_s1 + $0x6e0] ss:$8 sps:$4 sm:$0xff]  }
  0xfb   : > { %2165 = vmatmul.mubr.bf16.vlgmr.msra.gmra.mrb[0].mxu0 %v627_v39  ;;  %2010 = vmatpush1.bf16.msra.mxu1 %v3041_v40  ;;  %v3133_v39 = vld [vmem:[%s3667_s1 + $0x2f4] ss:$8 sps:$4 sm:$0xff]  }
  0xfc   : > { %2174 = vmatpush1.bf16.msra.mxu0 %v3044_v41  ;;  %2011 = vmatprep.subr.bf16.mxu1 %v3049_v42  ;;  %v3136_v40 = vld [vmem:[%s3667_s1 + $0x6f4] ss:$8 sps:$4 sm:$0xff]   ;;  %v3131_v41 = vld [vmem:[%s3667_s1 + $0x2f0] ss:$8 sps:$4 sm:$0xff]  }
  0xfd   : > { %2175 = vmatprep.subr.bf16.mxu0 %v3052_v43  ;;  %2041 = vmatprep.mubr.bf16.mxu1 %v3787_v29  ;;  %v3134_v42 = vld [vmem:[%s3667_s1 + $0x6f0] ss:$8 sps:$4 sm:$0xff]   ;;  %v3139_v43 = vld [vmem:[%s3667_s1 + $0x304] ss:$8 sps:$4 sm:$0xff]  }
  0xfe   : > { %2205 = vmatprep.mubr.bf16.mxu0 %v3790_v30 }
  0xff   : > { %2012 = vmatpush1.bf16.msra.mxu1 %v3047_v21  ;;  %v3142_v21 = vld [vmem:[%s3667_s1 + $0x704] ss:$8 sps:$4 sm:$0xff]  }
 0x100   : > { %2176 = vmatpush1.bf16.msra.mxu0 %v3050_v22  ;;  %2013 = vmatprep.subr.bf16.mxu1 %v3055_v45  ;;  %v3137_v22 = vld [vmem:[%s3667_s1 + $0x300] ss:$8 sps:$4 sm:$0xff]  }
 0x101   : > { %2177 = vmatprep.subr.bf16.mxu0 %v3058_v46  ;;  %v3140_v45 = vld [vmem:[%s3667_s1 + $0x700] ss:$8 sps:$4 sm:$0xff]   ;;  %v3145_v46 = vld [vmem:[%s3667_s1 + $0x314] ss:$8 sps:$4 sm:$0xff]  }
 0x103   : > { %2014 = vmatpush1.bf16.msra.mxu1 %v3053_v47  ;;  %v3148_v47 = vld [vmem:[%s3667_s1 + $0x714] ss:$8 sps:$4 sm:$0xff]  }
 0x104   : > { %2178 = vmatpush1.bf16.msra.mxu0 %v3056_v48  ;;  %2015 = vmatprep.subr.bf16.mxu1 %v3061_v49  ;;  %v581_v48 = vcombine.high %v3787_v29, %v3787_v29  ;;  %v630_v49 = vcombine.high %v3790_v30, %v3790_v30  ;;  %v3151_v29 = vld [vmem:[%s3667_s1 + $0x324] ss:$8 sps:$4 sm:$0xff]   ;;  %v3149_v30 = vld [vmem:[%s3667_s1 + $0x320] ss:$8 sps:$4 sm:$0xff]  }
 0x105   : > { %2179 = vmatprep.subr.bf16.mxu0 %v3064_v50  ;;  %v3143_v50 = vld [vmem:[%s3667_s1 + $0x310] ss:$8 sps:$4 sm:$0xff]  }
 0x107   : > { %2016 = vmatpush1.bf16.msra.mxu1 %v3059_v51  ;;  %v3146_v51 = vld [vmem:[%s3667_s1 + $0x710] ss:$8 sps:$4 sm:$0xff]  }
 0x108   : > { %2180 = vmatpush1.bf16.msra.mxu0 %v3062_v52  ;;  %2017 = vmatprep.subr.bf16.mxu1 %v3067_v53  ;;  %v3154_v52 = vld [vmem:[%s3667_s1 + $0x724] ss:$8 sps:$4 sm:$0xff]   ;;  %v3152_v53 = vld [vmem:[%s3667_s1 + $0x720] ss:$8 sps:$4 sm:$0xff]  }
 0x109   : > { %2181 = vmatprep.subr.bf16.mxu0 %v3070_v54  ;;  %v3157_v54 = vld [vmem:[%s3667_s1 + $0x334] ss:$8 sps:$4 sm:$0xff]  }
 0x10b   : > { %2018 = vmatpush1.bf16.msra.mxu1 %v3065_v55  ;;  %v3160_v55 = vld [vmem:[%s3667_s1 + $0x734] ss:$8 sps:$4 sm:$0xff]  }
 0x10c   : > { %2182 = vmatpush1.bf16.msra.mxu0 %v3068_v56  ;;  %2019 = vmatprep.subr.bf16.mxu1 %v3073_v57  ;;  %v3155_v56 = vld [vmem:[%s3667_s1 + $0x330] ss:$8 sps:$4 sm:$0xff]  }
 0x10d   : > { %2183 = vmatprep.subr.bf16.mxu0 %v3076_v58  ;;  %v3158_v57 = vld [vmem:[%s3667_s1 + $0x730] ss:$8 sps:$4 sm:$0xff]   ;;  %v3163_v58 = vld [vmem:[%s3667_s1 + $0x344] ss:$8 sps:$4 sm:$0xff]  }
 0x10f   : > { %2020 = vmatpush1.bf16.msra.mxu1 %v3071_v59  ;;  %v3166_v59 = vld [vmem:[%s3667_s1 + $0x744] ss:$8 sps:$4 sm:$0xff]  }
 0x110   : > { %2184 = vmatpush1.bf16.msra.mxu0 %v3074_v60  ;;  %2021 = vmatprep.subr.bf16.mxu1 %v3079_v61  ;;  %v3161_v60 = vld [vmem:[%s3667_s1 + $0x340] ss:$8 sps:$4 sm:$0xff]  }
 0x111   : > { %2185 = vmatprep.subr.bf16.mxu0 %v3082_v62  ;;  %v3164_v61 = vld [vmem:[%s3667_s1 + $0x740] ss:$8 sps:$4 sm:$0xff]   ;;  %v3169_v62 = vld [vmem:[%s3667_s1 + $0x354] ss:$8 sps:$4 sm:$0xff]  }
 0x113   : > { %2022 = vmatpush1.bf16.msra.mxu1 %v3077_v63  ;;  %v3172_v63 = vld [vmem:[%s3667_s1 + $0x754] ss:$8 sps:$4 sm:$0xff]  }
 0x114   : > { %2186 = vmatpush1.bf16.msra.mxu0 %v3080_v0  ;;  %2023 = vmatprep.subr.bf16.mxu1 %v3085_v1  ;;  %v3167_v0 = vld [vmem:[%s3667_s1 + $0x350] ss:$8 sps:$4 sm:$0xff]  }
 0x115   : > { %2187 = vmatprep.subr.bf16.mxu0 %v3088_v2  ;;  %v3170_v1 = vld [vmem:[%s3667_s1 + $0x750] ss:$8 sps:$4 sm:$0xff]   ;;  %v3175_v2 = vld [vmem:[%s3667_s1 + $0x364] ss:$8 sps:$4 sm:$0xff]  }
 0x117   : > { %2024 = vmatpush1.bf16.msra.mxu1 %v3083_v3  ;;  %v3178_v3 = vld [vmem:[%s3667_s1 + $0x764] ss:$8 sps:$4 sm:$0xff]  }
 0x118   : > { %2188 = vmatpush1.bf16.msra.mxu0 %v3086_v4  ;;  %2025 = vmatprep.subr.bf16.mxu1 %v3091_v5  ;;  %v3173_v4 = vld [vmem:[%s3667_s1 + $0x360] ss:$8 sps:$4 sm:$0xff]  }
 0x119   : > { %2189 = vmatprep.subr.bf16.mxu0 %v3094_v6  ;;  %v3176_v5 = vld [vmem:[%s3667_s1 + $0x760] ss:$8 sps:$4 sm:$0xff]   ;;  %v3181_v6 = vld [vmem:[%s3667_s1 + $0x374] ss:$8 sps:$4 sm:$0xff]  }
 0x11b   : > { %2026 = vmatpush1.bf16.msra.mxu1 %v3089_v7  ;;  %v3184_v7 = vld [vmem:[%s3667_s1 + $0x774] ss:$8 sps:$4 sm:$0xff]  }
 0x11c   : > { %2190 = vmatpush1.bf16.msra.mxu0 %v3092_v8  ;;  %2027 = vmatprep.subr.bf16.mxu1 %v3097_v9  ;;  %v3179_v8 = vld [vmem:[%s3667_s1 + $0x370] ss:$8 sps:$4 sm:$0xff]  }
 0x11d   : > { %2191 = vmatprep.subr.bf16.mxu0 %v3100_v10  ;;  %v3182_v9 = vld [vmem:[%s3667_s1 + $0x770] ss:$8 sps:$4 sm:$0xff]   ;;  %v3187_v10 = vld [vmem:[%s3667_s1 + $0x384] ss:$8 sps:$4 sm:$0xff]  }
 0x11f   : > { %2028 = vmatpush1.bf16.msra.mxu1 %v3095_v11  ;;  %v3190_v11 = vld [vmem:[%s3667_s1 + $0x784] ss:$8 sps:$4 sm:$0xff]  }
 0x120   : > { %2192 = vmatpush1.bf16.msra.mxu0 %v3098_v12  ;;  %2029 = vmatprep.subr.bf16.mxu1 %v3103_v13  ;;  %v3185_v12 = vld [vmem:[%s3667_s1 + $0x380] ss:$8 sps:$4 sm:$0xff]  }
 0x121   : > { %2193 = vmatprep.subr.bf16.mxu0 %v3106_v14  ;;  %v3188_v13 = vld [vmem:[%s3667_s1 + $0x780] ss:$8 sps:$4 sm:$0xff]   ;;  %v3193_v14 = vld [vmem:[%s3667_s1 + $0x394] ss:$8 sps:$4 sm:$0xff]  }
 0x123   : > { %2030 = vmatpush1.bf16.msra.mxu1 %v3101_v15  ;;  %v3196_v15 = vld [vmem:[%s3667_s1 + $0x794] ss:$8 sps:$4 sm:$0xff]  }
 0x124   : > { %2194 = vmatpush1.bf16.msra.mxu0 %v3104_v16  ;;  %2031 = vmatprep.subr.bf16.mxu1 %v3109_v17  ;;  %v3191_v16 = vld [vmem:[%s3667_s1 + $0x390] ss:$8 sps:$4 sm:$0xff]  }
 0x125   : > { %2195 = vmatprep.subr.bf16.mxu0 %v3112_v18  ;;  %v3194_v17 = vld [vmem:[%s3667_s1 + $0x790] ss:$8 sps:$4 sm:$0xff]   ;;  %v3199_v18 = vld [vmem:[%s3667_s1 + $0x3a4] ss:$8 sps:$4 sm:$0xff]  }
 0x127   : > { %2032 = vmatpush1.bf16.msra.mxu1 %v3107_v19  ;;  %v3202_v19 = vld [vmem:[%s3667_s1 + $0x7a4] ss:$8 sps:$4 sm:$0xff]  }
 0x128   : > { %2196 = vmatpush1.bf16.msra.mxu0 %v3110_v20  ;;  %2033 = vmatprep.subr.bf16.mxu1 %v3115_v23  ;;  %v3197_v20 = vld [vmem:[%s3667_s1 + $0x3a0] ss:$8 sps:$4 sm:$0xff]  }
 0x129   : > { %2197 = vmatprep.subr.bf16.mxu0 %v3118_v24  ;;  %v3200_v23 = vld [vmem:[%s3667_s1 + $0x7a0] ss:$8 sps:$4 sm:$0xff]   ;;  %v3205_v24 = vld [vmem:[%s3667_s1 + $0x3b4] ss:$8 sps:$4 sm:$0xff]  }
 0x12b   : > { %2034 = vmatpush1.bf16.msra.mxu1 %v3113_v25  ;;  %v3208_v25 = vld [vmem:[%s3667_s1 + $0x7b4] ss:$8 sps:$4 sm:$0xff]  }
 0x12c   : > { %2198 = vmatpush1.bf16.msra.mxu0 %v3116_v26  ;;  %2035 = vmatprep.subr.bf16.mxu1 %v3121_v27  ;;  %v3203_v26 = vld [vmem:[%s3667_s1 + $0x3b0] ss:$8 sps:$4 sm:$0xff]  }
 0x12d   : > { %2199 = vmatprep.subr.bf16.mxu0 %v3124_v28  ;;  %v3206_v27 = vld [vmem:[%s3667_s1 + $0x7b0] ss:$8 sps:$4 sm:$0xff]   ;;  %v3211_v28 = vld [vmem:[%s3667_s1 + $0x3c4] ss:$8 sps:$4 sm:$0xff]  }
 0x12f   : > { %2036 = vmatpush1.bf16.msra.mxu1 %v3119_v32  ;;  %v3214_v32 = vld [vmem:[%s3667_s1 + $0x7c4] ss:$8 sps:$4 sm:$0xff]  }
 0x130   : > { %2200 = vmatpush1.bf16.msra.mxu0 %v3122_v33  ;;  %2037 = vmatprep.subr.bf16.mxu1 %v3127_v35  ;;  %v3209_v33 = vld [vmem:[%s3667_s1 + $0x3c0] ss:$8 sps:$4 sm:$0xff]  }
 0x131   : > { %2201 = vmatprep.subr.bf16.mxu0 %v3130_v36  ;;  %v3212_v35 = vld [vmem:[%s3667_s1 + $0x7c0] ss:$8 sps:$4 sm:$0xff]   ;;  %v3217_v36 = vld [vmem:[%s3667_s1 + $0x3d4] ss:$8 sps:$4 sm:$0xff]  }
 0x133   : > { %2038 = vmatpush1.bf16.msra.mxu1 %v3125_v37  ;;  %v3220_v37 = vld [vmem:[%s3667_s1 + $0x7d4] ss:$8 sps:$4 sm:$0xff]  }
 0x134   : > { %2202 = vmatpush1.bf16.msra.mxu0 %v3128_v38  ;;  %2039 = vmatprep.subr.bf16.mxu1 %v3133_v39  ;;  %v3215_v38 = vld [vmem:[%s3667_s1 + $0x3d0] ss:$8 sps:$4 sm:$0xff]  }
 0x135   : > { %2203 = vmatprep.subr.bf16.mxu0 %v3136_v40  ;;  %v3218_v39 = vld [vmem:[%s3667_s1 + $0x7d0] ss:$8 sps:$4 sm:$0xff]   ;;  %v3223_v40 = vld [vmem:[%s3667_s1 + $0x3e4] ss:$8 sps:$4 sm:$0xff]  }
 0x137   : > { %2040 = vmatpush1.bf16.msra.mxu1 %v3131_v41  ;;  %v3226_v41 = vld [vmem:[%s3667_s1 + $0x7e4] ss:$8 sps:$4 sm:$0xff]  }
 0x138   : > { %2204 = vmatpush1.bf16.msra.mxu0 %v3134_v42  ;;  %2050 = vmatprep.subr.bf16.mxu1 %v3139_v43  ;;  %v3221_v42 = vld [vmem:[%s3667_s1 + $0x3e0] ss:$8 sps:$4 sm:$0xff]  }
 0x139   : > { %2214 = vmatprep.subr.bf16.mxu0 %v3142_v21  ;;  %v3224_v43 = vld [vmem:[%s3667_s1 + $0x7e0] ss:$8 sps:$4 sm:$0xff]   ;;  %v3229_v21 = vld [vmem:[%s3667_s1 + $0x3f4] ss:$8 sps:$4 sm:$0xff]  }
 0x13a   : > { %2042 = vmatmul.mubr.bf16.vlgmr.msra.gmra.mrb[0].mxu1 %v3793_v31 }
 0x13b   : > { %2206 = vmatmul.mubr.bf16.vlgmr.msra.gmra.mrb[0].mxu0 %v3798_v34  ;;  %2051 = vmatpush1.bf16.msra.mxu1 %v3137_v22  ;;  %v3232_v22 = vld [vmem:[%s3667_s1 + $0x7f4] ss:$8 sps:$4 sm:$0xff]  }
 0x13c   : > { %2215 = vmatpush1.bf16.msra.mxu0 %v3140_v45  ;;  %2052 = vmatprep.subr.bf16.mxu1 %v3145_v46  ;;  %v3227_v45 = vld [vmem:[%s3667_s1 + $0x3f0] ss:$8 sps:$4 sm:$0xff]  }
 0x13d   : > { %2216 = vmatprep.subr.bf16.mxu0 %v3148_v47  ;;  %2082 = vmatprep.mubr.bf16.mxu1 %v581_v48  ;;  %v3230_v46 = vld [vmem:[%s3667_s1 + $0x7f0] ss:$8 sps:$4 sm:$0xff]   ;;  %v579_v47 = vcombine.high %v3793_v31, %v3793_v31  ;;  %v628_v48 = vcombine.high %v3798_v34, %v3798_v34 }
 0x13e   : > { %2246 = vmatprep.mubr.bf16.mxu0 %v630_v49  ;;  %v3428_v49 = vmov 1983009808  }
 0x13f   : > { %2053 = vmatpush1.bf16.msra.mxu1 %v3143_v50  ;;  %v2259_v50 = vunpack.c.l.s4 %v3428_v49 }
 0x140   : > { %2217 = vmatpush1.bf16.msra.mxu0 %v3146_v51  ;;  %2054 = vmatprep.subr.bf16.mxu1 %v3151_v29 }
 0x141   : > { %2218 = vmatprep.subr.bf16.mxu0 %v3154_v52  ;;  %v2260_v51 = vunpack.c.0.s8 %v2259_v50 }
 0x143   : > { %2055 = vmatpush1.bf16.msra.mxu1 %v3149_v30 }
 0x144   : > { %2219 = vmatpush1.bf16.msra.mxu0 %v3152_v53  ;;  %2056 = vmatprep.subr.bf16.mxu1 %v3157_v54 }
 0x145   : > { %2220 = vmatprep.subr.bf16.mxu0 %v3160_v55 }
 0x147   : > { %2057 = vmatpush1.bf16.msra.mxu1 %v3155_v56  ;;  %v2263_v56 = vsub.s32 %v2260_v51, %v3733_v44 }
 0x148   : > { %2221 = vmatpush1.bf16.msra.mxu0 %v3158_v57  ;;  %2058 = vmatprep.subr.bf16.mxu1 %v3163_v58 }
 0x149   : > { %2222 = vmatprep.subr.bf16.mxu0 %v3166_v59 }
 0x14b   : > { %2059 = vmatpush1.bf16.msra.mxu1 %v3161_v60  ;;  %v272_v60 = vld [vmem:[#allocation2] sm:$0xf] }
 0x14c   : > { %2223 = vmatpush1.bf16.msra.mxu0 %v3164_v61  ;;  %2060 = vmatprep.subr.bf16.mxu1 %v3169_v62 }
 0x14d   : > { %2224 = vmatprep.subr.bf16.mxu0 %v3172_v63  ;;  %v2273_v63 = vld [vmem:[%s3678_s4] sm:$0x3] (!%p2699_p5) }
 0x14f   : > { %2061 = vmatpush1.bf16.msra.mxu1 %v3167_v0  ;;  %v2277_v0 = vsub.s32 (!%p2699_p5), 0, %v3733_v44 }
 0x150   : > { %2225 = vmatpush1.bf16.msra.mxu0 %v3170_v1  ;;  %2062 = vmatprep.subr.bf16.mxu1 %v3175_v2  ;;  %v2281_v1 = vsub.s32 (!%p2699_p5), 1, %v3733_v44 }
 0x151   : > { %2226 = vmatprep.subr.bf16.mxu0 %v3178_v3  ;;  %v2278_v2 = vrot.slane (!%p2699_p5), %v2273_v63, %v2277_v0 }
 0x152   : > { %v2282_v3 = vrot.slane (!%p2699_p5), %v2273_v63, %v2281_v1 }
 0x153   : > { %2063 = vmatpush1.bf16.msra.mxu1 %v3173_v4 }
 0x154   : > { %2227 = vmatpush1.bf16.msra.mxu0 %v3176_v5  ;;  %2064 = vmatprep.subr.bf16.mxu1 %v3181_v6  ;;  %v2283_v4 = vcombine.low (!%p2699_p5), %v2278_v2, %v2282_v3 }
 0x155   : > { %2228 = vmatprep.subr.bf16.mxu0 %v3184_v7 }
 0x156   : > { %v2290_v6 = vrot.slane (!%p2699_p5), %v2283_v4, %v2263_v56 }
 0x157   : > { %2065 = vmatpush1.bf16.msra.mxu1 %v3179_v8 }
 0x158   : > { %2229 = vmatpush1.bf16.msra.mxu0 %v3182_v9  ;;  %2066 = vmatprep.subr.bf16.mxu1 %v3187_v10 }
 0x159   : > { %2230 = vmatprep.subr.bf16.mxu0 %v3190_v11 }
 0x15b   : > { %2067 = vmatpush1.bf16.msra.mxu1 %v3185_v12 }
 0x15c   : > { %2231 = vmatpush1.bf16.msra.mxu0 %v3188_v13  ;;  %2068 = vmatprep.subr.bf16.mxu1 %v3193_v14 }
 0x15d   : > { %2232 = vmatprep.subr.bf16.mxu0 %v3196_v15 }
 0x15f   : > { %2069 = vmatpush1.bf16.msra.mxu1 %v3191_v16 }
 0x160   : > { %2233 = vmatpush1.bf16.msra.mxu0 %v3194_v17  ;;  %2070 = vmatprep.subr.bf16.mxu1 %v3199_v18 }
 0x161   : > { %2234 = vmatprep.subr.bf16.mxu0 %v3202_v19 }
 0x163   : > { %2071 = vmatpush1.bf16.msra.mxu1 %v3197_v20 }
 0x164   : > { %2235 = vmatpush1.bf16.msra.mxu0 %v3200_v23  ;;  %2072 = vmatprep.subr.bf16.mxu1 %v3205_v24 }
 0x165   : > { %2236 = vmatprep.subr.bf16.mxu0 %v3208_v25 }
 0x167   : > { %2073 = vmatpush1.bf16.msra.mxu1 %v3203_v26 }
 0x168   : > { %2237 = vmatpush1.bf16.msra.mxu0 %v3206_v27  ;;  %2074 = vmatprep.subr.bf16.mxu1 %v3211_v28 }
 0x169   : > { %2238 = vmatprep.subr.bf16.mxu0 %v3214_v32 }
 0x16b   : > { %2075 = vmatpush1.bf16.msra.mxu1 %v3209_v33 }
 0x16c   : > { %2239 = vmatpush1.bf16.msra.mxu0 %v3212_v35  ;;  %2076 = vmatprep.subr.bf16.mxu1 %v3217_v36 }
 0x16d   : > { %2240 = vmatprep.subr.bf16.mxu0 %v3220_v37 }
 0x16f   : > { %2077 = vmatpush1.bf16.msra.mxu1 %v3215_v38 }
 0x170   : > { %2241 = vmatpush1.bf16.msra.mxu0 %v3218_v39  ;;  %2078 = vmatprep.subr.bf16.mxu1 %v3223_v40 }
 0x171   : > { %2242 = vmatprep.subr.bf16.mxu0 %v3226_v41 }
 0x173   : > { %2079 = vmatpush1.bf16.msra.mxu1 %v3221_v42 }
 0x174   : > { %2243 = vmatpush1.bf16.msra.mxu0 %v3224_v43  ;;  %2080 = vmatprep.subr.bf16.mxu1 %v3229_v21 }
 0x175   : > { %2244 = vmatprep.subr.bf16.mxu0 %v3232_v22 }
 0x177   : > { %2081 = vmatpush1.bf16.msra.mxu1 %v3227_v45 }
 0x178   : > { %2245 = vmatpush1.bf16.msra.mxu0 %v3230_v46 }
 0x17a   : > { %2083 = vmatmul.mubr.bf16.vlgmr.msra.gmra.mrb[0].mxu1 %v579_v47 }
 0x17b   : > { %2247 = vmatmul.mubr.bf16.vlgmr.msra.gmra.mrb[0].mxu0 %v628_v48 }
 0x24d   : > { %v2084_v29 = vpop.f32.mrb[0].mxu1 }
 0x24e   : > { %v2248_v52 = vpop.f32.mrb[0].mxu0  ;;  %v2086_v53 = vpop.f32.mrb[1].mxu1 }
 0x24f   : > { %v2708_v30 = vadd.f32 %v2248_v52, %v2084_v29  ;;  %v2250_v54 = vpop.f32.mrb[1].mxu0  ;;  %v2088_v57 = vpop.f32.mrb[2].mxu1 }
 0x250   : > { %v2709_v55 = vadd.f32 %v2250_v54, %v2086_v53  ;;  %v2252_v31 = vpop.f32.mrb[2].mxu0  ;;  %v2089_v58 = vpop.f32.mrb[3].mxu1 }
 0x251   : > { %v2253_v59 = vpop.f32.mrb[3].mxu0 }
 0x252   : > { %v2257_v34 = vcombine.low %v2708_v30, %v2709_v55  ;;  %2271 = sbr.rel (%p2699_p5) target bundleno = 611 (0x263), region = 48 }
 0x254   : > { %v2264_v61 = vrot.slane %v2257_v34, %v2263_v56 }
 0x256   : > { %v2266_v62 = vadd.f32 %v2264_v61, %v272_v60 }
 0x258   : > { %2267 = vst [vmem:[#allocation2] sm:$0xf] %v2266_v62 }
 0x25f   : > { %v2272_v5 = vld [vmem:[#allocation2] sm:$0xf] }
 0x260   : > { %v2292_v7 = vadd.f32 %v2290_v6, %v2272_v5 }
 0x262   : > { %2293 = vst [vmem:[%s3691_s30] sm:$0xf] %v2292_v7 }
 0x263 PF: > { %s2707_s18 = sshll.u32 %s3407_s19, 6  ;;  %s2309_s1 = sshll.u32 %s3691_s30, 4  ;;  %s2310_s1 = int_to_ptr.vmem [resolvable:$true] %s2309_s1 }
 0x264   : > { %s4014_s24 = scalar_lea.hbm %s4075_s3, %s2707_s18  ;;  %s2295_s5 = scalar_lea.sflag [#allocation5], %s3674_s25 }
 0x265   : > { %s3293_s11 = scalar_lea.vmem %s2310_s1, 64  ;;  %p4100_p9 = scmp.ne.s32.totalorder %s4093_s9, 0 }
 0x266   : > { %p3294_p0 = scmp.ne.s32.totalorder %s2310_s1, %s3293_s11  ;;  %s3429_s4 = smov [#allocation8]  }
 0x267   : > { %s3297_s7 = sshll.u32 %s3429_s4, 4  ;;  %s3298_s7 = int_to_ptr.vmem [resolvable:$false] %s3297_s7 }
 0x268   : > { %p3295_p12 = pnand %p3294_p0, %p4100_p9  ;;  %s3299_s10 = scalar_lea.vmem %s3298_s7, 128 }
 0x269   : > { %p3300_p3 = scmp.lt.s32.totalorder %s2310_s1, %s3298_s7  ;;  %p3301_p11 = scmp.lt.s32.totalorder %s3299_s10, %s3293_s11 }
 0x26a   : > { %p3296_p10 = pneg %p3295_p12 }
 0x26b   : > { %p3302_p2 = por %p3301_p11, %p3300_p3 }
 0x26d   : > { %p3303_p4 = pnand %p3302_p2, %p3296_p10 }
 0x26f   : > { %3306 = shalt.err (!%p3303_p4)
}
 0x270   : > { %s3307_s19 = scalar_lea.hbm %s4014_s24, 64  ;;  %s3311_s8 = scalar_lea.hbm %s4075_s3, 128 }
 0x271   : > { %p3308_p8 = scmp.ne.s32.totalorder %s4014_s24, %s3307_s19  ;;  %p3312_p1 = scmp.lt.u32.totalorder %s4014_s24, %s4075_s3 }
 0x272   : > { %p3313_p7 = scmp.lt.u32.totalorder %s3311_s8, %s3307_s19  ;;  %p3315_p0 = scmp.lt.u32.totalorder %s3307_s19, %s4014_s24 }
 0x273   : > { %p3309_p13 = pnand %p3308_p8, %p4100_p9 }
 0x274   : > { %p3314_p5 = por %p3313_p7, %p3312_p1 }
 0x275   : > { %p3310_p6 = pneg %p3309_p13 }
 0x276   : > { %p3316_p12 = por %p3315_p0, %p3314_p5 }
 0x278   : > { %p3317_p10 = pnand %p3316_p12, %p3310_p6 }
 0x27a   : > { %3320 = shalt.err (!%p3317_p10)
}
 0x27b   : > { %2738 = dma.vmem_to_hbm [thread:$0]  (%p4100_p9), %s2310_s1, 64, %s4014_s24, %s2295_s5  }
 0x27c PF: > { %p2752_p3 = scmp.ge.s32.totalorder %s3419_s22, 2  ;;  %s2321_s18 = sand.u32 1, %s3379_s12  }
 0x27d   : > { %p4101_p11 = scmp.ne.s32.totalorder %s4095_s6, 0  ;;  %s2322_s15 = scalar_lea.sflag [#allocation5], %s2321_s18 }
 0x27f   : > { %p2748_p2 = pnand %p2752_p3, %p4101_p11 }
 0x281   : > { %3374 = dma.done.wait (!%p2748_p2), %s2322_s15, 64  }
 0x282   : > { %3376 = vsyncadd (!%p2748_p2), %s2322_s15, 4294967232  ;;  %s22_s22 = sadd.s32 1, %s3419_s22   ;;  %s4102_s9 = sld [smem:[#allocation12_spill]] }
 0x283   : > { %p19_p4 = scmp.ge.s32.totalorder %s22_s22, 34   ;;  %s4103_s26 = sld [smem:[#allocation13_spill]] }
 0x284   : > { %s4104_s12 = smov %s3383_s13  ;;  %s4105_s13 = smov %s3387_s14 }
 0x285   : > { %s4106_s14 = smov %s3608_s28  ;;  %s4107_s15 = smov %s3395_s16 }
 0x286   : > { %s4108_s16 = smov %s3399_s17  ;;  %s4109_s17 = smov %s3613_s27 }
 0x287   : > { %s4110_s18 = smov %s3411_s20  ;;  %s4111_s19 = smov %s3415_s21 }
 0x288   : > { %s4112_s20 = smov %s4102_s9  ;;  %21 = sbr.rel (!%p19_p4) target bundleno = 13 (0xd), region = 101 }
 0x289   : > { %s4113_s21 = smov %s4103_s26 }
 0x28f   :  { %2327 = vsyncpa [#allocation4], 1 }
 0x290   :  { %2329 = vsyncpa [#allocation4 + $0x1], 1 }
 0x291   :  { %2330 = vsyncpa [#allocation7], 1 }
 0x292   :  { %2332 = vsyncpa [#allocation7 + $0x1], 1 }
 0x293   :  { %2333 = vsyncpa [#allocation5], 1 }
 0x294   :  { %2335 = vsyncpa [#allocation5 + $0x1], 1 }

</bundles_post_ra>
